<compile_context>
chip_gen: v6e
topology: v6e:2x2x1
jax: 0.10.0
libtpu: 0.0.40
codegen_flags: <defaults>
</compile_context>

<pallas_src>
import jax
import jax.numpy as jnp
from jax.experimental import pallas as pl
from jax.experimental.pallas import tpu as pltpu

NOISE_DIM = 100
NOISE_DIM_PAD = 128          # lane-aligned noise width (zero padded)
EMBED_DIM = 768
IMAGE_DIM = 64 * 64          # 4096
H1, H2 = 256, 512
TN = 2048                    # layer-3 output tile -> grid of 2 steps
B_SUBLANE = 8                # f32 sublane height; batch padded to a multiple


def _generator_kernel(noise_ref, emb_ref,
                      w1n_ref, w1e_ref, b1_ref,
                      w2_ref, b2_ref,
                      w3q_ref, s3_ref, b3_ref,
                      out_ref):
    j = pl.program_id(0)

    # --- L2-normalize the embedding along the feature axis (torch.norm, dim=1).
    # No epsilon, matching the raw `emb / emb.norm()` in the PyTorch module.
    emb = emb_ref[...]
    inv_norm = jax.lax.rsqrt(jnp.sum(emb * emb, axis=-1, keepdims=True))
    emb_n = (emb * inv_norm).astype(jnp.bfloat16)
    noise = noise_ref[...].astype(jnp.bfloat16)

    # --- Layer 1: Linear(100+768 -> 256) + ReLU (concat folded into split matmul).
    # bf16 x bf16 MXU dots, f32 accumulation.
    h = jnp.dot(noise, w1n_ref[...], preferred_element_type=jnp.float32)
    h = h + jnp.dot(emb_n, w1e_ref[...], preferred_element_type=jnp.float32)
    h = jnp.maximum(h + b1_ref[...], 0.0)

    # --- Layer 2: Linear(256 -> 512) + ReLU ---
    h = jnp.dot(h.astype(jnp.bfloat16), w2_ref[...],
                preferred_element_type=jnp.float32)
    h = jnp.maximum(h + b2_ref[...], 0.0)

    # --- Layer 3 (tiled): int8 W3 tile -> bf16 (exact), MXU dot, then apply the
    # per-output-column f32 dequant scale to the f32 result, bias, tanh.
    w3 = w3q_ref[...].astype(jnp.float32).astype(jnp.bfloat16)
    z = jnp.dot(h.astype(jnp.bfloat16), w3, preferred_element_type=jnp.float32)

    col = pl.multiple_of(j * TN, TN)
    scale = s3_ref[:, pl.ds(col, TN)]
    bias = b3_ref[:, pl.ds(col, TN)]
    out_ref[...] = jnp.tanh(z * scale + bias)


def generator_forward(noise, embedding, params):
    """noise: (B, 100) f32; embedding: (B, 768) f32 -> (B, 1, 64, 64) f32."""
    B = noise.shape[0]
    w1n, w1e, b1, w2, b2, w3q, s3, b3 = params

    # Pad batch to a sublane multiple; pad noise width 100 -> 128 with zeros.
    bp = ((B + B_SUBLANE - 1) // B_SUBLANE) * B_SUBLANE
    noise_p = jnp.zeros((bp, NOISE_DIM_PAD), jnp.float32).at[:B, :NOISE_DIM].set(noise)
    # Pad embedding rows with ones so the dummy rows don't produce 0/0 NaNs.
    emb_p = jnp.ones((bp, EMBED_DIM), jnp.float32).at[:B, :].set(embedding)

    def const(shape):
        # Resident across grid steps (constant index_map -> fetched once).
        return pl.BlockSpec(shape, lambda j: tuple(0 for _ in shape))

    out = pl.pallas_call(
        _generator_kernel,
        out_shape=jax.ShapeDtypeStruct((bp, IMAGE_DIM), jnp.float32),
        grid_spec=pltpu.PrefetchScalarGridSpec(
            num_scalar_prefetch=0,
            grid=(IMAGE_DIM // TN,),
            in_specs=[
                const(noise_p.shape),
                const(emb_p.shape),
                const(w1n.shape),
                const(w1e.shape),
                const(b1.shape),
                const(w2.shape),
                const(b2.shape),
                pl.BlockSpec((H2, TN), lambda j: (0, j)),   # streamed int8 W3 tile
                const(s3.shape),        # resident scales; sliced in-kernel
                const(b3.shape),        # resident bias; sliced in-kernel
            ],
            out_specs=pl.BlockSpec((bp, TN), lambda j: (0, j)),
        ),
        compiler_params=pltpu.CompilerParams(
            # No cross-step state -> the W3 stream can be sharded across both
            # TensorCores on v7x; harmless on single-TC v5e/v6e.
            dimension_semantics=("parallel",),
            vmem_limit_bytes=32 << 20,
        ),
    )(noise_p, emb_p, w1n, w1e, b1, w2, b2, w3q, s3, b3)

    # PyTorch: .view(-1, 1, 64, 64)  (NCHW)
    return out[:B].reshape(B, 1, 64, 64)


def init_params(key):
    """Deterministic init mimicking nn.Linear's U(-1/sqrt(fan_in), 1/sqrt(fan_in)).

    Weights are stored transposed relative to PyTorch, i.e. (in_features,
    out_features).  W1 is split across the concat boundary (noise block
    zero-padded to 128 rows) and stored bf16 along with W2; W3 is stored as
    int8 with per-output-column f32 scales; biases stay f32.
    """
    def linear(key, fan_in, fan_out):
        kw, kb = jax.random.split(key)
        bound = 1.0 / jnp.sqrt(fan_in)
        w = jax.random.uniform(kw, (fan_in, fan_out), jnp.float32, -bound, bound)
        b = jax.random.uniform(kb, (1, fan_out), jnp.float32, -bound, bound)
        return w, b

    k1, k2, k3 = jax.random.split(key, 3)
    w1, b1 = linear(k1, NOISE_DIM + EMBED_DIM, H1)
    w2, b2 = linear(k2, H1, H2)
    w3, b3 = linear(k3, H2, IMAGE_DIM)

    w1n = jnp.zeros((NOISE_DIM_PAD, H1), jnp.float32).at[:NOISE_DIM].set(w1[:NOISE_DIM])
    w1e = w1[NOISE_DIM:]

    # Symmetric per-output-column int8 quantization of W3.
    maxabs = jnp.max(jnp.abs(w3), axis=0, keepdims=True)            # (1, 4096)
    s3 = jnp.maximum(maxabs, 1e-8) / 127.0
    w3q = jnp.clip(jnp.round(w3 / s3), -127, 127).astype(jnp.int8)

    return (w1n.astype(jnp.bfloat16), w1e.astype(jnp.bfloat16), b1,
            w2.astype(jnp.bfloat16), b2,
            w3q, s3, b3)


def reference_forward(noise, embedding, params):
    """Pure-JAX (f32) reference of the PyTorch forward using the stored weights."""
    w1n, w1e, b1, w2, b2, w3q, s3, b3 = params
    w1n = w1n.astype(jnp.float32)[:NOISE_DIM]   # drop the zero-padded rows
    w1e = w1e.astype(jnp.float32)
    w2 = w2.astype(jnp.float32)
    w3 = w3q.astype(jnp.float32) * s3            # dequantized W3
    emb = embedding / jnp.linalg.norm(embedding, axis=1, keepdims=True)
    x = jnp.concatenate([noise, emb], axis=1)
    w1 = jnp.concatenate([w1n, w1e], axis=0)
    h = jnp.maximum(x @ w1 + b1, 0.0)
    h = jnp.maximum(h @ w2 + b2, 0.0)
    h = jnp.tanh(h @ w3 + b3)
    return h.reshape(-1, 1, 64, 64)


if __name__ == "__main__":
    key = jax.random.PRNGKey(0)
    k_noise, k_emb, k_params = jax.random.split(key, 3)

    B = 2  # small batch
    noise = jax.random.normal(k_noise, (B, NOISE_DIM), jnp.float32)
    embedding = jax.random.normal(k_emb, (B, EMBED_DIM), jnp.float32)
    params = init_params(k_params)

    out = jax.block_until_ready(generator_forward(noise, embedding, params))
    assert out.shape == (B, 1, 64, 64), out.shape
    assert out.dtype == jnp.float32, out.dtype

    ref = jax.block_until_ready(reference_forward(noise, embedding, params))
    max_err = float(jnp.max(jnp.abs(out - ref)))
    # Kernel rounds activations to bf16 between layers (weights/quantization are
    # identical in both paths; the layer-3 scale is applied in f32 post-MXU),
    # tanh output scale is O(0.1), so 2e-2 is a comfortable bound.
    assert max_err < 2e-2, max_err

    print("KERNEL_OK")
</pallas_src>

<mosaic_0001>
module attributes {stable_mosaic.version = 11 : i64} {
  func.func @_generator_kernel(%arg0: i32, %arg1: memref<8x128xf32, #tpu.memory_space<vmem>>, %arg2: memref<8x768xf32, #tpu.memory_space<vmem>>, %arg3: memref<128x256xbf16, #tpu.memory_space<vmem>>, %arg4: memref<768x256xbf16, #tpu.memory_space<vmem>>, %arg5: memref<1x256xf32, #tpu.memory_space<vmem>>, %arg6: memref<256x512xbf16, #tpu.memory_space<vmem>>, %arg7: memref<1x512xf32, #tpu.memory_space<vmem>>, %arg8: memref<512x2048xi8, #tpu.memory_space<vmem>>, %arg9: memref<1x4096xf32, #tpu.memory_space<vmem>>, %arg10: memref<1x4096xf32, #tpu.memory_space<vmem>>, %arg11: memref<8x2048xf32, #tpu.memory_space<vmem>>) attributes {dimension_semantics = [#tpu.dimension_semantics<parallel>], iteration_bounds = array<i64: 2>, scalar_prefetch = 0 : i64, scratch_operands = 0 : i64, tpu.core_type = #tpu.core_type<tc>, window_params = [{pipeline_mode = #tpu.pipeline_mode<synchronous>, transform_indices = @transform_0, window_bounds = array<i64: 8, 128>}, {pipeline_mode = #tpu.pipeline_mode<synchronous>, transform_indices = @transform_1, window_bounds = array<i64: 8, 768>}, {pipeline_mode = #tpu.pipeline_mode<synchronous>, transform_indices = @transform_2, window_bounds = array<i64: 128, 256>}, {pipeline_mode = #tpu.pipeline_mode<synchronous>, transform_indices = @transform_3, window_bounds = array<i64: 768, 256>}, {pipeline_mode = #tpu.pipeline_mode<synchronous>, transform_indices = @transform_4, window_bounds = array<i64: 1, 256>}, {pipeline_mode = #tpu.pipeline_mode<synchronous>, transform_indices = @transform_5, window_bounds = array<i64: 256, 512>}, {pipeline_mode = #tpu.pipeline_mode<synchronous>, transform_indices = @transform_6, window_bounds = array<i64: 1, 512>}, {transform_indices = @transform_7, window_bounds = array<i64: 512, 2048>}, {pipeline_mode = #tpu.pipeline_mode<synchronous>, transform_indices = @transform_8, window_bounds = array<i64: 1, 4096>}, {pipeline_mode = #tpu.pipeline_mode<synchronous>, transform_indices = @transform_9, window_bounds = array<i64: 1, 4096>}, {transform_indices = @transform_10, window_bounds = array<i64: 8, 2048>}]} {
    %c0 = arith.constant 0 : index
    %c0_0 = arith.constant 0 : index
    %0 = vector.load %arg2[%c0, %c0_0] : memref<8x768xf32, #tpu.memory_space<vmem>>, vector<8x768xf32>
    %1 = arith.mulf %0, %0 : vector<8x768xf32>
    %cst = arith.constant dense<0.000000e+00> : vector<8xf32>
    %2 = vector.multi_reduction <add>, %1, %cst [1] : vector<8x768xf32> to vector<8xf32>
    %3 = vector.shape_cast %2 : vector<8xf32> to vector<8x1xf32>
    %4 = math.rsqrt %3 : vector<8x1xf32>
    %5 = vector.broadcast %4 : vector<8x1xf32> to vector<8x768xf32>
    %6 = arith.mulf %0, %5 : vector<8x768xf32>
    %7 = arith.truncf %6 : vector<8x768xf32> to vector<8x768xbf16>
    %c0_1 = arith.constant 0 : index
    %c0_2 = arith.constant 0 : index
    %8 = vector.load %arg1[%c0_1, %c0_2] : memref<8x128xf32, #tpu.memory_space<vmem>>, vector<8x128xf32>
    %9 = arith.truncf %8 : vector<8x128xf32> to vector<8x128xbf16>
    %c0_3 = arith.constant 0 : index
    %c0_4 = arith.constant 0 : index
    %10 = vector.load %arg3[%c0_3, %c0_4] : memref<128x256xbf16, #tpu.memory_space<vmem>>, vector<128x256xbf16>
    %cst_5 = arith.constant dense<0.000000e+00> : vector<8x256xf32>
    %11 = tpu.matmul %9, %10, %cst_5 {dimension_numbers = #tpu.dot_dimension_numbers<[1], [0], [0], [1], [0, 0, 1, 1], [], []>} : vector<8x128xbf16>, vector<128x256xbf16>, vector<8x256xf32> -> vector<8x256xf32>
    %c0_6 = arith.constant 0 : index
    %c0_7 = arith.constant 0 : index
    %12 = vector.load %arg4[%c0_6, %c0_7] : memref<768x256xbf16, #tpu.memory_space<vmem>>, vector<768x256xbf16>
    %cst_8 = arith.constant dense<0.000000e+00> : vector<8x256xf32>
    %13 = tpu.matmul %7, %12, %cst_8 {dimension_numbers = #tpu.dot_dimension_numbers<[1], [0], [0], [1], [0, 0, 1, 1], [], []>} : vector<8x768xbf16>, vector<768x256xbf16>, vector<8x256xf32> -> vector<8x256xf32>
    %14 = arith.addf %11, %13 : vector<8x256xf32>
    %c0_9 = arith.constant 0 : index
    %c0_10 = arith.constant 0 : index
    %15 = vector.load %arg5[%c0_9, %c0_10] : memref<1x256xf32, #tpu.memory_space<vmem>>, vector<1x256xf32>
    %16 = vector.broadcast %15 : vector<1x256xf32> to vector<8x256xf32>
    %17 = arith.addf %14, %16 : vector<8x256xf32>
    %cst_11 = arith.constant 0.000000e+00 : f32
    %18 = vector.broadcast %cst_11 : f32 to vector<8x256xf32>
    %19 = arith.maximumf %17, %18 : vector<8x256xf32>
    %20 = arith.truncf %19 : vector<8x256xf32> to vector<8x256xbf16>
    %c0_12 = arith.constant 0 : index
    %c0_13 = arith.constant 0 : index
    %21 = vector.load %arg6[%c0_12, %c0_13] : memref<256x512xbf16, #tpu.memory_space<vmem>>, vector<256x512xbf16>
    %cst_14 = arith.constant dense<0.000000e+00> : vector<8x512xf32>
    %22 = tpu.matmul %20, %21, %cst_14 {dimension_numbers = #tpu.dot_dimension_numbers<[1], [0], [0], [1], [0, 0, 1, 1], [], []>} : vector<8x256xbf16>, vector<256x512xbf16>, vector<8x512xf32> -> vector<8x512xf32>
    %c0_15 = arith.constant 0 : index
    %c0_16 = arith.constant 0 : index
    %23 = vector.load %arg7[%c0_15, %c0_16] : memref<1x512xf32, #tpu.memory_space<vmem>>, vector<1x512xf32>
    %24 = vector.broadcast %23 : vector<1x512xf32> to vector<8x512xf32>
    %25 = arith.addf %22, %24 : vector<8x512xf32>
    %cst_17 = arith.constant 0.000000e+00 : f32
    %26 = vector.broadcast %cst_17 : f32 to vector<8x512xf32>
    %27 = arith.maximumf %25, %26 : vector<8x512xf32>
    %c0_18 = arith.constant 0 : index
    %c0_19 = arith.constant 0 : index
    %28 = vector.load %arg8[%c0_18, %c0_19] : memref<512x2048xi8, #tpu.memory_space<vmem>>, vector<512x2048xi8>
    %29 = arith.sitofp %28 : vector<512x2048xi8> to vector<512x2048xf32>
    %30 = arith.truncf %29 : vector<512x2048xf32> to vector<512x2048xbf16>
    %31 = arith.truncf %27 : vector<8x512xf32> to vector<8x512xbf16>
    %cst_20 = arith.constant dense<0.000000e+00> : vector<8x2048xf32>
    %32 = tpu.matmul %31, %30, %cst_20 {dimension_numbers = #tpu.dot_dimension_numbers<[1], [0], [0], [1], [0, 0, 1, 1], [], []>} : vector<8x512xbf16>, vector<512x2048xbf16>, vector<8x2048xf32> -> vector<8x2048xf32>
    %c2048_i32 = arith.constant 2048 : i32
    %33 = arith.muli %arg0, %c2048_i32 : i32
    %34 = tpu.assume_multiple %33, 2048 : i32
    %c0_21 = arith.constant 0 : index
    %35 = arith.index_cast %34 : i32 to index
    %36 = vector.load %arg9[%c0_21, %35] : memref<1x4096xf32, #tpu.memory_space<vmem>>, vector<1x2048xf32>
    %c0_22 = arith.constant 0 : index
    %37 = arith.index_cast %34 : i32 to index
    %38 = vector.load %arg10[%c0_22, %37] : memref<1x4096xf32, #tpu.memory_space<vmem>>, vector<1x2048xf32>
    %39 = vector.broadcast %36 : vector<1x2048xf32> to vector<8x2048xf32>
    %40 = arith.mulf %32, %39 : vector<8x2048xf32>
    %41 = vector.broadcast %38 : vector<1x2048xf32> to vector<8x2048xf32>
    %42 = arith.addf %40, %41 : vector<8x2048xf32>
    %43 = math.tanh %42 : vector<8x2048xf32>
    %c0_23 = arith.constant 0 : index
    %c0_24 = arith.constant 0 : index
    %44 = vector.load %arg11[%c0_23, %c0_24] : memref<8x2048xf32, #tpu.memory_space<vmem>>, vector<8x2048xf32>
    tpu.vector_store %arg11[%c0_23, %c0_24], %43 {strides = array<i32>} : memref<8x2048xf32, #tpu.memory_space<vmem>>, vector<8x2048xf32>,
    return
  }
  func.func @transform_0(%arg0: i32) -> (i32, i32) {
    %c0_i32 = arith.constant 0 : i32
    %c0_i32_0 = arith.constant 0 : i32
    %c0_i32_1 = arith.constant 0 : i32
    return %c0_i32, %c0_i32_0 : i32, i32
  }
  func.func @transform_1(%arg0: i32) -> (i32, i32) {
    %c0_i32 = arith.constant 0 : i32
    %c0_i32_0 = arith.constant 0 : i32
    %c0_i32_1 = arith.constant 0 : i32
    return %c0_i32, %c0_i32_0 : i32, i32
  }
  func.func @transform_2(%arg0: i32) -> (i32, i32) {
    %c0_i32 = arith.constant 0 : i32
    %c0_i32_0 = arith.constant 0 : i32
    %c0_i32_1 = arith.constant 0 : i32
    return %c0_i32, %c0_i32_0 : i32, i32
  }
  func.func @transform_3(%arg0: i32) -> (i32, i32) {
    %c0_i32 = arith.constant 0 : i32
    %c0_i32_0 = arith.constant 0 : i32
    %c0_i32_1 = arith.constant 0 : i32
    return %c0_i32, %c0_i32_0 : i32, i32
  }
  func.func @transform_4(%arg0: i32) -> (i32, i32) {
    %c0_i32 = arith.constant 0 : i32
    %c0_i32_0 = arith.constant 0 : i32
    %c0_i32_1 = arith.constant 0 : i32
    return %c0_i32, %c0_i32_0 : i32, i32
  }
  func.func @transform_5(%arg0: i32) -> (i32, i32) {
    %c0_i32 = arith.constant 0 : i32
    %c0_i32_0 = arith.constant 0 : i32
    %c0_i32_1 = arith.constant 0 : i32
    return %c0_i32, %c0_i32_0 : i32, i32
  }
  func.func @transform_6(%arg0: i32) -> (i32, i32) {
    %c0_i32 = arith.constant 0 : i32
    %c0_i32_0 = arith.constant 0 : i32
    %c0_i32_1 = arith.constant 0 : i32
    return %c0_i32, %c0_i32_0 : i32, i32
  }
  func.func @transform_7(%arg0: i32) -> (i32, i32) {
    %c0_i32 = arith.constant 0 : i32
    %c0_i32_0 = arith.constant 0 : i32
    return %c0_i32, %arg0 : i32, i32
  }
  func.func @transform_8(%arg0: i32) -> (i32, i32) {
    %c0_i32 = arith.constant 0 : i32
    %c0_i32_0 = arith.constant 0 : i32
    %c0_i32_1 = arith.constant 0 : i32
    return %c0_i32, %c0_i32_0 : i32, i32
  }
  func.func @transform_9(%arg0: i32) -> (i32, i32) {
    %c0_i32 = arith.constant 0 : i32
    %c0_i32_0 = arith.constant 0 : i32
    %c0_i32_1 = arith.constant 0 : i32
    return %c0_i32, %c0_i32_0 : i32, i32
  }
  func.func @transform_10(%arg0: i32) -> (i32, i32) {
    %c0_i32 = arith.constant 0 : i32
    %c0_i32_0 = arith.constant 0 : i32
    return %c0_i32, %arg0 : i32, i32
  }
}

</mosaic_0001>

<bundles_post_ra>
// kernel: tpu_custom_call.1
= control target key start
LH: loop header
LB: loop body
LE: loop exit
PB: predicated region body
PF: predicated region fallthrough
CT: control target
= control target key end

     0   :  { %s5541_s0 = inlined_call_operand.hbm [shape: f32[8,128], index: 0, kind: input, shape index: {}]   ;;  %s5542_s1 = inlined_call_operand.hbm [shape: f32[8,768], index: 1, kind: input, shape index: {}]   ;;  %s5543_s2 = inlined_call_operand.hbm [shape: bf16[128,256], index: 2, kind: input, shape index: {}]   ;;  %s5544_s3 = inlined_call_operand.hbm [shape: bf16[768,256], index: 3, kind: input, shape index: {}]   ;;  %s5545_s4 = inlined_call_operand.hbm [shape: f32[1,256], index: 4, kind: input, shape index: {}]   ;;  %s5546_s5 = inlined_call_operand.hbm [shape: bf16[256,512], index: 5, kind: input, shape index: {}]   ;;  %s5547_s6 = inlined_call_operand.hbm [shape: f32[1,512], index: 6, kind: input, shape index: {}]   ;;  %s5548_s7 = inlined_call_operand.hbm [shape: s8[512,4096], index: 7, kind: input, shape index: {}]   ;;  %s5549_s8 = inlined_call_operand.hbm [shape: f32[1,4096], index: 8, kind: input, shape index: {}]   ;;  %s5550_s9 = inlined_call_operand.hbm [shape: f32[1,4096], index: 9, kind: input, shape index: {}]   ;;  %s5551_s10 = inlined_call_operand.hbm [shape: f32[8,4096], index: 10, kind: output, shape index: {}]  }
   0x1   :  { %5558 = sst [smem:[#allocation28_spill]] %s5541_s0 }
   0x2   :  { %5559 = sst [smem:[#allocation29_spill]] %s5542_s1 }
   0x3   :  { %5560 = sst [smem:[#allocation30_spill]] %s5543_s2 }
   0x4   :  { %5561 = sst [smem:[#allocation31_spill]] %s5544_s3 }
   0x5   :  { %5562 = sst [smem:[#allocation32_spill]] %s5545_s4 }
   0x6   :  { %15 = vsyncpa [#allocation3], 0 }
   0x7   :  { %16 = vsyncpa [#allocation6], 0 }
   0x8   :  { %17 = vsyncpa [#allocation9], 0 }
   0x9   :  { %18 = vsyncpa [#allocation12], 0 }
   0xa   :  { %19 = vsyncpa [#allocation15], 0 }
   0xb   :  { %21 = vsyncpa [#allocation15 + $0x1], 0 }
   0xc   :  { %22 = vsyncpa [#allocation18], 0 }
   0xd   :  { %23 = vsyncpa [#allocation4], 0 }
   0xe   :  { %25 = vsyncpa [#allocation4 + $0x1], 0  ;;  %s4800_s13 = smov 0   ;;  %s4802_s14 = smov 0  }
   0xf   :  { %s4804_s15 = smov 0   ;;  %s4806_s16 = smov 0  }
  0x10 LB: > { %s4727_s17 = smov [#allocation5]   ;;  %s4821_s19 = sadd.s32 4294967295, %s4725_s16   ;;  %s4725_s16 = sphi %s4806_s16, %s5597_s16   ;;  %s4721_s15 = sphi %s4804_s15, %s5596_s15   ;;  %s4717_s14 = sphi %s4802_s14, %s5595_s14   ;;  %s4713_s13 = sphi %s4800_s13, %s5594_s13  }
  0x11   : > { %s301_s18 = sshll.u32 %s4727_s17, 4  ;;  %p3721_p0 = scmp.ge.s32.totalorder %s4725_s16, 1  ;;  %s302_s18 = int_to_ptr.vmem [resolvable:$true] %s301_s18 }
  0x12   : > { %p5554_p1 = scmp.eq.s32.totalorder %s4821_s19, 0  ;;  %p277_p2 = scmp.lt.s32.totalorder %s4725_s16, 3 }
  0x13   : > { %s4728_s21 = smov [#allocation8]   ;;  %s4729_s24 = smov [#allocation11]  }
  0x14   : > { %p4826_p3 = pnand %p3721_p0, %p277_p2  ;;  %s324_s22 = sshll.u32 %s4728_s21, 4  ;;  %s4839_s22 = int_to_ptr.vmem [resolvable:$true] %s324_s22 }
  0x15   : > { %s348_s25 = sshll.u32 %s4729_s24, 4  ;;  %s4386_s27 = scalar_lea.vmem %s302_s18, 768  ;;  %s4841_s25 = int_to_ptr.vmem [resolvable:$true] %s348_s25 }
  0x16   : > { %s5563_s20 = scalar_select %p4826_p3, 1, 0 }
  0x17   : > { %p3971_p5 = pneg %p4826_p3  ;;  %p4387_p8 = scmp.ne.s32.totalorder %s302_s18, %s4386_s27 }
  0x18   : > { %p4394_p11 = scmp.lt.s32.totalorder %s302_s18, %s302_s18  ;;  %p4395_p12 = scmp.lt.s32.totalorder %s4386_s27, %s4386_s27 }
  0x19   : > { %p4835_p6 = pnand %p3971_p5, %p5554_p1 }
  0x1a   : > { %p4396_p13 = por %p4395_p12, %p4394_p11 }
  0x1b   : > { %p4845_p7 = pneg %p4835_p6 }
  0x1d   : > { %p4389_p9 = pnand %p4387_p8, %p4845_p7 }
  0x1f   : > { %p4390_p10 = pneg %p4389_p9 }
  0x21   : > { %p4397_p0 = pnand %p4396_p13, %p4390_p10 }
  0x23   : > { %4400 = shalt.err (!%p4397_p0)
}
  0x24   : > { %s5566_s1 = sld [smem:[#allocation29_spill]]  ;;  %s4412_s30 = scalar_lea.vmem %s4839_s22, 12288 }
  0x25   : > { %p4413_p2 = scmp.ne.s32.totalorder %s4839_s22, %s4412_s30  ;;  %p4420_p9 = scmp.lt.s32.totalorder %s4839_s22, %s4839_s22 }
  0x26   : > { %p4421_p11 = scmp.lt.s32.totalorder %s4412_s30, %s4412_s30 }
  0x27   : > { %p4415_p5 = pnand %p4413_p2, %p4845_p7 }
  0x28   : > { %p4422_p10 = por %p4421_p11, %p4420_p9 }
  0x29   : > { %p4416_p8 = pneg %p4415_p5 }
  0x2a   : > { %3977 = dma.hbm_to_vmem [thread:$0]  (!%p4835_p6), %s5566_s1, 768, %s302_s18, [#allocation6]  }
  0x2b   : > { %p4423_p12 = pnand %p4422_p10, %p4416_p8 }
  0x2d   : > { %4426 = shalt.err (!%p4423_p12)
}
  0x2e   : > { %s5552_s11 = smov 128   ;;  %s4731_s12 = smov 8  }
  0x2f   : > { %s5567_s3 = sld [smem:[#allocation31_spill]]  ;;  %s4438_s21 = scalar_lea.vmem %s4841_s25, 8192 }
  0x30   : > { %p4439_p13 = scmp.ne.s32.totalorder %s4841_s25, %s4438_s21  ;;  %p4446_p5 = scmp.lt.s32.totalorder %s4841_s25, %s4841_s25 }
  0x31   : > { %p4447_p8 = scmp.lt.s32.totalorder %s4438_s21, %s4438_s21 }
  0x32   : > { %p4441_p0 = pnand %p4439_p13, %p4845_p7 }
  0x33   : > { %p4448_p9 = por %p4447_p8, %p4446_p5 }
  0x34   : > { %p4442_p2 = pneg %p4441_p0 }
  0x35   : > { %3983 = dma.hbm_to_vmem [thread:$0]  (!%p4835_p6), %s5567_s3, 12288, %s4839_s22, [#allocation9], %s5552_s11, %s5552_s11, %s4731_s12  }
  0x36   : > { %p4449_p11 = pnand %p4448_p9, %p4442_p2 }
  0x38   : > { %4452 = shalt.err (!%p4449_p11)
}
  0x39   : > { %s4732_s24 = smov 256   ;;  %s4733_s27 = smov 16  }
  0x3a   : > { %3989 = dma.hbm_to_vmem [thread:$0]  (!%p4835_p6), %s5546_s5, 8192, %s4841_s25, [#allocation12], %s4732_s24, %s4732_s24, %s4733_s27  }
  0x3b   : > { %s4734_s22 = smov [#allocation16]   ;;  %s4735_s17 = smov [#allocation2]  }
  0x3c   : > { %s373_s30 = sshll.u32 %s4734_s22, 4  ;;  %s290_s18 = sshll.u32 %s4735_s17, 4  ;;  %s374_s30 = int_to_ptr.vmem [resolvable:$true] %s373_s30  ;;  %s291_s18 = int_to_ptr.vmem [resolvable:$true] %s290_s18 }
  0x3d   : > { %s4464_s11 = scalar_lea.vmem %s374_s30, 512  ;;  %p4472_p0 = scmp.lt.s32.totalorder %s374_s30, %s374_s30 }
  0x3e   : > { %p4465_p10 = scmp.ne.s32.totalorder %s374_s30, %s4464_s11  ;;  %p4473_p2 = scmp.lt.s32.totalorder %s4464_s11, %s4464_s11 }
  0x40   : > { %p4467_p12 = pnand %p4465_p10, %p4845_p7  ;;  %p4474_p5 = por %p4473_p2, %p4472_p0 }
  0x42   : > { %p4468_p13 = pneg %p4467_p12 }
  0x44   : > { %p4475_p8 = pnand %p4474_p5, %p4468_p13 }
  0x46   : > { %4478 = shalt.err (!%p4475_p8)
}
  0x47   : > { %3995 = dma.hbm_to_vmem [thread:$0]  (!%p4835_p6), %s5549_s8, 512, %s374_s30, [#allocation15]  }
  0x48   : > { %s4490_s25 = scalar_lea.vmem %s291_s18, 128  ;;  %p4498_p10 = scmp.lt.s32.totalorder %s291_s18, %s291_s18 }
  0x49   : > { %p4491_p9 = scmp.ne.s32.totalorder %s291_s18, %s4490_s25  ;;  %p4499_p12 = scmp.lt.s32.totalorder %s4490_s25, %s4490_s25 }
  0x4b   : > { %p4493_p11 = pnand %p4491_p9, %p4845_p7  ;;  %p4500_p1 = por %p4499_p12, %p4498_p10 }
  0x4d   : > { %p4494_p4 = pneg %p4493_p11 }
  0x4f   : > { %p4501_p3 = pnand %p4500_p1, %p4494_p4 }
  0x51   : > { %4504 = shalt.err (!%p4501_p3)
}
  0x52   : > { %s5568_s0 = sld [smem:[#allocation28_spill]]  ;;  %s4736_s27 = smov [#allocation7]  }
  0x53   : > { %s311_s29 = sshll.u32 %s4736_s27, 4  ;;  %s4737_s22 = smov [#allocation10]   ;;  %s312_s29 = int_to_ptr.vmem [resolvable:$true] %s311_s29 }
  0x54   : > { %s338_s30 = sshll.u32 %s4737_s22, 4  ;;  %s4516_s17 = scalar_lea.vmem %s312_s29, 2048  ;;  %s339_s30 = int_to_ptr.vmem [resolvable:$true] %s338_s30 }
  0x55   : > { %p4517_p13 = scmp.ne.s32.totalorder %s312_s29, %s4516_s17  ;;  %p4524_p5 = scmp.lt.s32.totalorder %s312_s29, %s312_s29 }
  0x56   : > { %p4525_p1 = scmp.lt.s32.totalorder %s4516_s17, %s4516_s17 }
  0x57   : > { %p4519_p0 = pnand %p4517_p13, %p4845_p7 }
  0x58   : > { %3974 = dma.hbm_to_vmem [thread:$0]  (!%p4835_p6), %s5568_s0, 128, %s291_s18, [#allocation3]  }
  0x59   : > { %p4520_p2 = pneg %p4519_p0  ;;  %p4526_p3 = por %p4525_p1, %p4524_p5 }
  0x5b   : > { %p4527_p4 = pnand %p4526_p3, %p4520_p2 }
  0x5d   : > { %4530 = shalt.err (!%p4527_p4)
}
  0x5e   : > { %s5569_s21 = smov 128   ;;  %s5570_s2 = sld [smem:[#allocation30_spill]] }
  0x5f   : > { %s4542_s25 = scalar_lea.vmem %s339_s30, 32  ;;  %p4550_p10 = scmp.lt.s32.totalorder %s339_s30, %s339_s30 }
  0x60   : > { %p4543_p8 = scmp.ne.s32.totalorder %s339_s30, %s4542_s25  ;;  %p4551_p12 = scmp.lt.s32.totalorder %s4542_s25, %s4542_s25 }
  0x62   : > { %p4545_p9 = pnand %p4543_p8, %p4845_p7  ;;  %p4552_p13 = por %p4551_p12, %p4550_p10 }
  0x64   : > { %3980 = dma.hbm_to_vmem [thread:$0]  (!%p4835_p6), %s5570_s2, 2048, %s312_s29, [#allocation6], %s5569_s21, %s5569_s21, %s4731_s12  }
  0x65   : > { %p4546_p11 = pneg %p4545_p9 }
  0x67   : > { %p4553_p0 = pnand %p4552_p13, %p4546_p11 }
  0x69   : > { %4556 = shalt.err (!%p4553_p0)
}
  0x6a   : > { %s5571_s4 = sld [smem:[#allocation32_spill]]  ;;  %s4738_s27 = smov [#allocation13]  }
  0x6b   : > { %s362_s12 = sshll.u32 %s4738_s27, 4  ;;  %s4739_s29 = smov [#allocation17]   ;;  %s363_s12 = int_to_ptr.vmem [resolvable:$true] %s362_s12 }
  0x6c   : > { %s384_s22 = sshll.u32 %s4739_s29, 4  ;;  %s4568_s17 = scalar_lea.vmem %s363_s12, 64  ;;  %s385_s22 = int_to_ptr.vmem [resolvable:$true] %s384_s22 }
  0x6d   : > { %p4569_p2 = scmp.ne.s32.totalorder %s363_s12, %s4568_s17  ;;  %p4576_p3 = scmp.lt.s32.totalorder %s363_s12, %s363_s12 }
  0x6e   : > { %p4577_p4 = scmp.lt.s32.totalorder %s4568_s17, %s4568_s17 }
  0x6f   : > { %p4571_p5 = pnand %p4569_p2, %p4845_p7 }
  0x70   : > { %3986 = dma.hbm_to_vmem [thread:$0]  (!%p4835_p6), %s5571_s4, 32, %s339_s30, [#allocation9]  }
  0x71   : > { %p4572_p1 = pneg %p4571_p5  ;;  %p4578_p8 = por %p4577_p4, %p4576_p3 }
  0x73   : > { %p4579_p9 = pnand %p4578_p8, %p4572_p1 }
  0x75   : > { %4582 = shalt.err (!%p4579_p9)
}
  0x76   : > { %3992 = dma.hbm_to_vmem [thread:$0]  (!%p4835_p6), %s5547_s6, 64, %s363_s12, [#allocation12]  }
  0x77   : > { %s4594_s30 = scalar_lea.vmem %s385_s22, 512  ;;  %p4602_p13 = scmp.lt.s32.totalorder %s385_s22, %s385_s22 }
  0x78   : > { %p4595_p11 = scmp.ne.s32.totalorder %s385_s22, %s4594_s30  ;;  %p4603_p0 = scmp.lt.s32.totalorder %s4594_s30, %s4594_s30 }
  0x7a   : > { %p4597_p10 = pnand %p4595_p11, %p4845_p7  ;;  %p4604_p2 = por %p4603_p0, %p4602_p13 }
  0x7c   : > { %p4598_p12 = pneg %p4597_p10 }
  0x7e   : > { %p4605_p5 = pnand %p4604_p2, %p4598_p12 }
  0x80   : > { %4608 = shalt.err (!%p4605_p5)
}
  0x81   : > { %3998 = dma.hbm_to_vmem [thread:$0]  (!%p4835_p6), %s5550_s9, 512, %s385_s22, [#allocation18]  }
  0x82   : > { %s3720_s26 = sadd.s32 4294967294, %s4725_s16   ;;  %s4930_s23 = sadd.s32 1, %s4725_s16  }
  0x83   : > { %s185_s24 = sadd.s32 1, %s4721_s15  ;;  %s182_s27 = ssub.s32 %s4725_s16, %s4930_s23 }
  0x84   : > { %p192_p7 = scmp.ne.s32.totalorder %s4721_s15, %s4717_s14  ;;  %p183_p1 = scmp.eq.s32.totalorder %s182_s27, 0 }
  0x85   : > { %p193_p3 = scmp.eq.s32.totalorder %s4725_s16, 0  ;;  %p198_p4 = scmp.ne.s32.totalorder %s4717_s14, %s4713_s13 }
  0x86   : > { %p264_p8 = scmp.eq.s32.totalorder %s4821_s19, 1  ;;  %p5572_p11 = scmp.eq.s32.totalorder %s4821_s19, 0 }
  0x87   : > { %s4942_s12 = scalar_select %p183_p1, %s4721_s15, %s185_s24  }
  0x88   : > { %p194_p9 = por %p193_p3, %p192_p7  ;;  %p4946_p10 = por %p5572_p11, %p198_p4 }
  0x89   : > { %p4950_p6 = por %p264_p8, %p192_p7  ;;  %p270_p12 = scmp.eq.s32.totalorder %s3720_s26, 1 }
  0x8a   : > { %s5573_s29 = scalar_select %p4946_p10, 1, 0 }
  0x8b   : > { %s5574_s22 = scalar_select %p4950_p6, 1, 0 }
  0x8c   : > { %p4016_p13 = scmp.lt.s32.totalorder %s4725_s16, 2  ;;  %s395_s17 = sand.u32 1, %s4725_s16  }
  0x8d   : > { %p4956_p0 = por %p270_p12, %p198_p4  ;;  %s397_s28 = sand.u32 1, %s4721_s15  }
  0x8e   : > { %s3929_s30 = sshll.u32 %s4725_s16, 11  ;;  %s3732_s25 = sshll.u32 %s397_s28, 11 }
  0x8f   : > { %s5575_s18 = scalar_select %p4956_p0, 1, 0 }
  0x90   : > { %s4965_s27 = scalar_lea.hbm %s5548_s7, %s3929_s30  ;;  %p4967_p2 = pnand %p4016_p13, %p194_p9 }
  0x91   : > { %s399_s26 = scalar_lea.vmem [#allocation14], %s3732_s25  ;;  %s4973_s2 = scalar_lea.sflag [#allocation15], %s395_s17 }
  0x92   : > { %s406_s1 = sshll.u32 %s399_s26, 4  ;;  %s4609_s28 = scalar_lea.hbm %s4965_s27, 32768  ;;  %s4971_s1 = int_to_ptr.vmem [resolvable:$true] %s406_s1 }
  0x93   : > { %p4610_p5 = scmp.ne.s32.totalorder %s4965_s27, %s4609_s28  ;;  %p4611_p7 = pneg %p4967_p2 }
  0x94   : > { %s4614_s24 = scalar_lea.hbm %s5548_s7, 65536  ;;  %p4615_p4 = scmp.lt.s32.totalorder %s4965_s27, %s5548_s7 }
  0x95   : > { %p4612_p1 = pnand %p4611_p7, %p4610_p5  ;;  %p4616_p8 = scmp.lt.s32.totalorder %s4614_s24, %s4609_s28 }
  0x97   : > { %p4613_p3 = pneg %p4612_p1  ;;  %p4617_p9 = por %p4616_p8, %p4615_p4 }
  0x99   : > { %p4618_p11 = pnand %p4617_p9, %p4613_p3 }
  0x9b   : > { %4621 = shalt.err (!%p4618_p11)
}
  0x9c   : > { %s4622_s17 = scalar_lea.vmem %s4971_s1, 32768  ;;  %s4740_s25 = smov [#allocation14]  }
  0x9d   : > { %p4623_p12 = scmp.ne.s32.totalorder %s4971_s1, %s4622_s17  ;;  %s4627_s26 = sshll.u32 %s4740_s25, 4  ;;  %s4628_s26 = int_to_ptr.vmem [resolvable:$false] %s4627_s26 }
  0x9e   : > { %s4629_s30 = scalar_lea.vmem %s4628_s26, 65536  ;;  %p4630_p1 = scmp.lt.s32.totalorder %s4971_s1, %s4628_s26 }
  0x9f   : > { %p4625_p13 = pnand %p4623_p12, %p4611_p7  ;;  %p4631_p0 = scmp.lt.s32.totalorder %s4629_s30, %s4622_s17 }
  0xa1   : > { %p4626_p5 = pneg %p4625_p13  ;;  %p4632_p6 = por %p4631_p0, %p4630_p1 }
  0xa3   : > { %p4633_p10 = pnand %p4632_p6, %p4626_p5 }
  0xa5   : > { %4636 = shalt.err (!%p4633_p10)
}
  0xa6   : > { %s4741_s3 = smov 4096   ;;  %s4742_s4 = smov 2048  }
  0xa7   : > { %4002 = dma.hbm_to_vmem [thread:$0]  (!%p4967_p2), %s4965_s27, 32768, %s4971_s1, %s4973_s2, %s4741_s3, %s4742_s4, %s5569_s21  }
  0xa8   : > { %p5577_p7 = scmp.ne.s32.totalorder %s5563_s20, 0 }
  0xa9   : > { %p5578_p3 = scmp.eq.s32.totalorder (!%p5577_p7), %s4821_s19, 0 }
  0xaa   : > { %418 = sbr.rel (%p5577_p7) target bundleno = 1515 (0x5eb), region = 60 }
  0xaf   : > { %4680 = dma.done.wait (%p5578_p3), [#allocation3], 128   ;;  %p5579_p4 = pmov %p5578_p3 }
  0xb0   : > { %p5580_p10 = pmov %p5578_p3 }
  0xb1   : > { %4682 = vsyncadd (%p5579_p4), [#allocation3], 4294967168 }
  0xb2   : > { %4684 = dma.done.wait (%p5580_p10), [#allocation6], 2816   ;;  %p5581_p6 = pmov %p5578_p3 }
  0xb3   : > { %p5582_p0 = pmov %p5578_p3 }
  0xb4   : > { %4686 = vsyncadd (%p5581_p6), [#allocation6], 4294964480 }
  0xb5   : > { %4688 = dma.done.wait (%p5582_p0), [#allocation9], 12320   ;;  %p5583_p2 = pmov %p5582_p0 }
  0xb6   : > { %p5584_p8 = pmov %p5582_p0 }
  0xb7   : > { %4690 = vsyncadd (%p5583_p2), [#allocation9], 4294954976 }
  0xb8   : > { %4692 = dma.done.wait (%p5584_p8), [#allocation12], 8256   ;;  %p5585_p9 = pmov %p5582_p0 }
  0xb9   : > { %s448_s0 = sand.u32 1, %s4821_s19   ;;  %s5015_s1 = sand.u32 1, %s4717_s14  }
  0xba   : > { %4694 = vsyncadd (%p5585_p9), [#allocation12], 4294959040  ;;  %s3743_s2 = sshll.u32 %s5015_s1, 11  ;;  %s449_s20 = scalar_lea.sflag [#allocation15], %s448_s0 }
  0xbb   : > { %s5018_s21 = scalar_lea.vmem [#allocation14], %s3743_s2  ;;  %p5586_p11 = scmp.ne.s32.totalorder %s5573_s29, 0 }
  0xbd   : > { %4696 = dma.done.wait (%p5586_p11), %s449_s20, 32768  }
  0xbe   : > { %4698 = vsyncadd (%p5586_p11), %s449_s20, 4294934528  ;;  %p5587_p12 = pmov %p5582_p0 }
  0xbf   : > { %p5588_p13 = pmov %p5582_p0 }
  0xc0   : > { %4700 = dma.done.wait (%p5587_p12), [#allocation15], 512  }
  0xc1   : > { %4702 = vsyncadd (%p5588_p13), [#allocation15], 4294966784  ;;  %p5589_p5 = pmov %p5582_p0 }
  0xc2   : > { %p5590_p1 = pmov %p5582_p0 }
  0xc3   : > { %4704 = dma.done.wait (%p5589_p5), [#allocation18], 512  }
  0xc4   : > { %4706 = vsyncadd (%p5590_p1), [#allocation18], 4294966784  ;;  %v5032_v0 = vld [vmem:[#allocation5] sm:$0xff]  ;;  %v5034_v1 = vld [vmem:[#allocation5 + $0x8] sm:$0xff]  ;;  %s3923_s29 = sshll.u32 %s4821_s19, 11  ;;  %s3746_s24 = sshll.u32 %s5015_s1, 7 }
  0xc5   : > { %v5036_v2 = vld [vmem:[#allocation5 + $0x10] sm:$0xff]  ;;  %v5038_v3 = vld [vmem:[#allocation5 + $0x18] sm:$0xff]  ;;  %v5040_v4 = vld [vmem:[#allocation5 + $0x20] sm:$0xff]  ;;  %v506_v5 = vmul.f32 %v5032_v0, %v5032_v0  ;;  %v507_v6 = vmul.f32 %v5034_v1, %v5034_v1  ;;  %s3309_s27 = sshra.s32 %s3923_s29, 7  ;;  %s5282_s17 = scalar_lea.vmem [#allocation19], %s3746_s24 }
  0xc6   : > { %v508_v7 = vmul.f32 %v5036_v2, %v5036_v2  ;;  %v5048_v8 = vld [vmem:[#allocation5 + $0x28] sm:$0xff]  ;;  %v509_v10 = vmul.f32 %v5038_v3, %v5038_v3  ;;  %v510_v15 = vmul.f32 %v5040_v4, %v5040_v4  ;;  %v4081_v17 = vld [vmem:[#allocation8 + $0x64] ss:$8 sps:$4 sm:$0xff]   ;;  %v4083_v18 = vld [vmem:[#allocation8 + $0x60] ss:$8 sps:$4 sm:$0xff]   ;;  %s5247_s28 = scalar_lea.vmem [#allocation16], %s3309_s27  ;;  %s5502_s3 = scalar_lea.hbm %s5551_s10, %s3923_s29 }
  0xc7   : > { %v4075_v9 = vld [vmem:[#allocation8 + $0x74] ss:$8 sps:$4 sm:$0xff]   ;;  %v512_v11 = vadd.f32 %v507_v6, %v506_v5  ;;  %v4077_v12 = vld [vmem:[#allocation8 + $0x70] ss:$8 sps:$4 sm:$0xff]   ;;  %v4084_v19 = vld [vmem:[#allocation8 + $0x164] ss:$8 sps:$4 sm:$0xff]   ;;  %v511_v20 = vmul.f32 %v5048_v8, %v5048_v8 }
  0xc8   : > { %1126 = vmatprep.subr.bf16.mxu0 %v4075_v9  ;;  %v4078_v13 = vld [vmem:[#allocation8 + $0x174] ss:$8 sps:$4 sm:$0xff]   ;;  %v4080_v14 = vld [vmem:[#allocation8 + $0x170] ss:$8 sps:$4 sm:$0xff]   ;;  %v4086_v22 = vld [vmem:[#allocation8 + $0x160] ss:$8 sps:$4 sm:$0xff]  }
  0xc9   : > { %v513_v16 = vadd.f32 %v512_v11, %v508_v7  ;;  %1127 = vmatpush1.bf16.msra.mxu0 %v4077_v12  ;;  %1167 = vmatprep.subr.bf16.mxu1 %v4078_v13  ;;  %v4087_v23 = vld [vmem:[#allocation8 + $0x54] ss:$8 sps:$4 sm:$0xff]   ;;  %v4089_v25 = vld [vmem:[#allocation8 + $0x50] ss:$8 sps:$4 sm:$0xff]   ;;  %v4093_v27 = vld [vmem:[#allocation8 + $0x44] ss:$8 sps:$4 sm:$0xff]  }
  0xca   : > { %1168 = vmatpush1.bf16.msra.mxu1 %v4080_v14  ;;  %1128 = vmatprep.subr.bf16.mxu0 %v4081_v17  ;;  %v4090_v26 = vld [vmem:[#allocation8 + $0x154] ss:$8 sps:$4 sm:$0xff]   ;;  %v4092_v29 = vld [vmem:[#allocation8 + $0x150] ss:$8 sps:$4 sm:$0xff]   ;;  %v4096_v30 = vld [vmem:[#allocation8 + $0x144] ss:$8 sps:$4 sm:$0xff]  }
  0xcb   : > { %v514_v21 = vadd.f32 %v513_v16, %v509_v10  ;;  %1169 = vmatprep.subr.bf16.mxu1 %v4084_v19  ;;  %v4095_v31 = vld [vmem:[#allocation8 + $0x40] ss:$8 sps:$4 sm:$0xff]   ;;  %v4099_v32 = vld [vmem:[#allocation8 + $0x34] ss:$8 sps:$4 sm:$0xff]   ;;  %v4101_v35 = vld [vmem:[#allocation8 + $0x30] ss:$8 sps:$4 sm:$0xff]  }
  0xcc   : > { %v4098_v33 = vld [vmem:[#allocation8 + $0x140] ss:$8 sps:$4 sm:$0xff]   ;;  %v4102_v34 = vld [vmem:[#allocation8 + $0x134] ss:$8 sps:$4 sm:$0xff]   ;;  %v4105_v36 = vld [vmem:[#allocation8 + $0x24] ss:$8 sps:$4 sm:$0xff]  }
  0xcd   : > { %v515_v24 = vadd.f32 %v514_v21, %v510_v15  ;;  %1129 = vmatpush1.bf16.msra.mxu0 %v4083_v18  ;;  %v4104_v37 = vld [vmem:[#allocation8 + $0x130] ss:$8 sps:$4 sm:$0xff]   ;;  %v4108_v38 = vld [vmem:[#allocation8 + $0x124] ss:$8 sps:$4 sm:$0xff]   ;;  %v4107_v39 = vld [vmem:[#allocation8 + $0x20] ss:$8 sps:$4 sm:$0xff]  }
  0xce   : > { %1130 = vmatprep.subr.bf16.mxu0 %v4087_v23  ;;  %1170 = vmatpush1.bf16.msra.mxu1 %v4086_v22  ;;  %v4111_v40 = vld [vmem:[#allocation8 + $0x14] ss:$8 sps:$4 sm:$0xff]   ;;  %v4110_v41 = vld [vmem:[#allocation8 + $0x120] ss:$8 sps:$4 sm:$0xff]   ;;  %v4113_v43 = vld [vmem:[#allocation8 + $0x10] ss:$8 sps:$4 sm:$0xff]  }
  0xcf   : > { %v516_v28 = vadd.f32 %v515_v24, %v511_v20  ;;  %1171 = vmatprep.subr.bf16.mxu1 %v4090_v26  ;;  %v4114_v42 = vld [vmem:[#allocation8 + $0x114] ss:$8 sps:$4 sm:$0xff]   ;;  %v4117_v44 = vld [vmem:[#allocation8 + $0x4] ss:$8 sps:$4 sm:$0xff]   ;;  %v4116_v45 = vld [vmem:[#allocation8 + $0x110] ss:$8 sps:$4 sm:$0xff]  }
  0xd0   : > { %v4120_v46 = vld [vmem:[#allocation8 + $0x104] ss:$8 sps:$4 sm:$0xff]   ;;  %v4119_v47 = vld [vmem:[#allocation8] ss:$8 sps:$4 sm:$0xff]   ;;  %v4123_v48 = vld [vmem:[#allocation8 + $0xf4] ss:$8 sps:$4 sm:$0xff]  }
  0xd1   : > { %517 = vadd.xlane.f32.xlu0 %v516_v28  ;;  %1131 = vmatpush1.bf16.msra.mxu0 %v4089_v25  ;;  %v4122_v49 = vld [vmem:[#allocation8 + $0x100] ss:$8 sps:$4 sm:$0xff]   ;;  %v4126_v50 = vld [vmem:[#allocation8 + $0x1f4] ss:$8 sps:$4 sm:$0xff]   ;;  %v4125_v51 = vld [vmem:[#allocation8 + $0xf0] ss:$8 sps:$4 sm:$0xff]  }
  0xd2   : > { %1132 = vmatprep.subr.bf16.mxu0 %v4093_v27  ;;  %1172 = vmatpush1.bf16.msra.mxu1 %v4092_v29  ;;  %v4129_v52 = vld [vmem:[#allocation8 + $0xe4] ss:$8 sps:$4 sm:$0xff]   ;;  %v4128_v53 = vld [vmem:[#allocation8 + $0x1f0] ss:$8 sps:$4 sm:$0xff]   ;;  %v4131_v55 = vld [vmem:[#allocation8 + $0xe0] ss:$8 sps:$4 sm:$0xff]  }
  0xd3   : > { %1173 = vmatprep.subr.bf16.mxu1 %v4096_v30  ;;  %v4132_v54 = vld [vmem:[#allocation8 + $0x1e4] ss:$8 sps:$4 sm:$0xff]   ;;  %v4135_v56 = vld [vmem:[#allocation8 + $0xd4] ss:$8 sps:$4 sm:$0xff]   ;;  %v4134_v57 = vld [vmem:[#allocation8 + $0x1e0] ss:$8 sps:$4 sm:$0xff]  }
  0xd4   : > { %v4138_v58 = vld [vmem:[#allocation8 + $0x1d4] ss:$8 sps:$4 sm:$0xff]   ;;  %v4137_v59 = vld [vmem:[#allocation8 + $0xd0] ss:$8 sps:$4 sm:$0xff]   ;;  %v4141_v60 = vld [vmem:[#allocation8 + $0xc4] ss:$8 sps:$4 sm:$0xff]  }
  0xd5   : > { %1133 = vmatpush1.bf16.msra.mxu0 %v4095_v31  ;;  %v4140_v61 = vld [vmem:[#allocation8 + $0x1d0] ss:$8 sps:$4 sm:$0xff]   ;;  %v4144_v62 = vld [vmem:[#allocation8 + $0x1c4] ss:$8 sps:$4 sm:$0xff]   ;;  %v4143_v63 = vld [vmem:[#allocation8 + $0xc0] ss:$8 sps:$4 sm:$0xff]  }
  0xd6   : > { %1134 = vmatprep.subr.bf16.mxu0 %v4099_v32  ;;  %1174 = vmatpush1.bf16.msra.mxu1 %v4098_v33  ;;  %v4146_v5 = vld [vmem:[#allocation8 + $0x1c0] ss:$8 sps:$4 sm:$0xff]   ;;  %v4147_v6 = vld [vmem:[#allocation8 + $0xb4] ss:$8 sps:$4 sm:$0xff]   ;;  %v4149_v7 = vld [vmem:[#allocation8 + $0xb0] ss:$8 sps:$4 sm:$0xff]  }
  0xd7   : > { %1175 = vmatprep.subr.bf16.mxu1 %v4102_v34  ;;  %v4150_v9 = vld [vmem:[#allocation8 + $0x1b4] ss:$8 sps:$4 sm:$0xff]   ;;  %v4153_v10 = vld [vmem:[#allocation8 + $0xa4] ss:$8 sps:$4 sm:$0xff]   ;;  %v4152_v11 = vld [vmem:[#allocation8 + $0x1b0] ss:$8 sps:$4 sm:$0xff]  }
  0xd8   : > { %v4155_v12 = vld [vmem:[#allocation8 + $0xa0] ss:$8 sps:$4 sm:$0xff]   ;;  %v4156_v13 = vld [vmem:[#allocation8 + $0x1a4] ss:$8 sps:$4 sm:$0xff]   ;;  %v4159_v14 = vld [vmem:[#allocation8 + $0x94] ss:$8 sps:$4 sm:$0xff]  }
  0xd9   : > { %1135 = vmatpush1.bf16.msra.mxu0 %v4101_v35  ;;  %v4158_v15 = vld [vmem:[#allocation8 + $0x1a0] ss:$8 sps:$4 sm:$0xff]   ;;  %v4161_v16 = vld [vmem:[#allocation8 + $0x90] ss:$8 sps:$4 sm:$0xff]   ;;  %v4162_v17 = vld [vmem:[#allocation8 + $0x194] ss:$8 sps:$4 sm:$0xff]  }
  0xda   : > { %1136 = vmatprep.subr.bf16.mxu0 %v4105_v36  ;;  %1176 = vmatpush1.bf16.msra.mxu1 %v4104_v37  ;;  %v4165_v18 = vld [vmem:[#allocation8 + $0x84] ss:$8 sps:$4 sm:$0xff]   ;;  %v4164_v19 = vld [vmem:[#allocation8 + $0x190] ss:$8 sps:$4 sm:$0xff]   ;;  %v4167_v20 = vld [vmem:[#allocation8 + $0x80] ss:$8 sps:$4 sm:$0xff]  }
  0xdb   : > { %1177 = vmatprep.subr.bf16.mxu1 %v4108_v38  ;;  %v4168_v21 = vld [vmem:[#allocation8 + $0x184] ss:$8 sps:$4 sm:$0xff]   ;;  %v4173_v22 = vld [vmem:[#allocation8 + $0x274] ss:$8 sps:$4 sm:$0xff]   ;;  %v4170_v23 = vld [vmem:[#allocation8 + $0x180] ss:$8 sps:$4 sm:$0xff]  }
  0xdc   : > { %v4197_v24 = vld [vmem:[#allocation7 + $0x74] ss:$8 sps:$4 sm:$0xff]   ;;  %v4171_v34 = vld [vmem:[#allocation8 + $0x270] ss:$8 sps:$4 sm:$0xff]   ;;  %v4176_v37 = vld [vmem:[#allocation8 + $0x264] ss:$8 sps:$4 sm:$0xff]  }
  0xdd   : > { %1137 = vmatpush1.bf16.msra.mxu0 %v4107_v39  ;;  %v4195_v38 = vld [vmem:[#allocation7 + $0x70] ss:$8 sps:$4 sm:$0xff]   ;;  %v4209_v39 = vld [vmem:[#allocation7 + $0x54] ss:$8 sps:$4 sm:$0xff]   ;;  %s5252_s11 = scalar_lea.vmem [#allocation17], %s3309_s27  ;;  %s3560_s25 = sshll.u32 %s5282_s17, 4  ;;  %s3561_s25 = int_to_ptr.vmem [resolvable:$true] %s3560_s25 }
  0xde   : > { %1138 = vmatprep.subr.bf16.mxu0 %v4111_v40  ;;  %1178 = vmatpush1.bf16.msra.mxu1 %v4110_v41  ;;  %v4743_v40 = vmov 0   ;;  %v4177_v41 = vld [vmem:[#allocation8 + $0x250] ss:$8 sps:$4 sm:$0xff]   ;;  %s3546_s4 = scalar_lea.sflag [#allocation4], %s5015_s1  ;;  %s4637_s0 = scalar_lea.vmem %s3561_s25, 2048 }
  0xdf   : > { %1179 = vmatprep.subr.bf16.mxu1 %v4114_v42  ;;  %v4182_v42 = vld [vmem:[#allocation8 + $0x244] ss:$8 sps:$4 sm:$0xff]   ;;  %p4638_p7 = scmp.ne.s32.totalorder %s3561_s25, %s4637_s0  ;;  %p5591_p3 = scmp.ne.s32.totalorder %s5574_s22, 0 }
  0xe0   : > { %s4744_s2 = smov [#allocation19]  }
  0xe1   : > { %1139 = vmatpush1.bf16.msra.mxu0 %v4113_v43  ;;  %v4207_v43 = vld [vmem:[#allocation7 + $0x50] ss:$8 sps:$4 sm:$0xff]   ;;  %p4639_p4 = pnand %p4638_p7, %p5591_p3  ;;  %s4641_s20 = sshll.u32 %s4744_s2, 4  ;;  %s4642_s20 = int_to_ptr.vmem [resolvable:$false] %s4641_s20 }
  0xe2   : > { %1140 = vmatprep.subr.bf16.mxu0 %v4117_v44  ;;  %1180 = vmatpush1.bf16.msra.mxu1 %v4116_v45  ;;  %v4215_v44 = vld [vmem:[#allocation7 + $0x44] ss:$8 sps:$4 sm:$0xff]   ;;  %v4180_v45 = vld [vmem:[#allocation8 + $0x240] ss:$8 sps:$4 sm:$0xff]   ;;  %p4644_p6 = scmp.lt.s32.totalorder %s3561_s25, %s4642_s20 }
  0xe3   : > { %1181 = vmatprep.subr.bf16.mxu1 %v4120_v46  ;;  %v4185_v46 = vld [vmem:[#allocation8 + $0x234] ss:$8 sps:$4 sm:$0xff]   ;;  %p4640_p10 = pneg %p4639_p4 }
  0xe5   : > { %1141 = vmatpush1.bf16.msra.mxu0 %v4119_v47  ;;  %v4213_v47 = vld [vmem:[#allocation7 + $0x40] ss:$8 sps:$4 sm:$0xff]  }
  0xe6   : > { %1142 = vmatprep.subr.bf16.mxu0 %v4123_v48  ;;  %1182 = vmatpush1.bf16.msra.mxu1 %v4122_v49  ;;  %v4221_v48 = vld [vmem:[#allocation7 + $0x34] ss:$8 sps:$4 sm:$0xff]   ;;  %v4183_v49 = vld [vmem:[#allocation8 + $0x230] ss:$8 sps:$4 sm:$0xff]  }
  0xe7   : > { %1183 = vmatprep.subr.bf16.mxu1 %v4126_v50  ;;  %v4188_v50 = vld [vmem:[#allocation8 + $0x224] ss:$8 sps:$4 sm:$0xff]  }
  0xe9   : > { %1143 = vmatpush2.bf16.msra.mxu0 %v4125_v51  ;;  %v4219_v51 = vld [vmem:[#allocation7 + $0x30] ss:$8 sps:$4 sm:$0xff]  }
  0xea   : > { %1144 = vmatprep.subr.bf16.mxu0 %v4129_v52  ;;  %1184 = vmatpush2.bf16.msra.mxu1 %v4128_v53  ;;  %v4227_v52 = vld [vmem:[#allocation7 + $0x24] ss:$8 sps:$4 sm:$0xff]   ;;  %v4186_v53 = vld [vmem:[#allocation8 + $0x220] ss:$8 sps:$4 sm:$0xff]  }
  0xeb   : > { %1185 = vmatprep.subr.bf16.mxu1 %v4132_v54  ;;  %v4191_v54 = vld [vmem:[#allocation8 + $0x214] ss:$8 sps:$4 sm:$0xff]  }
  0xed   : > { %1145 = vmatpush2.bf16.msra.mxu0 %v4131_v55  ;;  %v4225_v55 = vld [vmem:[#allocation7 + $0x20] ss:$8 sps:$4 sm:$0xff]  }
  0xee   : > { %1146 = vmatprep.subr.bf16.mxu0 %v4135_v56  ;;  %1186 = vmatpush2.bf16.msra.mxu1 %v4134_v57  ;;  %v4233_v56 = vld [vmem:[#allocation7 + $0x14] ss:$8 sps:$4 sm:$0xff]   ;;  %v4189_v57 = vld [vmem:[#allocation8 + $0x210] ss:$8 sps:$4 sm:$0xff]  }
  0xef   : > { %1187 = vmatprep.subr.bf16.mxu1 %v4138_v58  ;;  %v4194_v58 = vld [vmem:[#allocation8 + $0x204] ss:$8 sps:$4 sm:$0xff]  }
  0xf1   : > { %1147 = vmatpush2.bf16.msra.mxu0 %v4137_v59  ;;  %v4231_v59 = vld [vmem:[#allocation7 + $0x10] ss:$8 sps:$4 sm:$0xff]  }
  0xf2   : > { %1148 = vmatprep.subr.bf16.mxu0 %v4141_v60  ;;  %1188 = vmatpush2.bf16.msra.mxu1 %v4140_v61  ;;  %v4239_v60 = vld [vmem:[#allocation7 + $0x4] ss:$8 sps:$4 sm:$0xff]   ;;  %v4192_v61 = vld [vmem:[#allocation8 + $0x200] ss:$8 sps:$4 sm:$0xff]  }
  0xf3   : > { %1189 = vmatprep.subr.bf16.mxu1 %v4144_v62  ;;  %v4200_v62 = vld [vmem:[#allocation8 + $0x2f4] ss:$8 sps:$4 sm:$0xff]  }
  0xf5   : > { %1149 = vmatpush2.bf16.msra.mxu0 %v4143_v63  ;;  %v4237_v63 = vld [vmem:[#allocation7] ss:$8 sps:$4 sm:$0xff]  }
  0xf6   : > { %1150 = vmatprep.subr.bf16.mxu0 %v4147_v6  ;;  %1190 = vmatpush2.bf16.msra.mxu1 %v4146_v5  ;;  %v532_v5 = vld [vmem:[#allocation2] sm:$0xff]  ;;  %v4198_v6 = vld [vmem:[#allocation8 + $0x2f0] ss:$8 sps:$4 sm:$0xff]  }
  0xf7   : > { %1191 = vmatprep.subr.bf16.mxu1 %v4150_v9  ;;  %v4206_v9 = vld [vmem:[#allocation8 + $0x2e4] ss:$8 sps:$4 sm:$0xff]  }
  0xf9   : > { %1151 = vmatpush2.bf16.msra.mxu0 %v4149_v7  ;;  %v533_v7 = vpack.c.bf16 %v532_v5, %v532_v5  ;;  %v4314_v5 = vld [vmem:[#allocation11 + $0x18c] ss:$16 sps:$4 sm:$0xff]  }
  0xfa   : > { %1152 = vmatprep.subr.bf16.mxu0 %v4153_v10  ;;  %1192 = vmatpush2.bf16.msra.mxu1 %v4152_v11  ;;  %v4204_v10 = vld [vmem:[#allocation8 + $0x2e0] ss:$8 sps:$4 sm:$0xff]   ;;  %v4212_v11 = vld [vmem:[#allocation8 + $0x2d4] ss:$8 sps:$4 sm:$0xff]  }
  0xfb   : > { %1193 = vmatprep.subr.bf16.mxu1 %v4156_v13  ;;  %v4218_v13 = vld [vmem:[#allocation8 + $0x2c4] ss:$8 sps:$4 sm:$0xff]  }
  0xfd   : > { %1153 = vmatpush2.bf16.msra.mxu0 %v4155_v12  ;;  %v4210_v12 = vld [vmem:[#allocation8 + $0x2d0] ss:$8 sps:$4 sm:$0xff]  }
  0xfe   : > { %1154 = vmatprep.subr.bf16.mxu0 %v4159_v14  ;;  %1194 = vmatpush2.bf16.msra.mxu1 %v4158_v15  ;;  %v4216_v14 = vld [vmem:[#allocation8 + $0x2c0] ss:$8 sps:$4 sm:$0xff]   ;;  %v4224_v15 = vld [vmem:[#allocation8 + $0x2b4] ss:$8 sps:$4 sm:$0xff]  }
  0xff   : > { %1195 = vmatprep.subr.bf16.mxu1 %v4162_v17  ;;  %v4230_v17 = vld [vmem:[#allocation8 + $0x2a4] ss:$8 sps:$4 sm:$0xff]  }
 0x101   : > { %1155 = vmatpush2.bf16.msra.mxu0 %v4161_v16  ;;  %v4222_v16 = vld [vmem:[#allocation8 + $0x2b0] ss:$8 sps:$4 sm:$0xff]  }
 0x102   : > { %1156 = vmatprep.subr.bf16.mxu0 %v4165_v18  ;;  %1196 = vmatpush2.bf16.msra.mxu1 %v4164_v19  ;;  %v4228_v18 = vld [vmem:[#allocation8 + $0x2a0] ss:$8 sps:$4 sm:$0xff]   ;;  %v4236_v19 = vld [vmem:[#allocation8 + $0x294] ss:$8 sps:$4 sm:$0xff]  }
 0x103   : > { %1197 = vmatprep.subr.bf16.mxu1 %v4168_v21  ;;  %v4242_v21 = vld [vmem:[#allocation8 + $0x284] ss:$8 sps:$4 sm:$0xff]  }
 0x105   : > { %1157 = vmatpush2.bf16.msra.mxu0 %v4167_v20  ;;  %v4234_v20 = vld [vmem:[#allocation8 + $0x290] ss:$8 sps:$4 sm:$0xff]  }
 0x106   : > { %1208 = vmatprep.subr.bf16.mxu0 %v4173_v22  ;;  %1198 = vmatpush2.bf16.msra.mxu1 %v4170_v23  ;;  %v4240_v22 = vld [vmem:[#allocation8 + $0x280] ss:$8 sps:$4 sm:$0xff]  }
 0x107   : > { %1329 = vmatprep.subr.bf16.mxu1 %v4197_v24 }
 0x15a   : > { %v518_v25 = vpop.xlane.xlu0 %517 }
 0x15b   : > { %4339 = vrsqrt.f32 %v518_v25  ;;  %v4243_v25 = vld [vmem:[#allocation11 + $0xe0] ss:$16 sps:$4 sm:$0xff]  }
 0x168   : > { %v5056_v26 = vpop.eup %4339 }
 0x169   : > { %v521_v27 = vmul.f32 %v5056_v26, %v5034_v1  ;;  %v523_v28 = vmul.f32 %v5056_v26, %v5038_v3  ;;  %v520_v29 = vmul.f32 %v5056_v26, %v5032_v0  ;;  %v522_v30 = vmul.f32 %v5056_v26, %v5036_v2  ;;  %v4203_v3 = vld [vmem:[#allocation7 + $0x64] ss:$8 sps:$4 sm:$0xff]   ;;  %v4174_v0 = vld [vmem:[#allocation8 + $0x260] ss:$8 sps:$4 sm:$0xff]   ;;  %v4179_v2 = vld [vmem:[#allocation8 + $0x254] ss:$8 sps:$4 sm:$0xff]  }
 0x16a   : > { %v525_v31 = vmul.f32 %v5056_v26, %v5048_v8  ;;  %v4201_v8 = vld [vmem:[#allocation7 + $0x60] ss:$8 sps:$4 sm:$0xff]   ;;  %v524_v23 = vmul.f32 %v5056_v26, %v5040_v4 }
 0x16b   : > { %v527_v32 = vpack.c.bf16 %v521_v27, %v521_v27  ;;  %v529_v33 = vpack.c.bf16 %v523_v28, %v523_v28  ;;  %v526_v35 = vpack.c.bf16 %v520_v29, %v520_v29  ;;  %v528_v36 = vpack.c.bf16 %v522_v30, %v522_v30  ;;  %v4245_v27 = vld [vmem:[#allocation11 + $0xe4] ss:$16 sps:$4 sm:$0xff]   ;;  %v4246_v28 = vld [vmem:[#allocation11 + $0xe8] ss:$16 sps:$4 sm:$0xff]   ;;  %v4248_v29 = vld [vmem:[#allocation11 + $0xec] ss:$16 sps:$4 sm:$0xff]  }
 0x16c   : > { %v531_v1 = vpack.c.bf16 %v525_v31, %v525_v31  ;;  %v530_v24 = vpack.c.bf16 %v524_v23, %v524_v23  ;;  %v4251_v30 = vld [vmem:[#allocation11 + $0xc4] ss:$16 sps:$4 sm:$0xff]   ;;  %v4254_v31 = vld [vmem:[#allocation11 + $0xcc] ss:$16 sps:$4 sm:$0xff]   ;;  %v4255_v4 = vld [vmem:[#allocation11 + $0xa0] ss:$16 sps:$4 sm:$0xff]  }
 0x16d   : > { %1158 = vmatprep.mubr.bf16.mxu0 %v527_v32  ;;  %1199 = vmatprep.mubr.bf16.mxu1 %v529_v33  ;;  %v4249_v32 = vld [vmem:[#allocation11 + $0xc0] ss:$16 sps:$4 sm:$0xff]   ;;  %v4252_v33 = vld [vmem:[#allocation11 + $0xc8] ss:$16 sps:$4 sm:$0xff]  }
 0x16e   : > { %1159 = vmatmul.mubr.bf16.vlgmr.msra.gmra.mxu0 %v526_v35  ;;  %1200 = vmatmul.mubr.bf16.vlgmr.msra.gmra.mxu1 %v528_v36  ;;  %v4260_v35 = vld [vmem:[#allocation11 + $0xac] ss:$16 sps:$4 sm:$0xff]   ;;  %v4258_v26 = vld [vmem:[#allocation11 + $0xa8] ss:$16 sps:$4 sm:$0xff]   ;;  %v4263_v36 = vld [vmem:[#allocation11 + $0x84] ss:$16 sps:$4 sm:$0xff]  }
 0x16f   : > { %1209 = vmatpush1.bf16.msra.mxu0 %v4171_v34  ;;  %1240 = vmatprep.mubr.bf16.mxu0 %v531_v1  ;;  %v4257_v34 = vld [vmem:[#allocation11 + $0xa4] ss:$16 sps:$4 sm:$0xff]   ;;  %v4264_v1 = vld [vmem:[#allocation11 + $0x88] ss:$16 sps:$4 sm:$0xff]   ;;  %v4333_v23 = vld [vmem:[#allocation11 + $0x100] ss:$16 sps:$4 sm:$0xff]  }
 0x170   : > { %1210 = vmatprep.subr.bf16.mxu0 %v4176_v37  ;;  %1330 = vmatpush1.bf16.msra.mxu1 %v4195_v38  ;;  %v4266_v37 = vld [vmem:[#allocation11 + $0x8c] ss:$16 sps:$4 sm:$0xff]   ;;  %v4261_v38 = vld [vmem:[#allocation11 + $0x80] ss:$16 sps:$4 sm:$0xff]  }
 0x171   : > { %1331 = vmatprep.subr.bf16.mxu1 %v4203_v3  ;;  %1361 = vmatprep.mubr.bf16.mxu1 %v4743_v40  ;;  %v4269_v3 = vld [vmem:[#allocation11 + $0x64] ss:$16 sps:$4 sm:$0xff]   ;;  %v4278_v40 = vld [vmem:[#allocation11 + $0x4c] ss:$16 sps:$4 sm:$0xff]  }
 0x173   : > { %1211 = vmatpush1.bf16.msra.mxu0 %v4174_v0  ;;  %v4272_v0 = vld [vmem:[#allocation11 + $0x6c] ss:$16 sps:$4 sm:$0xff]  }
 0x174   : > { %1212 = vmatprep.subr.bf16.mxu0 %v4179_v2  ;;  %1332 = vmatpush1.bf16.msra.mxu1 %v4201_v8  ;;  %v4267_v2 = vld [vmem:[#allocation11 + $0x60] ss:$16 sps:$4 sm:$0xff]   ;;  %v4270_v8 = vld [vmem:[#allocation11 + $0x68] ss:$16 sps:$4 sm:$0xff]  }
 0x175   : > { %1333 = vmatprep.subr.bf16.mxu1 %v4209_v39  ;;  %v4275_v39 = vld [vmem:[#allocation11 + $0x44] ss:$16 sps:$4 sm:$0xff]  }
 0x177   : > { %1213 = vmatpush1.bf16.msra.mxu0 %v4177_v41  ;;  %v4273_v41 = vld [vmem:[#allocation11 + $0x40] ss:$16 sps:$4 sm:$0xff]  }
 0x178   : > { %1214 = vmatprep.subr.bf16.mxu0 %v4182_v42  ;;  %1334 = vmatpush1.bf16.msra.mxu1 %v4207_v43  ;;  %v4276_v42 = vld [vmem:[#allocation11 + $0x48] ss:$16 sps:$4 sm:$0xff]   ;;  %v4281_v43 = vld [vmem:[#allocation11 + $0x24] ss:$16 sps:$4 sm:$0xff]  }
 0x179   : > { %1335 = vmatprep.subr.bf16.mxu1 %v4215_v44  ;;  %v4284_v44 = vld [vmem:[#allocation11 + $0x2c] ss:$16 sps:$4 sm:$0xff]  }
 0x17b   : > { %1215 = vmatpush1.bf16.msra.mxu0 %v4180_v45  ;;  %v4279_v45 = vld [vmem:[#allocation11 + $0x20] ss:$16 sps:$4 sm:$0xff]  }
 0x17c   : > { %1216 = vmatprep.subr.bf16.mxu0 %v4185_v46  ;;  %1336 = vmatpush1.bf16.msra.mxu1 %v4213_v47  ;;  %v4282_v46 = vld [vmem:[#allocation11 + $0x28] ss:$16 sps:$4 sm:$0xff]   ;;  %v4287_v47 = vld [vmem:[#allocation11 + $0x4] ss:$16 sps:$4 sm:$0xff]  }
 0x17d   : > { %1337 = vmatprep.subr.bf16.mxu1 %v4221_v48  ;;  %v4290_v48 = vld [vmem:[#allocation11 + $0xc] ss:$16 sps:$4 sm:$0xff]  }
 0x17f   : > { %1217 = vmatpush1.bf16.msra.mxu0 %v4183_v49  ;;  %v4285_v49 = vld [vmem:[#allocation11] ss:$16 sps:$4 sm:$0xff]  }
 0x180   : > { %1218 = vmatprep.subr.bf16.mxu0 %v4188_v50  ;;  %1338 = vmatpush1.bf16.msra.mxu1 %v4219_v51  ;;  %v4288_v50 = vld [vmem:[#allocation11 + $0x8] ss:$16 sps:$4 sm:$0xff]   ;;  %v4293_v51 = vld [vmem:[#allocation11 + $0x1e4] ss:$16 sps:$4 sm:$0xff]  }
 0x181   : > { %1339 = vmatprep.subr.bf16.mxu1 %v4227_v52  ;;  %v4296_v52 = vld [vmem:[#allocation11 + $0x1ec] ss:$16 sps:$4 sm:$0xff]  }
 0x183   : > { %1219 = vmatpush1.bf16.msra.mxu0 %v4186_v53  ;;  %v4291_v53 = vld [vmem:[#allocation11 + $0x1e0] ss:$16 sps:$4 sm:$0xff]  }
 0x184   : > { %1220 = vmatprep.subr.bf16.mxu0 %v4191_v54  ;;  %1340 = vmatpush1.bf16.msra.mxu1 %v4225_v55  ;;  %v4294_v54 = vld [vmem:[#allocation11 + $0x1e8] ss:$16 sps:$4 sm:$0xff]   ;;  %v4299_v55 = vld [vmem:[#allocation11 + $0x1c4] ss:$16 sps:$4 sm:$0xff]  }
 0x185   : > { %1341 = vmatprep.subr.bf16.mxu1 %v4233_v56  ;;  %v4302_v56 = vld [vmem:[#allocation11 + $0x1cc] ss:$16 sps:$4 sm:$0xff]  }
 0x187   : > { %1221 = vmatpush1.bf16.msra.mxu0 %v4189_v57  ;;  %v4297_v57 = vld [vmem:[#allocation11 + $0x1c0] ss:$16 sps:$4 sm:$0xff]  }
 0x188   : > { %1222 = vmatprep.subr.bf16.mxu0 %v4194_v58  ;;  %1342 = vmatpush1.bf16.msra.mxu1 %v4231_v59  ;;  %v4300_v58 = vld [vmem:[#allocation11 + $0x1c8] ss:$16 sps:$4 sm:$0xff]   ;;  %v4305_v59 = vld [vmem:[#allocation11 + $0x1a4] ss:$16 sps:$4 sm:$0xff]  }
 0x189   : > { %1343 = vmatprep.subr.bf16.mxu1 %v4239_v60  ;;  %v4308_v60 = vld [vmem:[#allocation11 + $0x1ac] ss:$16 sps:$4 sm:$0xff]  }
 0x18b   : > { %1223 = vmatpush1.bf16.msra.mxu0 %v4192_v61  ;;  %v4303_v61 = vld [vmem:[#allocation11 + $0x1a0] ss:$16 sps:$4 sm:$0xff]  }
 0x18c   : > { %1224 = vmatprep.subr.bf16.mxu0 %v4200_v62  ;;  %1344 = vmatpush1.bf16.msra.mxu1 %v4237_v63  ;;  %v4306_v62 = vld [vmem:[#allocation11 + $0x1a8] ss:$16 sps:$4 sm:$0xff]   ;;  %v4311_v63 = vld [vmem:[#allocation11 + $0x184] ss:$16 sps:$4 sm:$0xff]  }
 0x18d   : > { %1794 = vmatprep.subr.bf16.mxu1 %v4245_v27  ;;  %v2057_v27 = vld [vmem:[%s5018_s21 + $0x588] sm:$0xff] }
 0x18f   : > { %1225 = vmatpush2.bf16.msra.mxu0 %v4198_v6  ;;  %1362 = vmatmul.mubr.bf16.vlgmr.msra.gmra.mxu1 %v533_v7  ;;  %v4309_v6 = vld [vmem:[#allocation11 + $0x180] ss:$16 sps:$4 sm:$0xff]   ;;  %v4312_v7 = vld [vmem:[#allocation11 + $0x188] ss:$16 sps:$4 sm:$0xff]  }
 0x190   : > { %1226 = vmatprep.subr.bf16.mxu0 %v4206_v9  ;;  %1795 = vmatpush1.bf16.msra.mxu1 %v4243_v25  ;;  %v4317_v9 = vld [vmem:[#allocation11 + $0x164] ss:$16 sps:$4 sm:$0xff]   ;;  %v1929_v25 = vld [vmem:[%s5018_s21 + $0x188] sm:$0xff] }
 0x191   : > { %1796 = vmatprep.subr.bf16.mxu1 %v4251_v30 }
 0x193   : > { %1227 = vmatpush2.bf16.msra.mxu0 %v4204_v10  ;;  %v4320_v10 = vld [vmem:[#allocation11 + $0x16c] ss:$16 sps:$4 sm:$0xff]  }
 0x194   : > { %1228 = vmatprep.subr.bf16.mxu0 %v4212_v11  ;;  %1797 = vmatpush1.bf16.msra.mxu1 %v4249_v32  ;;  %v4315_v11 = vld [vmem:[#allocation11 + $0x160] ss:$16 sps:$4 sm:$0xff]  }
 0x195   : > { %1798 = vmatprep.subr.bf16.mxu1 %v4257_v34 }
 0x197   : > { %1229 = vmatpush2.bf16.msra.mxu0 %v4210_v12  ;;  %v4318_v12 = vld [vmem:[#allocation11 + $0x168] ss:$16 sps:$4 sm:$0xff]  }
 0x198   : > { %1230 = vmatprep.subr.bf16.mxu0 %v4218_v13  ;;  %1799 = vmatpush1.bf16.msra.mxu1 %v4255_v4  ;;  %v4323_v13 = vld [vmem:[#allocation11 + $0x144] ss:$16 sps:$4 sm:$0xff]  }
 0x199   : > { %1800 = vmatprep.subr.bf16.mxu1 %v4263_v36 }
 0x19b   : > { %1231 = vmatpush2.bf16.msra.mxu0 %v4216_v14  ;;  %v4326_v14 = vld [vmem:[#allocation11 + $0x14c] ss:$16 sps:$4 sm:$0xff]  }
 0x19c   : > { %1232 = vmatprep.subr.bf16.mxu0 %v4224_v15  ;;  %1801 = vmatpush1.bf16.msra.mxu1 %v4261_v38  ;;  %v4321_v15 = vld [vmem:[#allocation11 + $0x140] ss:$16 sps:$4 sm:$0xff]  }
 0x19d   : > { %1802 = vmatprep.subr.bf16.mxu1 %v4269_v3 }
 0x19f   : > { %1233 = vmatpush2.bf16.msra.mxu0 %v4222_v16  ;;  %v4324_v16 = vld [vmem:[#allocation11 + $0x148] ss:$16 sps:$4 sm:$0xff]  }
 0x1a0   : > { %1234 = vmatprep.subr.bf16.mxu0 %v4230_v17  ;;  %1803 = vmatpush1.bf16.msra.mxu1 %v4267_v2  ;;  %v4329_v17 = vld [vmem:[#allocation11 + $0x124] ss:$16 sps:$4 sm:$0xff]  }
 0x1a1   : > { %1804 = vmatprep.subr.bf16.mxu1 %v4275_v39  ;;  %v1370_v39 = vld [vmem:[#allocation10] sm:$0x3] }
 0x1a3   : > { %1235 = vmatpush2.bf16.msra.mxu0 %v4228_v18  ;;  %v4332_v18 = vld [vmem:[#allocation11 + $0x12c] ss:$16 sps:$4 sm:$0xff]  }
 0x1a4   : > { %1236 = vmatprep.subr.bf16.mxu0 %v4236_v19  ;;  %1805 = vmatpush1.bf16.msra.mxu1 %v4273_v41  ;;  %v4327_v19 = vld [vmem:[#allocation11 + $0x120] ss:$16 sps:$4 sm:$0xff]  }
 0x1a5   : > { %1806 = vmatprep.subr.bf16.mxu1 %v4281_v43 }
 0x1a7   : > { %1237 = vmatpush2.bf16.msra.mxu0 %v4234_v20  ;;  %v4330_v20 = vld [vmem:[#allocation11 + $0x128] ss:$16 sps:$4 sm:$0xff]  }
 0x1a8   : > { %1238 = vmatprep.subr.bf16.mxu0 %v4242_v21  ;;  %1807 = vmatpush1.bf16.msra.mxu1 %v4279_v45  ;;  %v4335_v21 = vld [vmem:[#allocation11 + $0x104] ss:$16 sps:$4 sm:$0xff]  }
 0x1a9   : > { %1808 = vmatprep.subr.bf16.mxu1 %v4287_v47 }
 0x1ab   : > { %1239 = vmatpush2.bf16.msra.mxu0 %v4240_v22  ;;  %v4338_v22 = vld [vmem:[#allocation11 + $0x10c] ss:$16 sps:$4 sm:$0xff]  }
 0x1ac   : > { %1835 = vmatprep.subr.bf16.mxu0 %v4248_v29  ;;  %1809 = vmatpush1.bf16.msra.mxu1 %v4285_v49  ;;  %v2505_v29 = vunpack.c.h.s8.bf16 %v2057_v27 }
 0x1ad   : > { %1810 = vmatprep.subr.bf16.mxu1 %v4293_v51 }
 0x1ae   : > { %1241 = vmatmul.mubr.bf16.vlgmr.msra.gmra.mxu0 %v530_v24  ;;  %v4336_v24 = vld [vmem:[#allocation11 + $0x108] ss:$16 sps:$4 sm:$0xff]  }
 0x1af   : > { %1836 = vmatpush1.bf16.msra.mxu0 %v4246_v28  ;;  %v2249_v28 = vunpack.c.h.s8.bf16 %v1929_v25 }
 0x1b0   : > { %1837 = vmatprep.subr.bf16.mxu0 %v4254_v31  ;;  %1811 = vmatpush2.bf16.msra.mxu1 %v4291_v53 }
 0x1b1   : > { %1812 = vmatprep.subr.bf16.mxu1 %v4299_v55  ;;  %v1928_v55 = vld [vmem:[%s5018_s21 + $0x180] sm:$0xff] }
 0x1b3   : > { %1838 = vmatpush1.bf16.msra.mxu0 %v4252_v33 }
 0x1b4   : > { %1839 = vmatprep.subr.bf16.mxu0 %v4260_v35  ;;  %1813 = vmatpush2.bf16.msra.mxu1 %v4297_v57 }
 0x1b5   : > { %1814 = vmatprep.subr.bf16.mxu1 %v4305_v59  ;;  %v2248_v59 = vunpack.c.h.s8.bf16 %v1928_v55 }
 0x1b7   : > { %1840 = vmatpush1.bf16.msra.mxu0 %v4258_v26 }
 0x1b8   : > { %1841 = vmatprep.subr.bf16.mxu0 %v4266_v37  ;;  %1815 = vmatpush2.bf16.msra.mxu1 %v4303_v61 }
 0x1b9   : > { %1816 = vmatprep.subr.bf16.mxu1 %v4311_v63  ;;  %v2489_v63 = vunpack.c.l.s8.bf16 %v2057_v27 }
 0x1bb   : > { %1842 = vmatpush1.bf16.msra.mxu0 %v4264_v1 }
 0x1bc   : > { %1843 = vmatprep.subr.bf16.mxu0 %v4272_v0  ;;  %1817 = vmatpush2.bf16.msra.mxu1 %v4309_v6  ;;  %v1372_v0 = vlaneseq  ;;  %v2041_v6 = vld [vmem:[%s5018_s21 + $0x508] sm:$0xff] }
 0x1bd   : > { %1818 = vmatprep.subr.bf16.mxu1 %v4317_v9 }
 0x1be   : > { %v5072_v2 = vshrl.u32 %v1372_v0, 7  ;;  %v1993_v0 = vld [vmem:[%s5018_s21 + $0x388] sm:$0xff] }
 0x1bf   : > { %1844 = vmatpush1.bf16.msra.mxu0 %v4270_v8 }
 0x1c0   : > { %1845 = vmatprep.subr.bf16.mxu0 %v4278_v40  ;;  %1819 = vmatpush2.bf16.msra.mxu1 %v4315_v11  ;;  %v5075_v8 = vsub.s32 0, %v5072_v2  ;;  %v5078_v40 = vsub.s32 1, %v5072_v2  ;;  %v2473_v11 = vunpack.c.h.s8.bf16 %v2041_v6 }
 0x1c1   : > { %1820 = vmatprep.subr.bf16.mxu1 %v4323_v13  ;;  %v2040_v13 = vld [vmem:[%s5018_s21 + $0x500] sm:$0xff] }
 0x1c3   : > { %1846 = vmatpush1.bf16.msra.mxu0 %v4276_v42 }
 0x1c4   : > { %1847 = vmatprep.subr.bf16.mxu0 %v4284_v44  ;;  %1821 = vmatpush2.bf16.msra.mxu1 %v4321_v15  ;;  %v1375_v44 = vrot.slane %v1370_v39, %v5075_v8  ;;  %v2472_v15 = vunpack.c.h.s8.bf16 %v2040_v13 }
 0x1c5   : > { %1822 = vmatprep.subr.bf16.mxu1 %v4329_v17  ;;  %v2457_v17 = vunpack.c.l.s8.bf16 %v2041_v6 }
 0x1c7   : > { %1848 = vmatpush1.bf16.msra.mxu0 %v4282_v46 }
 0x1c8   : > { %1849 = vmatprep.subr.bf16.mxu0 %v4290_v48  ;;  %1823 = vmatpush2.bf16.msra.mxu1 %v4327_v19  ;;  %v1379_v48 = vrot.slane %v1370_v39, %v5078_v40  ;;  %v2025_v19 = vld [vmem:[%s5018_s21 + $0x488] sm:$0xff] }
 0x1c9   : > { %1824 = vmatprep.subr.bf16.mxu1 %v4335_v21  ;;  %v2456_v21 = vunpack.c.l.s8.bf16 %v2040_v13  ;;  %v2121_v39 = vld [vmem:[%s5018_s21 + $0x788] sm:$0xff] }
 0x1cb   : > { %1850 = vmatpush1.bf16.msra.mxu0 %v4288_v50 }
 0x1cc   : > { %1851 = vmatprep.subr.bf16.mxu0 %v4296_v52  ;;  %1825 = vmatpush2.bf16.msra.mxu1 %v4333_v23  ;;  %v2441_v23 = vunpack.c.h.s8.bf16 %v2025_v19 }
 0x1cd   : > { %2652 = vmatprep.subr.bf16.mxu1 %v2249_v28 }
 0x1cf   : > { %1852 = vmatpush2.bf16.msra.mxu0 %v4294_v54 }
 0x1d0   : > { %1853 = vmatprep.subr.bf16.mxu0 %v4302_v56  ;;  %v2056_v56 = vld [vmem:[%s5018_s21 + $0x580] sm:$0xff] }
 0x1d1   : > { %v2488_v9 = vunpack.c.l.s8.bf16 %v2056_v56 }
 0x1d3   : > { %1854 = vmatpush2.bf16.msra.mxu0 %v4300_v58 }
 0x1d4   : > { %1855 = vmatprep.subr.bf16.mxu0 %v4308_v60  ;;  %v2504_v60 = vunpack.c.h.s8.bf16 %v2056_v56 }
 0x1d7   : > { %1856 = vmatpush2.bf16.msra.mxu0 %v4306_v62  ;;  %v2233_v62 = vunpack.c.l.s8.bf16 %v1929_v25  ;;  %v2024_v25 = vld [vmem:[%s5018_s21 + $0x480] sm:$0xff] }
 0x1d8   : > { %1857 = vmatprep.subr.bf16.mxu0 %v4314_v5  ;;  %v1913_v5 = vld [vmem:[%s5018_s21 + $0x108] sm:$0xff]  ;;  %v2440_v28 = vunpack.c.h.s8.bf16 %v2024_v25 }
 0x1db   : > { %1858 = vmatpush2.bf16.msra.mxu0 %v4312_v7  ;;  %v2232_v7 = vunpack.c.l.s8.bf16 %v1928_v55 }
 0x1dc   : > { %1859 = vmatprep.subr.bf16.mxu0 %v4320_v10  ;;  %v2217_v10 = vunpack.c.h.s8.bf16 %v1913_v5 }
 0x1df   : > { %1860 = vmatpush2.bf16.msra.mxu0 %v4318_v12  ;;  %v1912_v12 = vld [vmem:[%s5018_s21 + $0x100] sm:$0xff] }
 0x1e0   : > { %1861 = vmatprep.subr.bf16.mxu0 %v4326_v14  ;;  %v2216_v14 = vunpack.c.h.s8.bf16 %v1912_v12 }
 0x1e3   : > { %1862 = vmatpush2.bf16.msra.mxu0 %v4324_v16  ;;  %v2201_v16 = vunpack.c.l.s8.bf16 %v1913_v5  ;;  %v2089_v5 = vld [vmem:[%s5018_s21 + $0x688] sm:$0xff] }
 0x1e4   : > { %1863 = vmatprep.subr.bf16.mxu0 %v4332_v18  ;;  %v1897_v18 = vld [vmem:[%s5018_s21 + $0x88] sm:$0xff] }
 0x1e7   : > { %1864 = vmatpush2.bf16.msra.mxu0 %v4330_v20  ;;  %v2200_v20 = vunpack.c.l.s8.bf16 %v1912_v12  ;;  %v2088_v12 = vld [vmem:[%s5018_s21 + $0x680] sm:$0xff] }
 0x1e8   : > { %1865 = vmatprep.subr.bf16.mxu0 %v4338_v22  ;;  %v2185_v22 = vunpack.c.h.s8.bf16 %v1897_v18 }
 0x1eb   : > { %1866 = vmatpush2.bf16.msra.mxu0 %v4336_v24  ;;  %v1896_v24 = vld [vmem:[%s5018_s21 + $0x80] sm:$0xff] }
 0x1ec   : > { %2693 = vmatprep.subr.bf16.mxu0 %v2505_v29  ;;  %v2184_v27 = vunpack.c.h.s8.bf16 %v1896_v24  ;;  %v2169_v29 = vunpack.c.l.s8.bf16 %v1897_v18  ;;  %v2552_v18 = vunpack.c.l.s8.bf16 %v2088_v12 }
 0x22e   : > { %v1160_v30 = vpop.f32.mrf.mxu0  ;;  %v1201_v31 = vpop.f32.mrf.mxu1 }
 0x22f   : > { %v1202_v32 = vadd.f32 %v1201_v31, %v1160_v30  ;;  %v2425_v30 = vunpack.c.l.s8.bf16 %v2025_v19  ;;  %v1881_v31 = vld [vmem:[%s5018_s21 + $0x8] sm:$0xff] }
 0x230   : > { %v1162_v33 = vpop.f32.mrf.mxu0  ;;  %v1203_v34 = vpop.f32.mrf.mxu1  ;;  %v1945_v19 = vld [vmem:[%s5018_s21 + $0x208] sm:$0xff] }
 0x231   : > { %v1204_v42 = vadd.f32 %v1203_v34, %v1162_v33  ;;  %v2168_v33 = vunpack.c.l.s8.bf16 %v1896_v24  ;;  %v2424_v34 = vunpack.c.l.s8.bf16 %v2024_v25  ;;  %v2072_v24 = vld [vmem:[%s5018_s21 + $0x600] sm:$0xff] }
 0x232   : > { %v1164_v35 = vpop.f32.mrf.mxu0  ;;  %v1205_v4 = vpop.f32.mrf.mxu1 }
 0x233   : > { %v2153_v35 = vunpack.c.h.s8.bf16 %v1881_v31 }
 0x234   : > { %v1165_v26 = vpop.f32.mrf.mxu0  ;;  %v1206_v36 = vpop.f32.mrf.mxu1 }
 0x235   : > { %v1880_v26 = vld [vmem:[%s5018_s21] sm:$0xff] }
 0x236   : > { %v2008_v36 = vld [vmem:[%s5018_s21 + $0x400] sm:$0xff] }
 0x24f   : > { %v1363_v37 = vpop.f32.mrf.mxu1 }
 0x251   : > { %v1365_v38 = vpop.f32.mrf.mxu1 }
 0x253   : > { %v1367_v1 = vpop.f32.mrf.mxu1 }
 0x254   : > { %v2137_v1 = vunpack.c.l.s8.bf16 %v1881_v31  ;;  %v2520_v31 = vunpack.c.l.s8.bf16 %v2072_v24 }
 0x255   : > { %v1368_v3 = vpop.f32.mrf.mxu1 }
 0x26e   : > { %v1242_v41 = vpop.f32.mrf.mxu0 }
 0x26f   : > { %v1243_v43 = vadd.f32 %v1242_v41, %v1202_v32  ;;  %v2009_v32 = vld [vmem:[%s5018_s21 + $0x408] sm:$0xff]  ;;  %v2136_v41 = vunpack.c.l.s8.bf16 %v1880_v26 }
 0x270   : > { %v1244_v45 = vpop.f32.mrf.mxu0  ;;  %v2409_v4 = vunpack.c.h.s8.bf16 %v2009_v32  ;;  %v2393_v3 = vunpack.c.l.s8.bf16 %v2009_v32  ;;  %v1931_v32 = vld [vmem:[%s5018_s21 + $0x198] sm:$0xff] }
 0x271   : > { %v1364_v46 = vadd.f32 %v1363_v37, %v1243_v43  ;;  %v1245_v47 = vadd.f32 %v1244_v45, %v1204_v42  ;;  %v2152_v37 = vunpack.c.h.s8.bf16 %v1880_v26  ;;  %v2392_v42 = vunpack.c.l.s8.bf16 %v2008_v36  ;;  %v1992_v45 = vld [vmem:[%s5018_s21 + $0x380] sm:$0xff]  ;;  %v1452_v26 = vld [vmem:[#allocation13] sm:$0xf] }
 0x272   : > { %v1246_v49 = vpop.f32.mrf.mxu0  ;;  %v2377_v43 = vunpack.c.h.s8.bf16 %v1993_v0 }
 0x273   : > { %v1382_v50 = vadd.f32 %v1375_v44, %v1364_v46  ;;  %v1366_v51 = vadd.f32 %v1365_v38, %v1245_v47  ;;  %v2408_v38 = vunpack.c.h.s8.bf16 %v2008_v36  ;;  %v2633_v44 = vunpack.c.h.s8.bf16 %v2121_v39  ;;  %v2120_v46 = vld [vmem:[%s5018_s21 + $0x780] sm:$0xff] }
 0x274   : > { %v1247_v52 = vpop.f32.mrf.mxu0  ;;  %v2376_v47 = vunpack.c.h.s8.bf16 %v1992_v45  ;;  %v2361_v49 = vunpack.c.l.s8.bf16 %v1993_v0  ;;  %v5118_v36 = vsub.s32 3, %v5072_v2 }
 0x275   : > { %v1383_v53 = vadd.f32 %v1379_v48, %v1366_v51  ;;  %v1384_v54 = vmax.f32 %v1382_v50, 0.0  ;;  %v2632_v48 = vunpack.c.h.s8.bf16 %v2120_v46  ;;  %v2617_v50 = vunpack.c.l.s8.bf16 %v2121_v39  ;;  %v1977_v51 = vld [vmem:[%s5018_s21 + $0x308] sm:$0xff] }
 0x276   : > { %v2105_v52 = vld [vmem:[%s5018_s21 + $0x708] sm:$0xff]  ;;  %v2345_v55 = vunpack.c.h.s8.bf16 %v1977_v51 }
 0x277   : > { %v1385_v57 = vmax.f32 %v1383_v53, 0.0  ;;  %v1386_v61 = vpack.c.bf16 %v1384_v54, %v1384_v54  ;;  %v2360_v53 = vunpack.c.l.s8.bf16 %v1992_v45  ;;  %v2616_v54 = vunpack.c.l.s8.bf16 %v2120_v46 }
 0x278   : > { %v2601_v56 = vunpack.c.h.s8.bf16 %v2105_v52 }
 0x279   : > { %v1387_v58 = vpack.c.bf16 %v1385_v57, %v1385_v57  ;;  %v1976_v57 = vld [vmem:[%s5018_s21 + $0x300] sm:$0xff] }
 0x27a   : > { %v2328_v6 = vunpack.c.l.s8.bf16 %v1976_v57 }
 0x27b   : > { %1826 = vmatprep.mubr.bf16.mxu1 %v1387_v58  ;;  %1867 = vmatprep.mubr.bf16.mxu0 %v1387_v58  ;;  %v2104_v58 = vld [vmem:[%s5018_s21 + $0x700] sm:$0xff] }
 0x27c   : > { %1827 = vmatmul.mubr.bf16.vlgmr.msra.gmra.mxu1 %v1386_v61  ;;  %1868 = vmatmul.mubr.bf16.vlgmr.msra.gmra.mxu0 %v1386_v61  ;;  %v2329_v61 = vunpack.c.l.s8.bf16 %v1977_v51  ;;  %v1930_v51 = vld [vmem:[%s5018_s21 + $0x190] sm:$0xff] }
 0x27d   : > { %2653 = vmatpush1.bf16.msra.mxu1 %v2248_v59  ;;  %2694 = vmatpush1.bf16.msra.mxu0 %v2504_v60  ;;  %v2344_v59 = vunpack.c.h.s8.bf16 %v1976_v57  ;;  %v2600_v60 = vunpack.c.h.s8.bf16 %v2104_v58 }
 0x27e   : > { %2654 = vmatprep.subr.bf16.mxu1 %v2233_v62  ;;  %2695 = vmatprep.subr.bf16.mxu0 %v2489_v63  ;;  %v2585_v62 = vunpack.c.l.s8.bf16 %v2105_v52  ;;  %v1961_v63 = vld [vmem:[%s5018_s21 + $0x288] sm:$0xff]  ;;  %v2058_v52 = vld [vmem:[%s5018_s21 + $0x590] sm:$0xff] }
 0x281   : > { %2655 = vmatpush1.bf16.msra.mxu1 %v2232_v7  ;;  %2696 = vmatpush1.bf16.msra.mxu0 %v2488_v9  ;;  %v2584_v7 = vunpack.c.l.s8.bf16 %v2104_v58  ;;  %v2313_v9 = vunpack.c.h.s8.bf16 %v1961_v63 }
 0x282   : > { %2656 = vmatprep.subr.bf16.mxu1 %v2217_v10  ;;  %2697 = vmatprep.subr.bf16.mxu0 %v2473_v11  ;;  %v2569_v10 = vunpack.c.h.s8.bf16 %v2089_v5  ;;  %v1960_v11 = vld [vmem:[%s5018_s21 + $0x280] sm:$0xff] }
 0x283   : > { %v2312_v13 = vunpack.c.h.s8.bf16 %v1960_v11 }
 0x285   : > { %2657 = vmatpush1.bf16.msra.mxu1 %v2216_v14  ;;  %2698 = vmatpush1.bf16.msra.mxu0 %v2472_v15  ;;  %v2568_v14 = vunpack.c.h.s8.bf16 %v2088_v12  ;;  %v2297_v15 = vunpack.c.l.s8.bf16 %v1961_v63  ;;  %v2235_v63 = vunpack.c.l.s8.bf16 %v1931_v32 }
 0x286   : > { %2658 = vmatprep.subr.bf16.mxu1 %v2201_v16  ;;  %2699 = vmatprep.subr.bf16.mxu0 %v2457_v17  ;;  %v2553_v16 = vunpack.c.l.s8.bf16 %v2089_v5  ;;  %v2296_v17 = vunpack.c.l.s8.bf16 %v1960_v11 }
 0x289   : > { %2659 = vmatpush1.bf16.msra.mxu1 %v2200_v20  ;;  %2700 = vmatpush1.bf16.msra.mxu0 %v2456_v21  ;;  %v2073_v20 = vld [vmem:[%s5018_s21 + $0x608] sm:$0xff]  ;;  %v2281_v21 = vunpack.c.h.s8.bf16 %v1945_v19 }
 0x28a   : > { %2660 = vmatprep.subr.bf16.mxu1 %v2185_v22  ;;  %2701 = vmatprep.subr.bf16.mxu0 %v2441_v23  ;;  %v2537_v22 = vunpack.c.h.s8.bf16 %v2073_v20  ;;  %v1944_v23 = vld [vmem:[%s5018_s21 + $0x200] sm:$0xff] }
 0x28b   : > { %v2280_v25 = vunpack.c.h.s8.bf16 %v1944_v23 }
 0x28d   : > { %2661 = vmatpush1.bf16.msra.mxu1 %v2184_v27  ;;  %2702 = vmatpush1.bf16.msra.mxu0 %v2440_v28  ;;  %v2536_v27 = vunpack.c.h.s8.bf16 %v2072_v24  ;;  %v2265_v28 = vunpack.c.l.s8.bf16 %v1945_v19  ;;  %v1899_v19 = vld [vmem:[%s5018_s21 + $0x98] sm:$0xff] }
 0x28e   : > { %2662 = vmatprep.subr.bf16.mxu1 %v2169_v29  ;;  %2703 = vmatprep.subr.bf16.mxu0 %v2425_v30  ;;  %v2521_v29 = vunpack.c.l.s8.bf16 %v2073_v20  ;;  %v2264_v30 = vunpack.c.l.s8.bf16 %v1944_v23  ;;  %v2027_v20 = vld [vmem:[%s5018_s21 + $0x498] sm:$0xff]  ;;  %v2187_v23 = vunpack.c.h.s8.bf16 %v1899_v19 }
 0x28f   : > { %v2443_v24 = vunpack.c.h.s8.bf16 %v2027_v20 }
 0x291   : > { %2663 = vmatpush1.bf16.msra.mxu1 %v2168_v33  ;;  %2704 = vmatpush1.bf16.msra.mxu0 %v2424_v34  ;;  %v2059_v33 = vld [vmem:[%s5018_s21 + $0x598] sm:$0xff]  ;;  %v2251_v34 = vunpack.c.h.s8.bf16 %v1931_v32 }
 0x292   : > { %2664 = vmatprep.subr.bf16.mxu1 %v2153_v35  ;;  %2705 = vmatprep.subr.bf16.mxu0 %v2409_v4  ;;  %v2507_v35 = vunpack.c.h.s8.bf16 %v2059_v33  ;;  %v5115_v4 = vsub.s32 2, %v5072_v2  ;;  %v2491_v5 = vunpack.c.l.s8.bf16 %v2059_v33  ;;  %v1883_v32 = vld [vmem:[%s5018_s21 + $0x18] sm:$0xff] }
 0x293   : > { %v2011_v33 = vld [vmem:[%s5018_s21 + $0x418] sm:$0xff] }
 0x295   : > { %2665 = vmatpush1.bf16.msra.mxu1 %v2152_v37  ;;  %2706 = vmatpush1.bf16.msra.mxu0 %v2408_v38  ;;  %v1457_v37 = vrot.slane %v1452_v26, %v5075_v8  ;;  %v1465_v38 = vrot.slane %v1452_v26, %v5115_v4 }
 0x296   : > { %2666 = vmatprep.subr.bf16.mxu1 %v2137_v1  ;;  %2707 = vmatprep.subr.bf16.mxu0 %v2393_v3  ;;  %v1461_v1 = vrot.slane %v1452_v26, %v5078_v40  ;;  %v1469_v3 = vrot.slane %v1452_v26, %v5118_v36  ;;  %v2155_v26 = vunpack.c.h.s8.bf16 %v1883_v32 }
 0x299   : > { %2667 = vmatpush1.bf16.msra.mxu1 %v2136_v41  ;;  %2708 = vmatpush1.bf16.msra.mxu0 %v2392_v42 }
 0x29a   : > { %2668 = vmatprep.subr.bf16.mxu1 %v2377_v43  ;;  %2709 = vmatprep.subr.bf16.mxu0 %v2633_v44 }
 0x29d   : > { %2669 = vmatpush2.bf16.msra.mxu1 %v2376_v47  ;;  %2710 = vmatpush2.bf16.msra.mxu0 %v2632_v48 }
 0x29e   : > { %2670 = vmatprep.subr.bf16.mxu1 %v2361_v49  ;;  %2711 = vmatprep.subr.bf16.mxu0 %v2617_v50 }
 0x2a1   : > { %2671 = vmatpush2.bf16.msra.mxu1 %v2360_v53  ;;  %2712 = vmatpush2.bf16.msra.mxu0 %v2616_v54 }
 0x2a2   : > { %2672 = vmatprep.subr.bf16.mxu1 %v2345_v55  ;;  %2713 = vmatprep.subr.bf16.mxu0 %v2601_v56 }
 0x2a5   : > { %2673 = vmatpush2.bf16.msra.mxu1 %v2344_v59  ;;  %2714 = vmatpush2.bf16.msra.mxu0 %v2600_v60  ;;  %v2250_v59 = vunpack.c.h.s8.bf16 %v1930_v51  ;;  %v2506_v60 = vunpack.c.h.s8.bf16 %v2058_v52 }
 0x2a6   : > { %2674 = vmatprep.subr.bf16.mxu1 %v2329_v61  ;;  %2715 = vmatprep.subr.bf16.mxu0 %v2585_v62 }
 0x2a9   : > { %2675 = vmatpush2.bf16.msra.mxu1 %v2328_v6  ;;  %2716 = vmatpush2.bf16.msra.mxu0 %v2584_v7  ;;  %v1915_v6 = vld [vmem:[%s5018_s21 + $0x118] sm:$0xff] }
 0x2aa   : > { %2676 = vmatprep.subr.bf16.mxu1 %v2313_v9  ;;  %2717 = vmatprep.subr.bf16.mxu0 %v2569_v10  ;;  %v2043_v7 = vld [vmem:[%s5018_s21 + $0x518] sm:$0xff]  ;;  %v2234_v9 = vunpack.c.l.s8.bf16 %v1930_v51  ;;  %v2490_v10 = vunpack.c.l.s8.bf16 %v2058_v52  ;;  %v2219_v11 = vunpack.c.h.s8.bf16 %v1915_v6 }
 0x2ab   : > { %v2475_v12 = vunpack.c.h.s8.bf16 %v2043_v7 }
 0x2ad   : > { %2677 = vmatpush2.bf16.msra.mxu1 %v2312_v13  ;;  %2718 = vmatpush2.bf16.msra.mxu0 %v2568_v14  ;;  %v1914_v13 = vld [vmem:[%s5018_s21 + $0x110] sm:$0xff] }
 0x2ae   : > { %2678 = vmatprep.subr.bf16.mxu1 %v2297_v15  ;;  %2719 = vmatprep.subr.bf16.mxu0 %v2553_v16  ;;  %v2042_v14 = vld [vmem:[%s5018_s21 + $0x510] sm:$0xff]  ;;  %v2218_v15 = vunpack.c.h.s8.bf16 %v1914_v13 }
 0x2af   : > { %v2474_v16 = vunpack.c.h.s8.bf16 %v2042_v14 }
 0x2b1   : > { %2679 = vmatpush2.bf16.msra.mxu1 %v2296_v17  ;;  %2720 = vmatpush2.bf16.msra.mxu0 %v2552_v18  ;;  %v2203_v17 = vunpack.c.l.s8.bf16 %v1915_v6  ;;  %v2459_v18 = vunpack.c.l.s8.bf16 %v2043_v7  ;;  %v2106_v6 = vld [vmem:[%s5018_s21 + $0x710] sm:$0xff] }
 0x2b2   : > { %2680 = vmatprep.subr.bf16.mxu1 %v2281_v21  ;;  %2721 = vmatprep.subr.bf16.mxu0 %v2537_v22  ;;  %v2202_v21 = vunpack.c.l.s8.bf16 %v1914_v13  ;;  %v2458_v22 = vunpack.c.l.s8.bf16 %v2042_v14  ;;  %v2091_v13 = vld [vmem:[%s5018_s21 + $0x698] sm:$0xff] }
 0x2b5   : > { %2681 = vmatpush2.bf16.msra.mxu1 %v2280_v25  ;;  %2722 = vmatpush2.bf16.msra.mxu0 %v2536_v27  ;;  %v1898_v25 = vld [vmem:[%s5018_s21 + $0x90] sm:$0xff] }
 0x2b6   : > { %2682 = vmatprep.subr.bf16.mxu1 %v2265_v28  ;;  %2723 = vmatprep.subr.bf16.mxu0 %v2521_v29  ;;  %v2026_v27 = vld [vmem:[%s5018_s21 + $0x490] sm:$0xff]  ;;  %v2186_v28 = vunpack.c.h.s8.bf16 %v1898_v25 }
 0x2b7   : > { %v2442_v29 = vunpack.c.h.s8.bf16 %v2026_v27 }
 0x2b9   : > { %2683 = vmatpush2.bf16.msra.mxu1 %v2264_v30  ;;  %2724 = vmatpush2.bf16.msra.mxu0 %v2520_v31  ;;  %v2171_v30 = vunpack.c.l.s8.bf16 %v1899_v19  ;;  %v2427_v31 = vunpack.c.l.s8.bf16 %v2027_v20  ;;  %v2090_v19 = vld [vmem:[%s5018_s21 + $0x690] sm:$0xff] }
 0x2ba   : > { %2734 = vmatprep.subr.bf16.mxu1 %v2251_v34  ;;  %2775 = vmatprep.subr.bf16.mxu0 %v2507_v35  ;;  %v2170_v34 = vunpack.c.l.s8.bf16 %v1898_v25  ;;  %v2426_v35 = vunpack.c.l.s8.bf16 %v2026_v27  ;;  %v2075_v25 = vld [vmem:[%s5018_s21 + $0x618] sm:$0xff] }
 0x33c   : > { %v1828_v0 = vpop.f32.mrf.mxu1  ;;  %v1869_v39 = vpop.f32.mrf.mxu0 }
 0x33d   : > { %v1829_v41 = vadd.f32 %v1828_v0, %v1457_v37  ;;  %v1870_v42 = vadd.f32 %v1869_v39, %v1465_v38  ;;  %v2411_v37 = vunpack.c.h.s8.bf16 %v2011_v33  ;;  %v1882_v38 = vld [vmem:[%s5018_s21 + $0x10] sm:$0xff]  ;;  %v2139_v39 = vunpack.c.l.s8.bf16 %v1883_v32 }
 0x33e   : > { %v1830_v43 = vpop.f32.mrf.mxu1  ;;  %v1871_v44 = vpop.f32.mrf.mxu0  ;;  %v2074_v32 = vld [vmem:[%s5018_s21 + $0x610] sm:$0xff] }
 0x33f   : > { %v1831_v45 = vadd.f32 %v1830_v43, %v1461_v1  ;;  %v1872_v46 = vadd.f32 %v1871_v44, %v1469_v3  ;;  %v1876_v47 = vmax.f32 %v1829_v41, 0.0  ;;  %v1878_v48 = vmax.f32 %v1870_v42, 0.0  ;;  %v2010_v1 = vld [vmem:[%s5018_s21 + $0x410] sm:$0xff]  ;;  %v1995_v42 = vld [vmem:[%s5018_s21 + $0x398] sm:$0xff] }
 0x340   : > { %v1832_v49 = vpop.f32.mrf.mxu1  ;;  %v1873_v50 = vpop.f32.mrf.mxu0  ;;  %v2154_v3 = vunpack.c.h.s8.bf16 %v1882_v38  ;;  %v2410_v0 = vunpack.c.h.s8.bf16 %v2010_v1  ;;  %v2395_v41 = vunpack.c.l.s8.bf16 %v2011_v33  ;;  %v2123_v43 = vld [vmem:[%s5018_s21 + $0x798] sm:$0xff]  ;;  %v2138_v44 = vunpack.c.l.s8.bf16 %v1882_v38  ;;  %v2061_v38 = vld [vmem:[%s5018_s21 + $0x5a8] sm:$0xff] }
 0x341   : > { %v1877_v53 = vmax.f32 %v1831_v45, 0.0  ;;  %v1879_v54 = vmax.f32 %v1872_v46, 0.0  ;;  %v5130_v61 = vpack.c.bf16 %v1876_v47, %v1876_v47  ;;  %v5132_v62 = vpack.c.bf16 %v1878_v48, %v1878_v48  ;;  %v1994_v48 = vld [vmem:[%s5018_s21 + $0x390] sm:$0xff] }
 0x342   : > { %v1833_v55 = vpop.f32.mrf.mxu1  ;;  %v1874_v56 = vpop.f32.mrf.mxu0  ;;  %v2394_v45 = vunpack.c.l.s8.bf16 %v2010_v1  ;;  %v2379_v46 = vunpack.c.h.s8.bf16 %v1995_v42  ;;  %v2635_v47 = vunpack.c.h.s8.bf16 %v2123_v43  ;;  %v2122_v49 = vld [vmem:[%s5018_s21 + $0x790] sm:$0xff]  ;;  %v2378_v50 = vunpack.c.h.s8.bf16 %v1994_v48 }
 0x343   : > { %v5126_v57 = vpack.c.bf16 %v1877_v53, %v1877_v53  ;;  %v5128_v58 = vpack.c.bf16 %v1879_v54, %v1879_v54  ;;  %v2634_v51 = vunpack.c.h.s8.bf16 %v2122_v49  ;;  %v2363_v52 = vunpack.c.l.s8.bf16 %v1995_v42  ;;  %v1979_v54 = vld [vmem:[%s5018_s21 + $0x318] sm:$0xff]  ;;  %v2060_v42 = vld [vmem:[%s5018_s21 + $0x5a0] sm:$0xff] }
 0x344   : > { %v2619_v53 = vunpack.c.l.s8.bf16 %v2123_v43  ;;  %v2107_v55 = vld [vmem:[%s5018_s21 + $0x718] sm:$0xff]  ;;  %v2362_v56 = vunpack.c.l.s8.bf16 %v1994_v48  ;;  %v2045_v48 = vld [vmem:[%s5018_s21 + $0x528] sm:$0xff] }
 0x345   : > { %2684 = vmatprep.mubr.bf16.mxu1 %v5126_v57  ;;  %2725 = vmatprep.mubr.bf16.mxu0 %v5128_v58 }
 0x346   : > { %2685 = vmatmul.mubr.bf16.vlgmr.msra.gmra.mxu1 %v5130_v61  ;;  %2726 = vmatmul.mubr.bf16.vlgmr.msra.gmra.mxu0 %v5132_v62 }
 0x347   : > { %2735 = vmatpush1.bf16.msra.mxu1 %v2250_v59  ;;  %2776 = vmatpush1.bf16.msra.mxu0 %v2506_v60  ;;  %v2618_v59 = vunpack.c.l.s8.bf16 %v2122_v49  ;;  %v2347_v60 = vunpack.c.h.s8.bf16 %v1979_v54 }
 0x348   : > { %2766 = vmatprep.mubr.bf16.mxu1 %v5126_v57  ;;  %2807 = vmatprep.mubr.bf16.mxu0 %v5128_v58 }
 0x349   : > { %2736 = vmatprep.subr.bf16.mxu1 %v2235_v63  ;;  %2777 = vmatprep.subr.bf16.mxu0 %v2491_v5  ;;  %v2603_v63 = vunpack.c.h.s8.bf16 %v2107_v55  ;;  %v1978_v5 = vld [vmem:[%s5018_s21 + $0x310] sm:$0xff] }
 0x34a   : > { %v2346_v7 = vunpack.c.h.s8.bf16 %v1978_v5  ;;  %v2330_v14 = vunpack.c.l.s8.bf16 %v1978_v5  ;;  %v2029_v5 = vld [vmem:[%s5018_s21 + $0x4a8] sm:$0xff] }
 0x34b   : > { %2737 = vmatpush1.bf16.msra.mxu1 %v2234_v9  ;;  %2778 = vmatpush1.bf16.msra.mxu0 %v2490_v10  ;;  %v2602_v9 = vunpack.c.h.s8.bf16 %v2106_v6  ;;  %v2331_v10 = vunpack.c.l.s8.bf16 %v1979_v54  ;;  %v2044_v54 = vld [vmem:[%s5018_s21 + $0x520] sm:$0xff] }
 0x34c   : > { %2738 = vmatprep.subr.bf16.mxu1 %v2219_v11  ;;  %2779 = vmatprep.subr.bf16.mxu0 %v2475_v12  ;;  %v2587_v11 = vunpack.c.l.s8.bf16 %v2107_v55  ;;  %v1963_v12 = vld [vmem:[%s5018_s21 + $0x298] sm:$0xff] }
 0x34f   : > { %2739 = vmatpush1.bf16.msra.mxu1 %v2218_v15  ;;  %2780 = vmatpush1.bf16.msra.mxu0 %v2474_v16  ;;  %v2586_v15 = vunpack.c.l.s8.bf16 %v2106_v6  ;;  %v2315_v16 = vunpack.c.h.s8.bf16 %v1963_v12 }
 0x350   : > { %2740 = vmatprep.subr.bf16.mxu1 %v2203_v17  ;;  %2781 = vmatprep.subr.bf16.mxu0 %v2459_v18  ;;  %v2571_v17 = vunpack.c.h.s8.bf16 %v2091_v13  ;;  %v1962_v18 = vld [vmem:[%s5018_s21 + $0x290] sm:$0xff] }
 0x351   : > { %v2314_v20 = vunpack.c.h.s8.bf16 %v1962_v18  ;;  %v2298_v27 = vunpack.c.l.s8.bf16 %v1962_v18  ;;  %v2013_v18 = vld [vmem:[%s5018_s21 + $0x428] sm:$0xff] }
 0x353   : > { %2741 = vmatpush1.bf16.msra.mxu1 %v2202_v21  ;;  %2782 = vmatpush1.bf16.msra.mxu0 %v2458_v22  ;;  %v2570_v21 = vunpack.c.h.s8.bf16 %v2090_v19  ;;  %v2299_v22 = vunpack.c.l.s8.bf16 %v1963_v12  ;;  %v2028_v12 = vld [vmem:[%s5018_s21 + $0x4a0] sm:$0xff] }
 0x354   : > { %2742 = vmatprep.subr.bf16.mxu1 %v2187_v23  ;;  %2783 = vmatprep.subr.bf16.mxu0 %v2443_v24  ;;  %v2555_v23 = vunpack.c.l.s8.bf16 %v2091_v13  ;;  %v1947_v24 = vld [vmem:[%s5018_s21 + $0x218] sm:$0xff] }
 0x357   : > { %2743 = vmatpush1.bf16.msra.mxu1 %v2186_v28  ;;  %2784 = vmatpush1.bf16.msra.mxu0 %v2442_v29  ;;  %v2554_v28 = vunpack.c.l.s8.bf16 %v2090_v19  ;;  %v2283_v29 = vunpack.c.h.s8.bf16 %v1947_v24 }
 0x358   : > { %2744 = vmatprep.subr.bf16.mxu1 %v2171_v30  ;;  %2785 = vmatprep.subr.bf16.mxu0 %v2427_v31  ;;  %v2539_v30 = vunpack.c.h.s8.bf16 %v2075_v25  ;;  %v1946_v31 = vld [vmem:[%s5018_s21 + $0x210] sm:$0xff] }
 0x359   : > { %v2282_v33 = vunpack.c.h.s8.bf16 %v1946_v31  ;;  %v2266_v1 = vunpack.c.l.s8.bf16 %v1946_v31  ;;  %v2125_v31 = vld [vmem:[%s5018_s21 + $0x7a8] sm:$0xff] }
 0x35b   : > { %2745 = vmatpush1.bf16.msra.mxu1 %v2170_v34  ;;  %2786 = vmatpush1.bf16.msra.mxu0 %v2426_v35  ;;  %v2538_v34 = vunpack.c.h.s8.bf16 %v2074_v32  ;;  %v2267_v35 = vunpack.c.l.s8.bf16 %v1947_v24  ;;  %v2012_v24 = vld [vmem:[%s5018_s21 + $0x420] sm:$0xff] }
 0x35c   : > { %2746 = vmatprep.subr.bf16.mxu1 %v2155_v26  ;;  %2787 = vmatprep.subr.bf16.mxu0 %v2411_v37  ;;  %v2523_v26 = vunpack.c.l.s8.bf16 %v2075_v25  ;;  %v1933_v37 = vld [vmem:[%s5018_s21 + $0x1a8] sm:$0xff] }
 0x35f   : > { %2747 = vmatpush1.bf16.msra.mxu1 %v2154_v3  ;;  %2788 = vmatpush1.bf16.msra.mxu0 %v2410_v0  ;;  %v2522_v3 = vunpack.c.l.s8.bf16 %v2074_v32  ;;  %v2253_v0 = vunpack.c.h.s8.bf16 %v1933_v37 }
 0x360   : > { %2748 = vmatprep.subr.bf16.mxu1 %v2139_v39  ;;  %2789 = vmatprep.subr.bf16.mxu0 %v2395_v41  ;;  %v2509_v39 = vunpack.c.h.s8.bf16 %v2061_v38  ;;  %v1932_v41 = vld [vmem:[%s5018_s21 + $0x1a0] sm:$0xff] }
 0x361   : > { %v2252_v43 = vunpack.c.h.s8.bf16 %v1932_v41  ;;  %v2236_v49 = vunpack.c.l.s8.bf16 %v1932_v41  ;;  %v2109_v41 = vld [vmem:[%s5018_s21 + $0x728] sm:$0xff] }
 0x363   : > { %2749 = vmatpush1.bf16.msra.mxu1 %v2138_v44  ;;  %2790 = vmatpush1.bf16.msra.mxu0 %v2394_v45  ;;  %v2508_v44 = vunpack.c.h.s8.bf16 %v2060_v42  ;;  %v2237_v45 = vunpack.c.l.s8.bf16 %v1933_v37  ;;  %v2124_v37 = vld [vmem:[%s5018_s21 + $0x7a0] sm:$0xff] }
 0x364   : > { %2750 = vmatprep.subr.bf16.mxu1 %v2379_v46  ;;  %2791 = vmatprep.subr.bf16.mxu0 %v2635_v47  ;;  %v2493_v46 = vunpack.c.l.s8.bf16 %v2061_v38  ;;  %v1917_v47 = vld [vmem:[%s5018_s21 + $0x128] sm:$0xff] }
 0x367   : > { %2751 = vmatpush2.bf16.msra.mxu1 %v2378_v50  ;;  %2792 = vmatpush2.bf16.msra.mxu0 %v2634_v51  ;;  %v2492_v50 = vunpack.c.l.s8.bf16 %v2060_v42  ;;  %v2221_v51 = vunpack.c.h.s8.bf16 %v1917_v47 }
 0x368   : > { %2752 = vmatprep.subr.bf16.mxu1 %v2363_v52  ;;  %2793 = vmatprep.subr.bf16.mxu0 %v2619_v53  ;;  %v1916_v52 = vld [vmem:[%s5018_s21 + $0x120] sm:$0xff]  ;;  %v2477_v53 = vunpack.c.h.s8.bf16 %v2045_v48 }
 0x369   : > { %v2220_v55 = vunpack.c.h.s8.bf16 %v1916_v52  ;;  %v2204_v6 = vunpack.c.l.s8.bf16 %v1916_v52  ;;  %v1965_v52 = vld [vmem:[%s5018_s21 + $0x2a8] sm:$0xff] }
 0x36b   : > { %2753 = vmatpush2.bf16.msra.mxu1 %v2362_v56  ;;  %2794 = vmatpush2.bf16.msra.mxu0 %v2618_v59  ;;  %v2476_v56 = vunpack.c.h.s8.bf16 %v2044_v54  ;;  %v2205_v59 = vunpack.c.l.s8.bf16 %v1917_v47  ;;  %v2108_v47 = vld [vmem:[%s5018_s21 + $0x720] sm:$0xff] }
 0x36c   : > { %2754 = vmatprep.subr.bf16.mxu1 %v2347_v60  ;;  %2795 = vmatprep.subr.bf16.mxu0 %v2603_v63  ;;  %v2461_v60 = vunpack.c.l.s8.bf16 %v2045_v48  ;;  %v1901_v63 = vld [vmem:[%s5018_s21 + $0xa8] sm:$0xff] }
 0x36f   : > { %2755 = vmatpush2.bf16.msra.mxu1 %v2346_v7  ;;  %2796 = vmatpush2.bf16.msra.mxu0 %v2602_v9  ;;  %v2460_v7 = vunpack.c.l.s8.bf16 %v2044_v54  ;;  %v2189_v9 = vunpack.c.h.s8.bf16 %v1901_v63 }
 0x370   : > { %2756 = vmatprep.subr.bf16.mxu1 %v2331_v10  ;;  %2797 = vmatprep.subr.bf16.mxu0 %v2587_v11  ;;  %v1900_v10 = vld [vmem:[%s5018_s21 + $0xa0] sm:$0xff]  ;;  %v2445_v11 = vunpack.c.h.s8.bf16 %v2029_v5 }
 0x371   : > { %v2188_v13 = vunpack.c.h.s8.bf16 %v1900_v10  ;;  %v2172_v19 = vunpack.c.l.s8.bf16 %v1900_v10  ;;  %v1949_v10 = vld [vmem:[%s5018_s21 + $0x228] sm:$0xff] }
 0x373   : > { %2757 = vmatpush2.bf16.msra.mxu1 %v2330_v14  ;;  %2798 = vmatpush2.bf16.msra.mxu0 %v2586_v15  ;;  %v2444_v14 = vunpack.c.h.s8.bf16 %v2028_v12  ;;  %v2173_v15 = vunpack.c.l.s8.bf16 %v1901_v63  ;;  %v2092_v63 = vld [vmem:[%s5018_s21 + $0x6a0] sm:$0xff] }
 0x374   : > { %2758 = vmatprep.subr.bf16.mxu1 %v2315_v16  ;;  %2799 = vmatprep.subr.bf16.mxu0 %v2571_v17  ;;  %v2429_v16 = vunpack.c.l.s8.bf16 %v2029_v5  ;;  %v1885_v17 = vld [vmem:[%s5018_s21 + $0x28] sm:$0xff] }
 0x377   : > { %2759 = vmatpush2.bf16.msra.mxu1 %v2314_v20  ;;  %2800 = vmatpush2.bf16.msra.mxu0 %v2570_v21  ;;  %v2428_v20 = vunpack.c.l.s8.bf16 %v2028_v12  ;;  %v2157_v21 = vunpack.c.h.s8.bf16 %v1885_v17 }
 0x378   : > { %2760 = vmatprep.subr.bf16.mxu1 %v2299_v22  ;;  %2801 = vmatprep.subr.bf16.mxu0 %v2555_v23  ;;  %v1884_v22 = vld [vmem:[%s5018_s21 + $0x20] sm:$0xff]  ;;  %v2413_v23 = vunpack.c.h.s8.bf16 %v2013_v18 }
 0x379   : > { %v2156_v25 = vunpack.c.h.s8.bf16 %v1884_v22  ;;  %v2140_v32 = vunpack.c.l.s8.bf16 %v1884_v22  ;;  %v1935_v22 = vld [vmem:[%s5018_s21 + $0x1b8] sm:$0xff] }
 0x37b   : > { %2761 = vmatpush2.bf16.msra.mxu1 %v2298_v27  ;;  %2802 = vmatpush2.bf16.msra.mxu0 %v2554_v28  ;;  %v2412_v27 = vunpack.c.h.s8.bf16 %v2012_v24  ;;  %v2141_v28 = vunpack.c.l.s8.bf16 %v1885_v17  ;;  %v2076_v17 = vld [vmem:[%s5018_s21 + $0x620] sm:$0xff] }
 0x37c   : > { %2762 = vmatprep.subr.bf16.mxu1 %v2283_v29  ;;  %2803 = vmatprep.subr.bf16.mxu0 %v2539_v30  ;;  %v2397_v29 = vunpack.c.l.s8.bf16 %v2013_v18  ;;  %v1997_v30 = vld [vmem:[%s5018_s21 + $0x3a8] sm:$0xff] }
 0x37f   : > { %2763 = vmatpush2.bf16.msra.mxu1 %v2282_v33  ;;  %2804 = vmatpush2.bf16.msra.mxu0 %v2538_v34  ;;  %v2396_v33 = vunpack.c.l.s8.bf16 %v2012_v24  ;;  %v2381_v34 = vunpack.c.h.s8.bf16 %v1997_v30 }
 0x380   : > { %2764 = vmatprep.subr.bf16.mxu1 %v2267_v35  ;;  %2805 = vmatprep.subr.bf16.mxu0 %v2523_v26  ;;  %v1996_v35 = vld [vmem:[%s5018_s21 + $0x3a0] sm:$0xff]  ;;  %v2637_v26 = vunpack.c.h.s8.bf16 %v2125_v31 }
 0x381   : > { %v2380_v38 = vunpack.c.h.s8.bf16 %v1996_v35  ;;  %v2364_v42 = vunpack.c.l.s8.bf16 %v1996_v35 }
 0x383   : > { %2765 = vmatpush2.bf16.msra.mxu1 %v2266_v1  ;;  %2806 = vmatpush2.bf16.msra.mxu0 %v2522_v3  ;;  %v2636_v1 = vunpack.c.h.s8.bf16 %v2124_v37  ;;  %v2365_v3 = vunpack.c.l.s8.bf16 %v1997_v30  ;;  %v2062_v30 = vld [vmem:[%s5018_s21 + $0x5b0] sm:$0xff] }
 0x384   : > { %2816 = vmatprep.subr.bf16.mxu1 %v2253_v0  ;;  %2857 = vmatprep.subr.bf16.mxu0 %v2509_v39  ;;  %v2621_v0 = vunpack.c.l.s8.bf16 %v2125_v31  ;;  %v1981_v39 = vld [vmem:[%s5018_s21 + $0x328] sm:$0xff] }
 0x386   : > { %2767 = vmatmul.mubr.bf16.vlgmr.msra.gmra.mxu1 %v5130_v61  ;;  %2808 = vmatmul.mubr.bf16.vlgmr.msra.gmra.mxu0 %v5132_v62 }
 0x387   : > { %2817 = vmatpush1.bf16.msra.mxu1 %v2252_v43  ;;  %2848 = vmatprep.mubr.bf16.mxu1 %v5126_v57  ;;  %v2620_v43 = vunpack.c.l.s8.bf16 %v2124_v37 }
 0x388   : > { %2858 = vmatpush1.bf16.msra.mxu0 %v2508_v44  ;;  %2889 = vmatprep.mubr.bf16.mxu0 %v5128_v58  ;;  %v2349_v44 = vunpack.c.h.s8.bf16 %v1981_v39 }
 0x389   : > { %2818 = vmatprep.subr.bf16.mxu1 %v2237_v45  ;;  %2859 = vmatprep.subr.bf16.mxu0 %v2493_v46  ;;  %v1980_v45 = vld [vmem:[%s5018_s21 + $0x320] sm:$0xff]  ;;  %v2605_v46 = vunpack.c.h.s8.bf16 %v2109_v41 }
 0x38a   : > { %v2348_v48 = vunpack.c.h.s8.bf16 %v1980_v45  ;;  %v2332_v54 = vunpack.c.l.s8.bf16 %v1980_v45  ;;  %v1903_v45 = vld [vmem:[%s5018_s21 + $0xb8] sm:$0xff] }
 0x38b   : > { %2819 = vmatpush1.bf16.msra.mxu1 %v2236_v49  ;;  %v2604_v49 = vunpack.c.h.s8.bf16 %v2108_v47 }
 0x38c   : > { %2860 = vmatpush1.bf16.msra.mxu0 %v2492_v50  ;;  %2820 = vmatprep.subr.bf16.mxu1 %v2221_v51  ;;  %v2333_v50 = vunpack.c.l.s8.bf16 %v1981_v39  ;;  %v2589_v51 = vunpack.c.l.s8.bf16 %v2109_v41  ;;  %v2046_v39 = vld [vmem:[%s5018_s21 + $0x530] sm:$0xff] }
 0x38d   : > { %2861 = vmatprep.subr.bf16.mxu0 %v2477_v53  ;;  %v2093_v53 = vld [vmem:[%s5018_s21 + $0x6a8] sm:$0xff] }
 0x38f   : > { %2821 = vmatpush1.bf16.msra.mxu1 %v2220_v55  ;;  %v2588_v55 = vunpack.c.l.s8.bf16 %v2108_v47 }
 0x390   : > { %2862 = vmatpush1.bf16.msra.mxu0 %v2476_v56  ;;  %2822 = vmatprep.subr.bf16.mxu1 %v2205_v59  ;;  %v2317_v56 = vunpack.c.h.s8.bf16 %v1965_v52  ;;  %v1964_v59 = vld [vmem:[%s5018_s21 + $0x2a0] sm:$0xff] }
 0x391   : > { %2863 = vmatprep.subr.bf16.mxu0 %v2461_v60  ;;  %v2573_v60 = vunpack.c.h.s8.bf16 %v2093_v53  ;;  %v2316_v5 = vunpack.c.h.s8.bf16 %v1964_v59  ;;  %v2300_v12 = vunpack.c.l.s8.bf16 %v1964_v59  ;;  %v1887_v59 = vld [vmem:[%s5018_s21 + $0x38] sm:$0xff] }
 0x393   : > { %2823 = vmatpush1.bf16.msra.mxu1 %v2204_v6  ;;  %v2572_v6 = vunpack.c.h.s8.bf16 %v2092_v63 }
 0x394   : > { %2864 = vmatpush1.bf16.msra.mxu0 %v2460_v7  ;;  %2824 = vmatprep.subr.bf16.mxu1 %v2189_v9  ;;  %v2301_v7 = vunpack.c.l.s8.bf16 %v1965_v52  ;;  %v2557_v9 = vunpack.c.l.s8.bf16 %v2093_v53  ;;  %v2030_v52 = vld [vmem:[%s5018_s21 + $0x4b0] sm:$0xff] }
 0x395   : > { %2865 = vmatprep.subr.bf16.mxu0 %v2445_v11  ;;  %v2077_v11 = vld [vmem:[%s5018_s21 + $0x628] sm:$0xff] }
 0x397   : > { %2825 = vmatpush1.bf16.msra.mxu1 %v2188_v13  ;;  %v2556_v13 = vunpack.c.l.s8.bf16 %v2092_v63 }
 0x398   : > { %2866 = vmatpush1.bf16.msra.mxu0 %v2444_v14  ;;  %2826 = vmatprep.subr.bf16.mxu1 %v2173_v15  ;;  %v2285_v14 = vunpack.c.h.s8.bf16 %v1949_v10  ;;  %v1948_v15 = vld [vmem:[%s5018_s21 + $0x220] sm:$0xff] }
 0x399   : > { %2867 = vmatprep.subr.bf16.mxu0 %v2429_v16  ;;  %v2541_v16 = vunpack.c.h.s8.bf16 %v2077_v11  ;;  %v2284_v18 = vunpack.c.h.s8.bf16 %v1948_v15  ;;  %v2268_v24 = vunpack.c.l.s8.bf16 %v1948_v15  ;;  %v1999_v15 = vld [vmem:[%s5018_s21 + $0x3b8] sm:$0xff] }
 0x39b   : > { %2827 = vmatpush1.bf16.msra.mxu1 %v2172_v19  ;;  %v2540_v19 = vunpack.c.h.s8.bf16 %v2076_v17 }
 0x39c   : > { %2868 = vmatpush1.bf16.msra.mxu0 %v2428_v20  ;;  %2828 = vmatprep.subr.bf16.mxu1 %v2157_v21  ;;  %v2269_v20 = vunpack.c.l.s8.bf16 %v1949_v10  ;;  %v2525_v21 = vunpack.c.l.s8.bf16 %v2077_v11  ;;  %v2014_v10 = vld [vmem:[%s5018_s21 + $0x430] sm:$0xff] }
 0x39d   : > { %2869 = vmatprep.subr.bf16.mxu0 %v2413_v23  ;;  %v2063_v23 = vld [vmem:[%s5018_s21 + $0x5b8] sm:$0xff] }
 0x39e   : > { %v2495_v35 = vunpack.c.l.s8.bf16 %v2063_v23 }
 0x39f   : > { %2829 = vmatpush1.bf16.msra.mxu1 %v2156_v25  ;;  %v2524_v25 = vunpack.c.l.s8.bf16 %v2076_v17 }
 0x3a0   : > { %2870 = vmatpush1.bf16.msra.mxu0 %v2412_v27  ;;  %2830 = vmatprep.subr.bf16.mxu1 %v2141_v28  ;;  %v2255_v27 = vunpack.c.h.s8.bf16 %v1935_v22  ;;  %v1934_v28 = vld [vmem:[%s5018_s21 + $0x1b0] sm:$0xff] }
 0x3a1   : > { %2871 = vmatprep.subr.bf16.mxu0 %v2397_v29  ;;  %v2511_v29 = vunpack.c.h.s8.bf16 %v2063_v23  ;;  %v2254_v31 = vunpack.c.h.s8.bf16 %v1934_v28  ;;  %v2238_v37 = vunpack.c.l.s8.bf16 %v1934_v28  ;;  %v1983_v28 = vld [vmem:[%s5018_s21 + $0x338] sm:$0xff] }
 0x3a3   : > { %2831 = vmatpush1.bf16.msra.mxu1 %v2140_v32  ;;  %v2510_v32 = vunpack.c.h.s8.bf16 %v2062_v30 }
 0x3a4   : > { %2872 = vmatpush1.bf16.msra.mxu0 %v2396_v33  ;;  %2832 = vmatprep.subr.bf16.mxu1 %v2381_v34  ;;  %v2239_v33 = vunpack.c.l.s8.bf16 %v1935_v22  ;;  %v1919_v34 = vld [vmem:[%s5018_s21 + $0x138] sm:$0xff]  ;;  %v2126_v22 = vld [vmem:[%s5018_s21 + $0x7b0] sm:$0xff] }
 0x3a5   : > { %2873 = vmatprep.subr.bf16.mxu0 %v2637_v26  ;;  %v2047_v26 = vld [vmem:[%s5018_s21 + $0x538] sm:$0xff] }
 0x3a7   : > { %2833 = vmatpush2.bf16.msra.mxu1 %v2380_v38  ;;  %v2494_v38 = vunpack.c.l.s8.bf16 %v2062_v30 }
 0x3a8   : > { %2874 = vmatpush2.bf16.msra.mxu0 %v2636_v1  ;;  %2834 = vmatprep.subr.bf16.mxu1 %v2365_v3  ;;  %v2223_v1 = vunpack.c.h.s8.bf16 %v1919_v34  ;;  %v1918_v3 = vld [vmem:[%s5018_s21 + $0x130] sm:$0xff] }
 0x3a9   : > { %2875 = vmatprep.subr.bf16.mxu0 %v2621_v0  ;;  %v2479_v0 = vunpack.c.h.s8.bf16 %v2047_v26  ;;  %v2222_v41 = vunpack.c.h.s8.bf16 %v1918_v3  ;;  %v2206_v47 = vunpack.c.l.s8.bf16 %v1918_v3  ;;  %v1967_v3 = vld [vmem:[%s5018_s21 + $0x2b8] sm:$0xff] }
 0x3ab   : > { %2835 = vmatpush2.bf16.msra.mxu1 %v2364_v42  ;;  %v2478_v42 = vunpack.c.h.s8.bf16 %v2046_v39 }
 0x3ac   : > { %2876 = vmatpush2.bf16.msra.mxu0 %v2620_v43  ;;  %2836 = vmatprep.subr.bf16.mxu1 %v2349_v44  ;;  %v2207_v43 = vunpack.c.l.s8.bf16 %v1919_v34  ;;  %v2463_v44 = vunpack.c.l.s8.bf16 %v2047_v26 }
 0x3ad   : > { %2877 = vmatprep.subr.bf16.mxu0 %v2605_v46  ;;  %v2031_v46 = vld [vmem:[%s5018_s21 + $0x4b8] sm:$0xff] }
 0x3af   : > { %2837 = vmatpush2.bf16.msra.mxu1 %v2348_v48  ;;  %v2462_v48 = vunpack.c.l.s8.bf16 %v2046_v39 }
 0x3b0   : > { %2878 = vmatpush2.bf16.msra.mxu0 %v2604_v49  ;;  %2838 = vmatprep.subr.bf16.mxu1 %v2333_v50  ;;  %v2191_v49 = vunpack.c.h.s8.bf16 %v1903_v45  ;;  %v1902_v50 = vld [vmem:[%s5018_s21 + $0xb0] sm:$0xff] }
 0x3b1   : > { %2879 = vmatprep.subr.bf16.mxu0 %v2589_v51  ;;  %v2447_v51 = vunpack.c.h.s8.bf16 %v2031_v46  ;;  %v2190_v53 = vunpack.c.h.s8.bf16 %v1902_v50  ;;  %v2174_v63 = vunpack.c.l.s8.bf16 %v1902_v50  ;;  %v1951_v50 = vld [vmem:[%s5018_s21 + $0x238] sm:$0xff] }
 0x3b3   : > { %2839 = vmatpush2.bf16.msra.mxu1 %v2332_v54  ;;  %v2446_v54 = vunpack.c.h.s8.bf16 %v2030_v52 }
 0x3b4   : > { %2880 = vmatpush2.bf16.msra.mxu0 %v2588_v55  ;;  %2840 = vmatprep.subr.bf16.mxu1 %v2317_v56  ;;  %v2175_v55 = vunpack.c.l.s8.bf16 %v1903_v45  ;;  %v2431_v56 = vunpack.c.l.s8.bf16 %v2031_v46  ;;  %v2094_v45 = vld [vmem:[%s5018_s21 + $0x6b0] sm:$0xff] }
 0x3b5   : > { %2881 = vmatprep.subr.bf16.mxu0 %v2573_v60  ;;  %v2015_v60 = vld [vmem:[%s5018_s21 + $0x438] sm:$0xff] }
 0x3b7   : > { %2841 = vmatpush2.bf16.msra.mxu1 %v2316_v5  ;;  %v2430_v5 = vunpack.c.l.s8.bf16 %v2030_v52 }
 0x3b8   : > { %2882 = vmatpush2.bf16.msra.mxu0 %v2572_v6  ;;  %2842 = vmatprep.subr.bf16.mxu1 %v2301_v7  ;;  %v2159_v6 = vunpack.c.h.s8.bf16 %v1887_v59  ;;  %v1886_v7 = vld [vmem:[%s5018_s21 + $0x30] sm:$0xff] }
 0x3b9   : > { %2883 = vmatprep.subr.bf16.mxu0 %v2557_v9  ;;  %v2415_v9 = vunpack.c.h.s8.bf16 %v2015_v60  ;;  %v2158_v11 = vunpack.c.h.s8.bf16 %v1886_v7  ;;  %v2142_v17 = vunpack.c.l.s8.bf16 %v1886_v7  ;;  %v1937_v7 = vld [vmem:[%s5018_s21 + $0x1c8] sm:$0xff] }
 0x3bb   : > { %2843 = vmatpush2.bf16.msra.mxu1 %v2300_v12  ;;  %v2414_v12 = vunpack.c.h.s8.bf16 %v2014_v10 }
 0x3bc   : > { %2884 = vmatpush2.bf16.msra.mxu0 %v2556_v13  ;;  %2844 = vmatprep.subr.bf16.mxu1 %v2285_v14  ;;  %v2143_v13 = vunpack.c.l.s8.bf16 %v1887_v59  ;;  %v2399_v14 = vunpack.c.l.s8.bf16 %v2015_v60  ;;  %v2078_v59 = vld [vmem:[%s5018_s21 + $0x630] sm:$0xff] }
 0x3bd   : > { %2885 = vmatprep.subr.bf16.mxu0 %v2541_v16  ;;  %v2127_v16 = vld [vmem:[%s5018_s21 + $0x7b8] sm:$0xff] }
 0x3bf   : > { %2845 = vmatpush2.bf16.msra.mxu1 %v2284_v18  ;;  %v2398_v18 = vunpack.c.l.s8.bf16 %v2014_v10 }
 0x3c0   : > { %2886 = vmatpush2.bf16.msra.mxu0 %v2540_v19  ;;  %2846 = vmatprep.subr.bf16.mxu1 %v2269_v20  ;;  %v2383_v19 = vunpack.c.h.s8.bf16 %v1999_v15  ;;  %v1998_v20 = vld [vmem:[%s5018_s21 + $0x3b0] sm:$0xff] }
 0x3c1   : > { %2887 = vmatprep.subr.bf16.mxu0 %v2525_v21  ;;  %v2639_v21 = vunpack.c.h.s8.bf16 %v2127_v16  ;;  %v2382_v23 = vunpack.c.h.s8.bf16 %v1998_v20  ;;  %v2366_v30 = vunpack.c.l.s8.bf16 %v1998_v20 }
 0x3c3   : > { %2847 = vmatpush2.bf16.msra.mxu1 %v2268_v24  ;;  %v2638_v24 = vunpack.c.h.s8.bf16 %v2126_v22 }
 0x3c4   : > { %2888 = vmatpush2.bf16.msra.mxu0 %v2524_v25  ;;  %2898 = vmatprep.subr.bf16.mxu1 %v2255_v27  ;;  %v2367_v25 = vunpack.c.l.s8.bf16 %v1999_v15  ;;  %v2623_v27 = vunpack.c.l.s8.bf16 %v2127_v16  ;;  %v2064_v15 = vld [vmem:[%s5018_s21 + $0x5c0] sm:$0xff] }
 0x3c5   : > { %2939 = vmatprep.subr.bf16.mxu0 %v2511_v29  ;;  %v2111_v29 = vld [vmem:[%s5018_s21 + $0x738] sm:$0xff]  ;;  %v5250_v16 = vld [vmem:[%s5247_s28] sm:$0xff] }
 0x3c6   : > { %2849 = vmatmul.mubr.bf16.vlgmr.msra.gmra.mxu1 %v5130_v61  ;;  %v2607_v34 = vunpack.c.h.s8.bf16 %v2111_v29  ;;  %v3322_v20 = vrot.slane %v5250_v16, %v5075_v8 }
 0x3c7   : > { %2890 = vmatmul.mubr.bf16.vlgmr.msra.gmra.mxu0 %v5132_v62  ;;  %2899 = vmatpush1.bf16.msra.mxu1 %v2254_v31  ;;  %v2622_v31 = vunpack.c.l.s8.bf16 %v2126_v22  ;;  %v1921_v22 = vld [vmem:[%s5018_s21 + $0x148] sm:$0xff] }
 0x3c8   : > { %2930 = vmatprep.mubr.bf16.mxu1 %v5126_v57  ;;  %2940 = vmatpush1.bf16.msra.mxu0 %v2510_v32  ;;  %v2351_v32 = vunpack.c.h.s8.bf16 %v1983_v28 }
 0x3c9   : > { %2971 = vmatprep.mubr.bf16.mxu0 %v5128_v58  ;;  %2900 = vmatprep.subr.bf16.mxu1 %v2239_v33  ;;  %v1982_v33 = vld [vmem:[%s5018_s21 + $0x330] sm:$0xff] }
 0x3ca   : > { %2941 = vmatprep.subr.bf16.mxu0 %v2495_v35  ;;  %v2110_v35 = vld [vmem:[%s5018_s21 + $0x730] sm:$0xff]  ;;  %v2350_v26 = vunpack.c.h.s8.bf16 %v1982_v33  ;;  %v2334_v39 = vunpack.c.l.s8.bf16 %v1982_v33 }
 0x3cb   : > { %2901 = vmatpush1.bf16.msra.mxu1 %v2238_v37  ;;  %v2606_v37 = vunpack.c.h.s8.bf16 %v2110_v35 }
 0x3cc   : > { %2942 = vmatpush1.bf16.msra.mxu0 %v2494_v38  ;;  %2902 = vmatprep.subr.bf16.mxu1 %v2223_v1  ;;  %v2335_v38 = vunpack.c.l.s8.bf16 %v1983_v28  ;;  %v2591_v1 = vunpack.c.l.s8.bf16 %v2111_v29 }
 0x3cd   : > { %2943 = vmatprep.subr.bf16.mxu0 %v2479_v0  ;;  %v2095_v0 = vld [vmem:[%s5018_s21 + $0x6b8] sm:$0xff] }
 0x3cf   : > { %2903 = vmatpush1.bf16.msra.mxu1 %v2222_v41  ;;  %v2590_v41 = vunpack.c.l.s8.bf16 %v2110_v35  ;;  %v2225_v35 = vunpack.c.h.s8.bf16 %v1921_v22 }
 0x3d0   : > { %2944 = vmatpush1.bf16.msra.mxu0 %v2478_v42  ;;  %2904 = vmatprep.subr.bf16.mxu1 %v2207_v43  ;;  %v2319_v42 = vunpack.c.h.s8.bf16 %v1967_v3  ;;  %v1966_v43 = vld [vmem:[%s5018_s21 + $0x2b0] sm:$0xff] }
 0x3d1   : > { %2945 = vmatprep.subr.bf16.mxu0 %v2463_v44  ;;  %v2575_v44 = vunpack.c.h.s8.bf16 %v2095_v0  ;;  %v2318_v46 = vunpack.c.h.s8.bf16 %v1966_v43  ;;  %v2302_v52 = vunpack.c.l.s8.bf16 %v1966_v43 }
 0x3d3   : > { %2905 = vmatpush1.bf16.msra.mxu1 %v2206_v47  ;;  %v2574_v47 = vunpack.c.h.s8.bf16 %v2094_v45 }
 0x3d4   : > { %2946 = vmatpush1.bf16.msra.mxu0 %v2462_v48  ;;  %2906 = vmatprep.subr.bf16.mxu1 %v2191_v49  ;;  %v2303_v48 = vunpack.c.l.s8.bf16 %v1967_v3  ;;  %v2559_v49 = vunpack.c.l.s8.bf16 %v2095_v0  ;;  %v2048_v0 = vld [vmem:[%s5018_s21 + $0x540] sm:$0xff] }
 0x3d5   : > { %2947 = vmatprep.subr.bf16.mxu0 %v2447_v51  ;;  %v2079_v51 = vld [vmem:[%s5018_s21 + $0x638] sm:$0xff] }
 0x3d7   : > { %2907 = vmatpush1.bf16.msra.mxu1 %v2190_v53  ;;  %v2558_v53 = vunpack.c.l.s8.bf16 %v2094_v45 }
 0x3d8   : > { %2948 = vmatpush1.bf16.msra.mxu0 %v2446_v54  ;;  %2908 = vmatprep.subr.bf16.mxu1 %v2175_v55  ;;  %v2287_v54 = vunpack.c.h.s8.bf16 %v1951_v50  ;;  %v1950_v55 = vld [vmem:[%s5018_s21 + $0x230] sm:$0xff] }
 0x3d9   : > { %2949 = vmatprep.subr.bf16.mxu0 %v2431_v56  ;;  %v2543_v56 = vunpack.c.h.s8.bf16 %v2079_v51  ;;  %v2286_v60 = vunpack.c.h.s8.bf16 %v1950_v55  ;;  %v2270_v10 = vunpack.c.l.s8.bf16 %v1950_v55 }
 0x3db   : > { %2909 = vmatpush1.bf16.msra.mxu1 %v2174_v63  ;;  %v2542_v63 = vunpack.c.h.s8.bf16 %v2078_v59 }
 0x3dc   : > { %2950 = vmatpush1.bf16.msra.mxu0 %v2430_v5  ;;  %2910 = vmatprep.subr.bf16.mxu1 %v2159_v6  ;;  %v2271_v5 = vunpack.c.l.s8.bf16 %v1951_v50  ;;  %v2527_v6 = vunpack.c.l.s8.bf16 %v2079_v51  ;;  %v1905_v51 = vld [vmem:[%s5018_s21 + $0xc8] sm:$0xff] }
 0x3dd   : > { %2951 = vmatprep.subr.bf16.mxu0 %v2415_v9  ;;  %v2065_v9 = vld [vmem:[%s5018_s21 + $0x5c8] sm:$0xff]  ;;  %v2193_v55 = vunpack.c.h.s8.bf16 %v1905_v51 }
 0x3df   : > { %2911 = vmatpush1.bf16.msra.mxu1 %v2158_v11  ;;  %v2526_v11 = vunpack.c.l.s8.bf16 %v2078_v59 }
 0x3e0   : > { %2952 = vmatpush1.bf16.msra.mxu0 %v2414_v12  ;;  %2912 = vmatprep.subr.bf16.mxu1 %v2143_v13  ;;  %v2257_v12 = vunpack.c.h.s8.bf16 %v1937_v7  ;;  %v1936_v13 = vld [vmem:[%s5018_s21 + $0x1c0] sm:$0xff] }
 0x3e1   : > { %2953 = vmatprep.subr.bf16.mxu0 %v2399_v14  ;;  %v2513_v14 = vunpack.c.h.s8.bf16 %v2065_v9 }
 0x3e3   : > { %2913 = vmatpush1.bf16.msra.mxu1 %v2142_v17  ;;  %v2256_v17 = vunpack.c.h.s8.bf16 %v1936_v13 }
 0x3e4   : > { %2954 = vmatpush1.bf16.msra.mxu0 %v2398_v18  ;;  %2914 = vmatprep.subr.bf16.mxu1 %v2383_v19  ;;  %v5255_v18 = vld [vmem:[%s5252_s11] sm:$0xff]  ;;  %v2512_v19 = vunpack.c.h.s8.bf16 %v2064_v15 }
 0x3e5   : > { %2955 = vmatprep.subr.bf16.mxu0 %v2639_v21  ;;  %v2241_v21 = vunpack.c.l.s8.bf16 %v1937_v7  ;;  %v3420_v29 = vrot.slane %v5255_v18, %v5075_v8 }
 0x3e7   : > { %2915 = vmatpush2.bf16.msra.mxu1 %v2382_v23 }
 0x3e8   : > { %2956 = vmatpush2.bf16.msra.mxu0 %v2638_v24  ;;  %2916 = vmatprep.subr.bf16.mxu1 %v2367_v25  ;;  %v2497_v25 = vunpack.c.l.s8.bf16 %v2065_v9  ;;  %v1889_v9 = vld [vmem:[%s5018_s21 + $0x48] sm:$0xff] }
 0x3e9   : > { %2957 = vmatprep.subr.bf16.mxu0 %v2623_v27  ;;  %v2049_v27 = vld [vmem:[%s5018_s21 + $0x548] sm:$0xff] }
 0x3ea   : > { %v2481_v3 = vunpack.c.h.s8.bf16 %v2049_v27  ;;  %v2465_v50 = vunpack.c.l.s8.bf16 %v2049_v27  ;;  %v2129_v27 = vld [vmem:[%s5018_s21 + $0x7c8] sm:$0xff] }
 0x3eb   : > { %2917 = vmatpush2.bf16.msra.mxu1 %v2366_v30  ;;  %v3326_v30 = vrot.slane %v5250_v16, %v5078_v40 }
 0x3ec   : > { %2958 = vmatpush2.bf16.msra.mxu0 %v2622_v31  ;;  %2918 = vmatprep.subr.bf16.mxu1 %v2351_v32  ;;  %v2240_v31 = vunpack.c.l.s8.bf16 %v1936_v13  ;;  %v2161_v13 = vunpack.c.h.s8.bf16 %v1889_v9 }
 0x3ed   : > { %2959 = vmatprep.subr.bf16.mxu0 %v2607_v34  ;;  %v2496_v34 = vunpack.c.l.s8.bf16 %v2064_v15 }
 0x3ef   : > { %2919 = vmatpush2.bf16.msra.mxu1 %v2350_v26  ;;  %v1920_v26 = vld [vmem:[%s5018_s21 + $0x140] sm:$0xff] }
 0x3f0   : > { %2960 = vmatpush2.bf16.msra.mxu0 %v2606_v37  ;;  %2920 = vmatprep.subr.bf16.mxu1 %v2335_v38 }
 0x3f1   : > { %2961 = vmatprep.subr.bf16.mxu0 %v2591_v1  ;;  %v3424_v1 = vrot.slane %v5255_v18, %v5078_v40 }
 0x3f3   : > { %2921 = vmatpush2.bf16.msra.mxu1 %v2334_v39 }
 0x3f4   : > { %2962 = vmatpush2.bf16.msra.mxu0 %v2590_v41  ;;  %2922 = vmatprep.subr.bf16.mxu1 %v2319_v42 }
 0x3f5   : > { %2963 = vmatprep.subr.bf16.mxu0 %v2575_v44  ;;  %v2224_v44 = vunpack.c.h.s8.bf16 %v1920_v26 }
 0x3f7   : > { %2923 = vmatpush2.bf16.msra.mxu1 %v2318_v46 }
 0x3f8   : > { %2964 = vmatpush2.bf16.msra.mxu0 %v2574_v47  ;;  %2924 = vmatprep.subr.bf16.mxu1 %v2303_v48  ;;  %v2480_v47 = vunpack.c.h.s8.bf16 %v2048_v0  ;;  %v2209_v48 = vunpack.c.l.s8.bf16 %v1921_v22 }
 0x3f9   : > { %2965 = vmatprep.subr.bf16.mxu0 %v2559_v49 }
 0x3fb   : > { %2925 = vmatpush2.bf16.msra.mxu1 %v2302_v52  ;;  %v2033_v52 = vld [vmem:[%s5018_s21 + $0x4c8] sm:$0xff] }
 0x3fc   : > { %2966 = vmatpush2.bf16.msra.mxu0 %v2558_v53  ;;  %2926 = vmatprep.subr.bf16.mxu1 %v2287_v54  ;;  %v2208_v53 = vunpack.c.l.s8.bf16 %v1920_v26  ;;  %v2464_v54 = vunpack.c.l.s8.bf16 %v2048_v0  ;;  %v2449_v59 = vunpack.c.h.s8.bf16 %v2033_v52  ;;  %v2433_v7 = vunpack.c.l.s8.bf16 %v2033_v52 }
 0x3fd   : > { %2967 = vmatprep.subr.bf16.mxu0 %v2543_v56  ;;  %v1904_v56 = vld [vmem:[%s5018_s21 + $0xc0] sm:$0xff] }
 0x3ff   : > { %2927 = vmatpush2.bf16.msra.mxu1 %v2286_v60  ;;  %v2032_v60 = vld [vmem:[%s5018_s21 + $0x4c0] sm:$0xff] }
 0x400   : > { %2968 = vmatpush2.bf16.msra.mxu0 %v2542_v63  ;;  %2928 = vmatprep.subr.bf16.mxu1 %v2271_v5  ;;  %v2192_v63 = vunpack.c.h.s8.bf16 %v1904_v56  ;;  %v2448_v5 = vunpack.c.h.s8.bf16 %v2032_v60 }
 0x401   : > { %2969 = vmatprep.subr.bf16.mxu0 %v2527_v6  ;;  %v2177_v6 = vunpack.c.l.s8.bf16 %v1905_v51 }
 0x403   : > { %2929 = vmatpush2.bf16.msra.mxu1 %v2270_v10  ;;  %v2017_v10 = vld [vmem:[%s5018_s21 + $0x448] sm:$0xff] }
 0x404   : > { %2970 = vmatpush2.bf16.msra.mxu0 %v2526_v11  ;;  %2980 = vmatprep.subr.bf16.mxu1 %v2257_v12  ;;  %v2176_v11 = vunpack.c.l.s8.bf16 %v1904_v56  ;;  %v2432_v12 = vunpack.c.l.s8.bf16 %v2032_v60  ;;  %v2417_v15 = vunpack.c.h.s8.bf16 %v2017_v10 }
 0x405   : > { %3021 = vmatprep.subr.bf16.mxu0 %v2513_v14  ;;  %v1888_v14 = vld [vmem:[%s5018_s21 + $0x40] sm:$0xff] }
 0x406   : > { %2931 = vmatmul.mubr.bf16.vlgmr.msra.gmra.mxu1 %v5130_v61  ;;  %v2686_v23 = vpop.f32.mrf.mxu1  ;;  %v2727_v24 = vpop.f32.mrf.mxu0 }
 0x407   : > { %2972 = vmatmul.mubr.bf16.vlgmr.msra.gmra.mxu0 %v5132_v62  ;;  %v2728_v28 = vadd.f32 %v2727_v24, %v2686_v23  ;;  %2981 = vmatpush1.bf16.msra.mxu1 %v2256_v17  ;;  %v2016_v17 = vld [vmem:[%s5018_s21 + $0x440] sm:$0xff]  ;;  %v2145_v23 = vunpack.c.l.s8.bf16 %v1889_v9  ;;  %v2401_v24 = vunpack.c.l.s8.bf16 %v2017_v10 }
 0x408   : > { %3012 = vmatprep.mubr.bf16.mxu1 %v5126_v57  ;;  %3022 = vmatpush1.bf16.msra.mxu0 %v2512_v19  ;;  %v2688_v32 = vpop.f32.mrf.mxu1  ;;  %v2729_v33 = vpop.f32.mrf.mxu0  ;;  %v2416_v22 = vunpack.c.h.s8.bf16 %v2016_v17 }
 0x409   : > { %v3399_v37 = vmul.f32 %v3322_v20, %v2728_v28  ;;  %3053 = vmatprep.mubr.bf16.mxu0 %v5128_v58  ;;  %v2730_v38 = vadd.f32 %v2729_v33, %v2688_v32  ;;  %2982 = vmatprep.subr.bf16.mxu1 %v2241_v21  ;;  %v2160_v20 = vunpack.c.h.s8.bf16 %v1888_v14  ;;  %v2144_v28 = vunpack.c.l.s8.bf16 %v1888_v14  ;;  %v2128_v33 = vld [vmem:[%s5018_s21 + $0x7c0] sm:$0xff] }
 0x40a   : > { %3023 = vmatprep.subr.bf16.mxu0 %v2497_v25  ;;  %v2690_v39 = vpop.f32.mrf.mxu1  ;;  %v2731_v41 = vpop.f32.mrf.mxu0  ;;  %v2001_v25 = vld [vmem:[%s5018_s21 + $0x3c8] sm:$0xff]  ;;  %v2641_v32 = vunpack.c.h.s8.bf16 %v2129_v27  ;;  %v2624_v0 = vunpack.c.l.s8.bf16 %v2128_v33 }
 0x40b   : > { %v3497_v42 = vadd.f32 %v3420_v29, %v3399_v37  ;;  %v3400_v43 = vmul.f32 %v3326_v30, %v2730_v38  ;;  %2983 = vmatpush1.bf16.msra.mxu1 %v2240_v31  ;;  %v2400_v29 = vunpack.c.l.s8.bf16 %v2016_v17  ;;  %v2385_v30 = vunpack.c.h.s8.bf16 %v2001_v25  ;;  %v2000_v31 = vld [vmem:[%s5018_s21 + $0x3c0] sm:$0xff]  ;;  %v1985_v38 = vld [vmem:[%s5018_s21 + $0x348] sm:$0xff] }
 0x40c   : > { %3024 = vmatpush1.bf16.msra.mxu0 %v2496_v34  ;;  %v2691_v45 = vpop.f32.mrf.mxu1  ;;  %v2732_v46 = vpop.f32.mrf.mxu0  ;;  %2984 = vmatprep.subr.bf16.mxu1 %v2225_v35  ;;  %v2384_v34 = vunpack.c.h.s8.bf16 %v2000_v31  ;;  %v2640_v35 = vunpack.c.h.s8.bf16 %v2128_v33  ;;  %v2369_v26 = vunpack.c.l.s8.bf16 %v2001_v25  ;;  %v2625_v37 = vunpack.c.l.s8.bf16 %v2129_v27  ;;  %v1984_v41 = vld [vmem:[%s5018_s21 + $0x340] sm:$0xff]  ;;  %v1938_v25 = vld [vmem:[%s5018_s21 + $0x1d0] sm:$0xff]  ;;  %v1923_v33 = vld [vmem:[%s5018_s21 + $0x158] sm:$0xff] }
 0x40d   : > { %4341 = vtanh.f32 %v3497_v42  ;;  %v3498_v49 = vadd.f32 %v3424_v1, %v3400_v43  ;;  %3025 = vmatprep.subr.bf16.mxu0 %v2481_v3  ;;  %v2113_v1 = vld [vmem:[%s5018_s21 + $0x748] sm:$0xff]  ;;  %v2368_v3 = vunpack.c.l.s8.bf16 %v2000_v31  ;;  %v2353_v39 = vunpack.c.h.s8.bf16 %v1985_v38  ;;  %v2112_v43 = vld [vmem:[%s5018_s21 + $0x740] sm:$0xff] }
 0x40e   : > { %v2609_v42 = vunpack.c.h.s8.bf16 %v2113_v1  ;;  %v2608_v45 = vunpack.c.h.s8.bf16 %v2112_v43  ;;  %v2337_v46 = vunpack.c.l.s8.bf16 %v1985_v38  ;;  %v2592_v51 = vunpack.c.l.s8.bf16 %v2112_v43 }
 0x40f   : > { %4343 = vtanh.f32 %v3498_v49  ;;  %2985 = vmatpush1.bf16.msra.mxu1 %v2224_v44  ;;  %v2352_v44 = vunpack.c.h.s8.bf16 %v1984_v41  ;;  %v2097_v49 = vld [vmem:[%s5018_s21 + $0x6c8] sm:$0xff]  ;;  %v3330_v31 = vrot.slane %v5250_v16, %v5115_v4  ;;  %v2227_v43 = vunpack.c.h.s8.bf16 %v1923_v33 }
 0x410   : > { %3026 = vmatpush1.bf16.msra.mxu0 %v2480_v47  ;;  %2986 = vmatprep.subr.bf16.mxu1 %v2209_v48  ;;  %v2593_v47 = vunpack.c.l.s8.bf16 %v2113_v1  ;;  %v1969_v48 = vld [vmem:[%s5018_s21 + $0x2c8] sm:$0xff]  ;;  %v3428_v1 = vrot.slane %v5255_v18, %v5115_v4 }
 0x411   : > { %3027 = vmatprep.subr.bf16.mxu0 %v2465_v50  ;;  %v2336_v50 = vunpack.c.l.s8.bf16 %v1984_v41  ;;  %v2321_v52 = vunpack.c.h.s8.bf16 %v1969_v48  ;;  %v2305_v60 = vunpack.c.l.s8.bf16 %v1969_v48 }
 0x413   : > { %2987 = vmatpush1.bf16.msra.mxu1 %v2208_v53  ;;  %v1968_v53 = vld [vmem:[%s5018_s21 + $0x2c0] sm:$0xff] }
 0x414   : > { %3028 = vmatpush1.bf16.msra.mxu0 %v2464_v54  ;;  %2988 = vmatprep.subr.bf16.mxu1 %v2193_v55  ;;  %v2577_v54 = vunpack.c.h.s8.bf16 %v2097_v49  ;;  %v2096_v55 = vld [vmem:[%s5018_s21 + $0x6c0] sm:$0xff]  ;;  %v2320_v56 = vunpack.c.h.s8.bf16 %v1968_v53 }
 0x415   : > { %3029 = vmatprep.subr.bf16.mxu0 %v2449_v59  ;;  %v2576_v59 = vunpack.c.h.s8.bf16 %v2096_v55  ;;  %v2560_v9 = vunpack.c.l.s8.bf16 %v2096_v55 }
 0x417   : > { %2989 = vmatpush1.bf16.msra.mxu1 %v2192_v63  ;;  %v2561_v63 = vunpack.c.l.s8.bf16 %v2097_v49  ;;  %v2050_v49 = vld [vmem:[%s5018_s21 + $0x550] sm:$0xff] }
 0x418   : > { %3030 = vmatpush1.bf16.msra.mxu0 %v2448_v5  ;;  %2990 = vmatprep.subr.bf16.mxu1 %v2177_v6  ;;  %v1953_v5 = vld [vmem:[%s5018_s21 + $0x248] sm:$0xff] }
 0x419   : > { %3031 = vmatprep.subr.bf16.mxu0 %v2433_v7  ;;  %v2081_v6 = vld [vmem:[%s5018_s21 + $0x648] sm:$0xff]  ;;  %v2304_v7 = vunpack.c.l.s8.bf16 %v1968_v53  ;;  %v2289_v10 = vunpack.c.h.s8.bf16 %v1953_v5  ;;  %v2273_v17 = vunpack.c.l.s8.bf16 %v1953_v5 }
 0x41a   : > { %v4342_v19 = vpop.eup %4341 }
 0x41b   : > { %3529 = vst [vmem:[%s5282_s17] sm:$0xff] %v4342_v19  ;;  %2991 = vmatpush1.bf16.msra.mxu1 %v2176_v11  ;;  %v1952_v11 = vld [vmem:[%s5018_s21 + $0x240] sm:$0xff]  ;;  %v2529_v19 = vunpack.c.l.s8.bf16 %v2081_v6 }
 0x41c   : > { %v4344_v21 = vpop.eup %4343  ;;  %3032 = vmatpush1.bf16.msra.mxu0 %v2432_v12  ;;  %2992 = vmatprep.subr.bf16.mxu1 %v2161_v13  ;;  %v2545_v12 = vunpack.c.h.s8.bf16 %v2081_v6  ;;  %v2080_v13 = vld [vmem:[%s5018_s21 + $0x640] sm:$0xff]  ;;  %v2288_v14 = vunpack.c.h.s8.bf16 %v1952_v11  ;;  %v1907_v6 = vld [vmem:[%s5018_s21 + $0xd8] sm:$0xff] }
 0x41d   : > { %3530 = vst [vmem:[%s5282_s17 + $0x8] sm:$0xff] %v4344_v21  ;;  %3033 = vmatprep.subr.bf16.mxu0 %v2417_v15  ;;  %v2544_v15 = vunpack.c.h.s8.bf16 %v2080_v13  ;;  %v2067_v21 = vld [vmem:[%s5018_s21 + $0x5d8] sm:$0xff] }
 0x41e   : > { %v2515_v27 = vunpack.c.h.s8.bf16 %v2067_v21 }
 0x41f   : > { %2993 = vmatpush1.bf16.msra.mxu1 %v2160_v20  ;;  %v1939_v20 = vld [vmem:[%s5018_s21 + $0x1d8] sm:$0xff] }
 0x420   : > { %3034 = vmatpush1.bf16.msra.mxu0 %v2416_v22  ;;  %2994 = vmatprep.subr.bf16.mxu1 %v2145_v23  ;;  %v2272_v22 = vunpack.c.l.s8.bf16 %v1952_v11  ;;  %v2528_v23 = vunpack.c.l.s8.bf16 %v2080_v13  ;;  %v2195_v11 = vunpack.c.h.s8.bf16 %v1907_v6 }
 0x421   : > { %3035 = vmatprep.subr.bf16.mxu0 %v2401_v24  ;;  %v2259_v24 = vunpack.c.h.s8.bf16 %v1939_v20 }
 0x423   : > { %2995 = vmatpush1.bf16.msra.mxu1 %v2144_v28  ;;  %v2066_v28 = vld [vmem:[%s5018_s21 + $0x5d0] sm:$0xff] }
 0x424   : > { %3036 = vmatpush1.bf16.msra.mxu0 %v2400_v29  ;;  %2996 = vmatprep.subr.bf16.mxu1 %v2385_v30  ;;  %v2258_v29 = vunpack.c.h.s8.bf16 %v1938_v25  ;;  %v2514_v30 = vunpack.c.h.s8.bf16 %v2066_v28 }
 0x425   : > { %3037 = vmatprep.subr.bf16.mxu0 %v2641_v32  ;;  %v2243_v32 = vunpack.c.l.s8.bf16 %v1939_v20 }
 0x427   : > { %2997 = vmatpush2.bf16.msra.mxu1 %v2384_v34 }
 0x428   : > { %3038 = vmatpush2.bf16.msra.mxu0 %v2640_v35  ;;  %2998 = vmatprep.subr.bf16.mxu1 %v2369_v26  ;;  %v2499_v26 = vunpack.c.l.s8.bf16 %v2067_v21  ;;  %v1891_v21 = vld [vmem:[%s5018_s21 + $0x58] sm:$0xff] }
 0x429   : > { %3039 = vmatprep.subr.bf16.mxu0 %v2625_v37  ;;  %v2051_v37 = vld [vmem:[%s5018_s21 + $0x558] sm:$0xff] }
 0x42a   : > { %v2483_v48 = vunpack.c.h.s8.bf16 %v2051_v37  ;;  %v2467_v5 = vunpack.c.l.s8.bf16 %v2051_v37  ;;  %v2131_v37 = vld [vmem:[%s5018_s21 + $0x7d8] sm:$0xff] }
 0x42b   : > { %2999 = vmatpush2.bf16.msra.mxu1 %v2368_v3  ;;  %v3334_v3 = vrot.slane %v5250_v16, %v5118_v36 }
 0x42c   : > { %3040 = vmatpush2.bf16.msra.mxu0 %v2624_v0  ;;  %3000 = vmatprep.subr.bf16.mxu1 %v2353_v39  ;;  %v2242_v0 = vunpack.c.l.s8.bf16 %v1938_v25  ;;  %v2163_v25 = vunpack.c.h.s8.bf16 %v1891_v21 }
 0x42d   : > { %3041 = vmatprep.subr.bf16.mxu0 %v2609_v42  ;;  %v2498_v42 = vunpack.c.l.s8.bf16 %v2066_v28 }
 0x42f   : > { %3001 = vmatpush2.bf16.msra.mxu1 %v2352_v44  ;;  %v1922_v44 = vld [vmem:[%s5018_s21 + $0x150] sm:$0xff] }
 0x430   : > { %3042 = vmatpush2.bf16.msra.mxu0 %v2608_v45  ;;  %3002 = vmatprep.subr.bf16.mxu1 %v2337_v46 }
 0x431   : > { %3043 = vmatprep.subr.bf16.mxu0 %v2593_v47  ;;  %v3432_v47 = vrot.slane %v5255_v18, %v5118_v36 }
 0x433   : > { %3003 = vmatpush2.bf16.msra.mxu1 %v2336_v50 }
 0x434   : > { %3044 = vmatpush2.bf16.msra.mxu0 %v2592_v51  ;;  %3004 = vmatprep.subr.bf16.mxu1 %v2321_v52 }
 0x435   : > { %3045 = vmatprep.subr.bf16.mxu0 %v2577_v54  ;;  %v2226_v54 = vunpack.c.h.s8.bf16 %v1922_v44 }
 0x437   : > { %3005 = vmatpush2.bf16.msra.mxu1 %v2320_v56 }
 0x438   : > { %3046 = vmatpush2.bf16.msra.mxu0 %v2576_v59  ;;  %3006 = vmatprep.subr.bf16.mxu1 %v2305_v60  ;;  %v2482_v59 = vunpack.c.h.s8.bf16 %v2050_v49  ;;  %v2211_v60 = vunpack.c.l.s8.bf16 %v1923_v33 }
 0x439   : > { %3047 = vmatprep.subr.bf16.mxu0 %v2561_v63 }
 0x43b   : > { %3007 = vmatpush2.bf16.msra.mxu1 %v2304_v7  ;;  %v2035_v7 = vld [vmem:[%s5018_s21 + $0x4d8] sm:$0xff] }
 0x43c   : > { %3048 = vmatpush2.bf16.msra.mxu0 %v2560_v9  ;;  %3008 = vmatprep.subr.bf16.mxu1 %v2289_v10  ;;  %v2210_v9 = vunpack.c.l.s8.bf16 %v1922_v44  ;;  %v2466_v10 = vunpack.c.l.s8.bf16 %v2050_v49  ;;  %v2451_v13 = vunpack.c.h.s8.bf16 %v2035_v7  ;;  %v2435_v20 = vunpack.c.l.s8.bf16 %v2035_v7 }
 0x43d   : > { %3049 = vmatprep.subr.bf16.mxu0 %v2545_v12  ;;  %v1906_v12 = vld [vmem:[%s5018_s21 + $0xd0] sm:$0xff] }
 0x43f   : > { %3009 = vmatpush2.bf16.msra.mxu1 %v2288_v14  ;;  %v2034_v14 = vld [vmem:[%s5018_s21 + $0x4d0] sm:$0xff] }
 0x440   : > { %3050 = vmatpush2.bf16.msra.mxu0 %v2544_v15  ;;  %3010 = vmatprep.subr.bf16.mxu1 %v2273_v17  ;;  %v2194_v15 = vunpack.c.h.s8.bf16 %v1906_v12  ;;  %v2450_v17 = vunpack.c.h.s8.bf16 %v2034_v14 }
 0x441   : > { %3051 = vmatprep.subr.bf16.mxu0 %v2529_v19  ;;  %v2179_v19 = vunpack.c.l.s8.bf16 %v1907_v6 }
 0x443   : > { %3011 = vmatpush2.bf16.msra.mxu1 %v2272_v22  ;;  %v2019_v22 = vld [vmem:[%s5018_s21 + $0x458] sm:$0xff] }
 0x444   : > { %3052 = vmatpush2.bf16.msra.mxu0 %v2528_v23  ;;  %3062 = vmatprep.subr.bf16.mxu1 %v2259_v24  ;;  %v2178_v23 = vunpack.c.l.s8.bf16 %v1906_v12  ;;  %v2434_v24 = vunpack.c.l.s8.bf16 %v2034_v14  ;;  %v2419_v28 = vunpack.c.h.s8.bf16 %v2019_v22 }
 0x445   : > { %3103 = vmatprep.subr.bf16.mxu0 %v2515_v27  ;;  %v1890_v27 = vld [vmem:[%s5018_s21 + $0x50] sm:$0xff] }
 0x446   : > { %v2768_v34 = vpop.f32.mrf.mxu1  ;;  %v2809_v35 = vpop.f32.mrf.mxu0  ;;  %3013 = vmatmul.mubr.bf16.vlgmr.msra.gmra.mxu1 %v5130_v61 }
 0x447   : > { %v2810_v38 = vadd.f32 %v2809_v35, %v2768_v34  ;;  %3054 = vmatmul.mubr.bf16.vlgmr.msra.gmra.mxu0 %v5132_v62  ;;  %3063 = vmatpush1.bf16.msra.mxu1 %v2258_v29  ;;  %v2018_v29 = vld [vmem:[%s5018_s21 + $0x450] sm:$0xff]  ;;  %v2147_v34 = vunpack.c.l.s8.bf16 %v1891_v21  ;;  %v2403_v35 = vunpack.c.l.s8.bf16 %v2019_v22 }
 0x448   : > { %3094 = vmatprep.mubr.bf16.mxu1 %v5126_v57  ;;  %3104 = vmatpush1.bf16.msra.mxu0 %v2514_v30  ;;  %v2770_v39 = vpop.f32.mrf.mxu1  ;;  %v2811_v41 = vpop.f32.mrf.mxu0  ;;  %v2418_v33 = vunpack.c.h.s8.bf16 %v2018_v29 }
 0x449   : > { %v3401_v45 = vmul.f32 %v3330_v31, %v2810_v38  ;;  %3135 = vmatprep.mubr.bf16.mxu0 %v5128_v58  ;;  %v2812_v46 = vadd.f32 %v2811_v41, %v2770_v39  ;;  %3064 = vmatprep.subr.bf16.mxu1 %v2243_v32  ;;  %v2162_v31 = vunpack.c.h.s8.bf16 %v1890_v27  ;;  %v2146_v38 = vunpack.c.l.s8.bf16 %v1890_v27  ;;  %v2130_v41 = vld [vmem:[%s5018_s21 + $0x7d0] sm:$0xff] }
 0x44a   : > { %v2772_v50 = vpop.f32.mrf.mxu1  ;;  %v2813_v51 = vpop.f32.mrf.mxu0  ;;  %3105 = vmatprep.subr.bf16.mxu0 %v2499_v26  ;;  %v2003_v26 = vld [vmem:[%s5018_s21 + $0x3d8] sm:$0xff]  ;;  %v2643_v39 = vunpack.c.h.s8.bf16 %v2131_v37  ;;  %v2626_v49 = vunpack.c.l.s8.bf16 %v2130_v41 }
 0x44b   : > { %v3499_v52 = vadd.f32 %v3428_v1, %v3401_v45  ;;  %v3402_v53 = vmul.f32 %v3334_v3, %v2812_v46  ;;  %3065 = vmatpush1.bf16.msra.mxu1 %v2242_v0  ;;  %v2402_v1 = vunpack.c.l.s8.bf16 %v2018_v29  ;;  %v2387_v3 = vunpack.c.h.s8.bf16 %v2003_v26  ;;  %v2002_v0 = vld [vmem:[%s5018_s21 + $0x3d0] sm:$0xff]  ;;  %v1987_v46 = vld [vmem:[%s5018_s21 + $0x358] sm:$0xff] }
 0x44c   : > { %3106 = vmatpush1.bf16.msra.mxu0 %v2498_v42  ;;  %v2773_v55 = vpop.f32.mrf.mxu1  ;;  %v2814_v56 = vpop.f32.mrf.mxu0  ;;  %3066 = vmatprep.subr.bf16.mxu1 %v2227_v43  ;;  %v2386_v42 = vunpack.c.h.s8.bf16 %v2002_v0  ;;  %v2642_v43 = vunpack.c.h.s8.bf16 %v2130_v41  ;;  %v2371_v44 = vunpack.c.l.s8.bf16 %v2003_v26  ;;  %v2627_v45 = vunpack.c.l.s8.bf16 %v2131_v37  ;;  %v1986_v51 = vld [vmem:[%s5018_s21 + $0x350] sm:$0xff]  ;;  %v1940_v26 = vld [vmem:[%s5018_s21 + $0x1e0] sm:$0xff] }
 0x44d   : > { %4345 = vtanh.f32 %v3499_v52  ;;  %v3500_v63 = vadd.f32 %v3432_v47, %v3402_v53  ;;  %3107 = vmatprep.subr.bf16.mxu0 %v2483_v48  ;;  %v2115_v47 = vld [vmem:[%s5018_s21 + $0x758] sm:$0xff]  ;;  %v2370_v48 = vunpack.c.l.s8.bf16 %v2002_v0  ;;  %v2355_v50 = vunpack.c.h.s8.bf16 %v1987_v46  ;;  %v2114_v53 = vld [vmem:[%s5018_s21 + $0x750] sm:$0xff] }
 0x44e   : > { %v2611_v52 = vunpack.c.h.s8.bf16 %v2115_v47  ;;  %v2610_v55 = vunpack.c.h.s8.bf16 %v2114_v53  ;;  %v2339_v56 = vunpack.c.l.s8.bf16 %v1987_v46  ;;  %v2594_v6 = vunpack.c.l.s8.bf16 %v2114_v53  ;;  %v2053_v46 = vld [vmem:[%s5018_s21 + $0x568] sm:$0xff] }
 0x44f   : > { %4347 = vtanh.f32 %v3500_v63  ;;  %3067 = vmatpush1.bf16.msra.mxu1 %v2226_v54  ;;  %v2354_v54 = vunpack.c.h.s8.bf16 %v1986_v51  ;;  %v2099_v63 = vld [vmem:[%s5018_s21 + $0x6d8] sm:$0xff] }
 0x450   : > { %3108 = vmatpush1.bf16.msra.mxu0 %v2482_v59  ;;  %3068 = vmatprep.subr.bf16.mxu1 %v2211_v60  ;;  %v2595_v59 = vunpack.c.l.s8.bf16 %v2115_v47  ;;  %v1971_v60 = vld [vmem:[%s5018_s21 + $0x2d8] sm:$0xff] }
 0x451   : > { %3109 = vmatprep.subr.bf16.mxu0 %v2467_v5  ;;  %v2338_v5 = vunpack.c.l.s8.bf16 %v1986_v51  ;;  %v2323_v7 = vunpack.c.h.s8.bf16 %v1971_v60  ;;  %v2307_v14 = vunpack.c.l.s8.bf16 %v1971_v60  ;;  %v2052_v60 = vld [vmem:[%s5018_s21 + $0x560] sm:$0xff] }
 0x453   : > { %3069 = vmatpush1.bf16.msra.mxu1 %v2210_v9  ;;  %v1970_v9 = vld [vmem:[%s5018_s21 + $0x2d0] sm:$0xff] }
 0x454   : > { %3110 = vmatpush1.bf16.msra.mxu0 %v2466_v10  ;;  %3070 = vmatprep.subr.bf16.mxu1 %v2195_v11  ;;  %v2579_v10 = vunpack.c.h.s8.bf16 %v2099_v63  ;;  %v2098_v11 = vld [vmem:[%s5018_s21 + $0x6d0] sm:$0xff]  ;;  %v2322_v12 = vunpack.c.h.s8.bf16 %v1970_v9 }
 0x455   : > { %3111 = vmatprep.subr.bf16.mxu0 %v2451_v13  ;;  %v2578_v13 = vunpack.c.h.s8.bf16 %v2098_v11  ;;  %v2562_v21 = vunpack.c.l.s8.bf16 %v2098_v11 }
 0x457   : > { %3071 = vmatpush1.bf16.msra.mxu1 %v2194_v15  ;;  %v2563_v15 = vunpack.c.l.s8.bf16 %v2099_v63 }
 0x458   : > { %3112 = vmatpush1.bf16.msra.mxu0 %v2450_v17  ;;  %3072 = vmatprep.subr.bf16.mxu1 %v2179_v19  ;;  %v1955_v17 = vld [vmem:[%s5018_s21 + $0x258] sm:$0xff] }
 0x459   : > { %3113 = vmatprep.subr.bf16.mxu0 %v2435_v20  ;;  %v2083_v19 = vld [vmem:[%s5018_s21 + $0x658] sm:$0xff]  ;;  %v2306_v20 = vunpack.c.l.s8.bf16 %v1970_v9  ;;  %v2291_v22 = vunpack.c.h.s8.bf16 %v1955_v17  ;;  %v2275_v29 = vunpack.c.l.s8.bf16 %v1955_v17  ;;  %v2469_v17 = vunpack.c.l.s8.bf16 %v2053_v46 }
 0x45a   : > { %v4346_v30 = vpop.eup %4345 }
 0x45b   : > { %3531 = vst [vmem:[%s5282_s17 + $0x10] sm:$0xff] %v4346_v30  ;;  %3073 = vmatpush1.bf16.msra.mxu1 %v2178_v23  ;;  %v1954_v23 = vld [vmem:[%s5018_s21 + $0x250] sm:$0xff]  ;;  %v2531_v30 = vunpack.c.l.s8.bf16 %v2083_v19 }
 0x45c   : > { %v4348_v32 = vpop.eup %4347  ;;  %3114 = vmatpush1.bf16.msra.mxu0 %v2434_v24  ;;  %3074 = vmatprep.subr.bf16.mxu1 %v2163_v25  ;;  %v2547_v24 = vunpack.c.h.s8.bf16 %v2083_v19  ;;  %v2082_v25 = vld [vmem:[%s5018_s21 + $0x650] sm:$0xff]  ;;  %v2290_v27 = vunpack.c.h.s8.bf16 %v1954_v23 }
 0x45d   : > { %3532 = vst [vmem:[%s5282_s17 + $0x18] sm:$0xff] %v4348_v32  ;;  %3115 = vmatprep.subr.bf16.mxu0 %v2419_v28  ;;  %v2546_v28 = vunpack.c.h.s8.bf16 %v2082_v25  ;;  %v2069_v32 = vld [vmem:[%s5018_s21 + $0x5e8] sm:$0xff] }
 0x45e   : > { %v2517_v37 = vunpack.c.h.s8.bf16 %v2069_v32 }
 0x45f   : > { %3075 = vmatpush1.bf16.msra.mxu1 %v2162_v31  ;;  %v1941_v31 = vld [vmem:[%s5018_s21 + $0x1e8] sm:$0xff] }
 0x460   : > { %3116 = vmatpush1.bf16.msra.mxu0 %v2418_v33  ;;  %3076 = vmatprep.subr.bf16.mxu1 %v2147_v34  ;;  %v2274_v33 = vunpack.c.l.s8.bf16 %v1954_v23  ;;  %v2530_v34 = vunpack.c.l.s8.bf16 %v2082_v25  ;;  %v2245_v41 = vunpack.c.l.s8.bf16 %v1941_v31 }
 0x461   : > { %3117 = vmatprep.subr.bf16.mxu0 %v2403_v35  ;;  %v2261_v35 = vunpack.c.h.s8.bf16 %v1941_v31 }
 0x463   : > { %3077 = vmatpush1.bf16.msra.mxu1 %v2146_v38  ;;  %v2068_v38 = vld [vmem:[%s5018_s21 + $0x5e0] sm:$0xff] }
 0x464   : > { %3118 = vmatpush1.bf16.msra.mxu0 %v2402_v1  ;;  %3078 = vmatprep.subr.bf16.mxu1 %v2387_v3  ;;  %v5353_v1 = vsub.s32 4, %v5072_v2  ;;  %v2260_v3 = vunpack.c.h.s8.bf16 %v1940_v26  ;;  %v2516_v0 = vunpack.c.h.s8.bf16 %v2068_v38  ;;  %v2500_v53 = vunpack.c.l.s8.bf16 %v2068_v38 }
 0x465   : > { %3119 = vmatprep.subr.bf16.mxu0 %v2643_v39  ;;  %v5356_v39 = vsub.s32 5, %v5072_v2 }
 0x467   : > { %3079 = vmatpush2.bf16.msra.mxu1 %v2386_v42  ;;  %v1925_v42 = vld [vmem:[%s5018_s21 + $0x168] sm:$0xff] }
 0x468   : > { %3120 = vmatpush2.bf16.msra.mxu0 %v2642_v43  ;;  %3080 = vmatprep.subr.bf16.mxu1 %v2371_v44  ;;  %v3338_v44 = vrot.slane %v5250_v16, %v5353_v1 }
 0x469   : > { %3121 = vmatprep.subr.bf16.mxu0 %v2627_v45  ;;  %v2501_v45 = vunpack.c.l.s8.bf16 %v2069_v32  ;;  %v1893_v32 = vld [vmem:[%s5018_s21 + $0x68] sm:$0xff] }
 0x46b   : > { %3081 = vmatpush2.bf16.msra.mxu1 %v2370_v48  ;;  %v3436_v48 = vrot.slane %v5255_v18, %v5353_v1 }
 0x46c   : > { %3122 = vmatpush2.bf16.msra.mxu0 %v2626_v49  ;;  %3082 = vmatprep.subr.bf16.mxu1 %v2355_v50  ;;  %v2244_v49 = vunpack.c.l.s8.bf16 %v1940_v26  ;;  %v2165_v26 = vunpack.c.h.s8.bf16 %v1893_v32 }
 0x46d   : > { %3123 = vmatprep.subr.bf16.mxu0 %v2611_v52  ;;  %v3342_v52 = vrot.slane %v5250_v16, %v5356_v39 }
 0x46f   : > { %3083 = vmatpush2.bf16.msra.mxu1 %v2354_v54  ;;  %v2229_v54 = vunpack.c.h.s8.bf16 %v1925_v42 }
 0x470   : > { %3124 = vmatpush2.bf16.msra.mxu0 %v2610_v55  ;;  %3084 = vmatprep.subr.bf16.mxu1 %v2339_v56  ;;  %v1924_v55 = vld [vmem:[%s5018_s21 + $0x160] sm:$0xff] }
 0x471   : > { %3125 = vmatprep.subr.bf16.mxu0 %v2595_v59  ;;  %v2485_v59 = vunpack.c.h.s8.bf16 %v2053_v46  ;;  %v2228_v16 = vunpack.c.h.s8.bf16 %v1924_v55  ;;  %v2005_v46 = vld [vmem:[%s5018_s21 + $0x3e8] sm:$0xff] }
 0x473   : > { %3085 = vmatpush2.bf16.msra.mxu1 %v2338_v5 }
 0x474   : > { %3126 = vmatpush2.bf16.msra.mxu0 %v2594_v6  ;;  %3086 = vmatprep.subr.bf16.mxu1 %v2323_v7  ;;  %v3440_v6 = vrot.slane %v5255_v18, %v5356_v39  ;;  %v1909_v18 = vld [vmem:[%s5018_s21 + $0xe8] sm:$0xff] }
 0x475   : > { %3127 = vmatprep.subr.bf16.mxu0 %v2579_v10  ;;  %v2197_v23 = vunpack.c.h.s8.bf16 %v1909_v18 }
 0x477   : > { %3087 = vmatpush2.bf16.msra.mxu1 %v2322_v12 }
 0x478   : > { %3128 = vmatpush2.bf16.msra.mxu0 %v2578_v13  ;;  %3088 = vmatprep.subr.bf16.mxu1 %v2307_v14  ;;  %v2484_v13 = vunpack.c.h.s8.bf16 %v2052_v60  ;;  %v2213_v14 = vunpack.c.l.s8.bf16 %v1925_v42 }
 0x479   : > { %3129 = vmatprep.subr.bf16.mxu0 %v2563_v15 }
 0x47b   : > { %3089 = vmatpush2.bf16.msra.mxu1 %v2306_v20  ;;  %v2037_v20 = vld [vmem:[%s5018_s21 + $0x4e8] sm:$0xff] }
 0x47c   : > { %3130 = vmatpush2.bf16.msra.mxu0 %v2562_v21  ;;  %3090 = vmatprep.subr.bf16.mxu1 %v2291_v22  ;;  %v2212_v21 = vunpack.c.l.s8.bf16 %v1924_v55  ;;  %v2468_v22 = vunpack.c.l.s8.bf16 %v2052_v60  ;;  %v2453_v25 = vunpack.c.h.s8.bf16 %v2037_v20  ;;  %v2437_v31 = vunpack.c.l.s8.bf16 %v2037_v20  ;;  %v1989_v60 = vld [vmem:[%s5018_s21 + $0x368] sm:$0xff] }
 0x47d   : > { %3131 = vmatprep.subr.bf16.mxu0 %v2547_v24  ;;  %v1908_v24 = vld [vmem:[%s5018_s21 + $0xe0] sm:$0xff] }
 0x47f   : > { %3091 = vmatpush2.bf16.msra.mxu1 %v2290_v27  ;;  %v2036_v27 = vld [vmem:[%s5018_s21 + $0x4e0] sm:$0xff] }
 0x480   : > { %3132 = vmatpush2.bf16.msra.mxu0 %v2546_v28  ;;  %3092 = vmatprep.subr.bf16.mxu1 %v2275_v29  ;;  %v2196_v28 = vunpack.c.h.s8.bf16 %v1908_v24  ;;  %v2452_v29 = vunpack.c.h.s8.bf16 %v2036_v27 }
 0x481   : > { %3133 = vmatprep.subr.bf16.mxu0 %v2531_v30  ;;  %v2181_v30 = vunpack.c.l.s8.bf16 %v1909_v18 }
 0x483   : > { %3093 = vmatpush2.bf16.msra.mxu1 %v2274_v33  ;;  %v2021_v33 = vld [vmem:[%s5018_s21 + $0x468] sm:$0xff] }
 0x484   : > { %3134 = vmatpush2.bf16.msra.mxu0 %v2530_v34  ;;  %3144 = vmatprep.subr.bf16.mxu1 %v2261_v35  ;;  %v2180_v34 = vunpack.c.l.s8.bf16 %v1908_v24  ;;  %v2436_v35 = vunpack.c.l.s8.bf16 %v2036_v27  ;;  %v2421_v38 = vunpack.c.h.s8.bf16 %v2021_v33 }
 0x485   : > { %3185 = vmatprep.subr.bf16.mxu0 %v2517_v37  ;;  %v1892_v37 = vld [vmem:[%s5018_s21 + $0x60] sm:$0xff] }
 0x486   : > { %v2850_v43 = vpop.f32.mrf.mxu1  ;;  %3095 = vmatmul.mubr.bf16.vlgmr.msra.gmra.mxu1 %v5130_v61 }
 0x487   : > { %v2891_v47 = vpop.f32.mrf.mxu0  ;;  %3136 = vmatmul.mubr.bf16.vlgmr.msra.gmra.mxu0 %v5132_v62  ;;  %3145 = vmatpush1.bf16.msra.mxu1 %v2260_v3  ;;  %v2020_v3 = vld [vmem:[%s5018_s21 + $0x460] sm:$0xff] }
 0x488   : > { %v2892_v50 = vadd.f32 %v2891_v47, %v2850_v43  ;;  %3176 = vmatprep.mubr.bf16.mxu1 %v5126_v57  ;;  %3186 = vmatpush1.bf16.msra.mxu0 %v2516_v0  ;;  %v2852_v51 = vpop.f32.mrf.mxu1  ;;  %v2420_v42 = vunpack.c.h.s8.bf16 %v2020_v3  ;;  %v2149_v43 = vunpack.c.l.s8.bf16 %v1893_v32  ;;  %v2133_v47 = vld [vmem:[%s5018_s21 + $0x7e8] sm:$0xff] }
 0x489   : > { %3217 = vmatprep.mubr.bf16.mxu0 %v5128_v58  ;;  %v2893_v56 = vpop.f32.mrf.mxu0  ;;  %3146 = vmatprep.subr.bf16.mxu1 %v2245_v41  ;;  %v2164_v41 = vunpack.c.h.s8.bf16 %v1892_v37 }
 0x48a   : > { %v3403_v63 = vmul.f32 %v3338_v44, %v2892_v50  ;;  %v2894_v5 = vadd.f32 %v2893_v56, %v2852_v51  ;;  %v2854_v7 = vpop.f32.mrf.mxu1  ;;  %3187 = vmatprep.subr.bf16.mxu0 %v2501_v45  ;;  %v2405_v45 = vunpack.c.l.s8.bf16 %v2021_v33  ;;  %v2389_v50 = vunpack.c.h.s8.bf16 %v2005_v46  ;;  %v2004_v51 = vld [vmem:[%s5018_s21 + $0x3e0] sm:$0xff] }
 0x48b   : > { %v2895_v9 = vpop.f32.mrf.mxu0  ;;  %3147 = vmatpush1.bf16.msra.mxu1 %v2244_v49  ;;  %v2404_v49 = vunpack.c.l.s8.bf16 %v2020_v3  ;;  %v2373_v56 = vunpack.c.l.s8.bf16 %v2005_v46  ;;  %v2357_v7 = vunpack.c.h.s8.bf16 %v1989_v60  ;;  %v1942_v46 = vld [vmem:[%s5018_s21 + $0x1f0] sm:$0xff] }
 0x48c   : > { %v3501_v10 = vadd.f32 %v3436_v48, %v3403_v63  ;;  %v3404_v11 = vmul.f32 %v3342_v52, %v2894_v5  ;;  %3188 = vmatpush1.bf16.msra.mxu0 %v2500_v53  ;;  %v2855_v12 = vpop.f32.mrf.mxu1  ;;  %3148 = vmatprep.subr.bf16.mxu1 %v2229_v54  ;;  %v2148_v48 = vunpack.c.l.s8.bf16 %v1892_v37  ;;  %v2645_v52 = vunpack.c.h.s8.bf16 %v2133_v47  ;;  %v2132_v53 = vld [vmem:[%s5018_s21 + $0x7e0] sm:$0xff]  ;;  %v2117_v63 = vld [vmem:[%s5018_s21 + $0x768] sm:$0xff] }
 0x48d   : > { %v2896_v15 = vpop.f32.mrf.mxu0  ;;  %3189 = vmatprep.subr.bf16.mxu0 %v2485_v59  ;;  %v2388_v54 = vunpack.c.h.s8.bf16 %v2004_v51  ;;  %v2644_v55 = vunpack.c.h.s8.bf16 %v2132_v53  ;;  %v2629_v59 = vunpack.c.l.s8.bf16 %v2133_v47  ;;  %v2372_v5 = vunpack.c.l.s8.bf16 %v2004_v51  ;;  %v1988_v9 = vld [vmem:[%s5018_s21 + $0x360] sm:$0xff] }
 0x48e   : > { %4349 = vtanh.f32 %v3501_v10  ;;  %v3502_v19 = vadd.f32 %v3440_v6, %v3404_v11  ;;  %v2628_v6 = vunpack.c.l.s8.bf16 %v2132_v53  ;;  %v2116_v10 = vld [vmem:[%s5018_s21 + $0x760] sm:$0xff]  ;;  %v2356_v11 = vunpack.c.h.s8.bf16 %v1988_v9  ;;  %v1973_v15 = vld [vmem:[%s5018_s21 + $0x2e8] sm:$0xff] }
 0x48f   : > { %3149 = vmatpush1.bf16.msra.mxu1 %v2228_v16  ;;  %v2613_v16 = vunpack.c.h.s8.bf16 %v2117_v63  ;;  %v2612_v12 = vunpack.c.h.s8.bf16 %v2116_v10  ;;  %v2340_v18 = vunpack.c.l.s8.bf16 %v1988_v9  ;;  %v2325_v20 = vunpack.c.h.s8.bf16 %v1973_v15 }
 0x490   : > { %4351 = vtanh.f32 %v3502_v19  ;;  %3190 = vmatpush1.bf16.msra.mxu0 %v2484_v13  ;;  %3150 = vmatprep.subr.bf16.mxu1 %v2213_v14  ;;  %v2341_v13 = vunpack.c.l.s8.bf16 %v1989_v60  ;;  %v2597_v14 = vunpack.c.l.s8.bf16 %v2117_v63  ;;  %v2596_v19 = vunpack.c.l.s8.bf16 %v2116_v10  ;;  %v2055_v63 = vld [vmem:[%s5018_s21 + $0x578] sm:$0xff] }
 0x491   : > { %3191 = vmatprep.subr.bf16.mxu0 %v2469_v17  ;;  %v2101_v17 = vld [vmem:[%s5018_s21 + $0x6e8] sm:$0xff]  ;;  %v2309_v27 = vunpack.c.l.s8.bf16 %v1973_v15  ;;  %v2487_v15 = vunpack.c.h.s8.bf16 %v2055_v63 }
 0x493   : > { %3151 = vmatpush1.bf16.msra.mxu1 %v2212_v21  ;;  %v1972_v21 = vld [vmem:[%s5018_s21 + $0x2e0] sm:$0xff] }
 0x494   : > { %3192 = vmatpush1.bf16.msra.mxu0 %v2468_v22  ;;  %3152 = vmatprep.subr.bf16.mxu1 %v2197_v23  ;;  %v2581_v22 = vunpack.c.h.s8.bf16 %v2101_v17  ;;  %v2100_v23 = vld [vmem:[%s5018_s21 + $0x6e0] sm:$0xff]  ;;  %v2324_v24 = vunpack.c.h.s8.bf16 %v1972_v21 }
 0x495   : > { %3193 = vmatprep.subr.bf16.mxu0 %v2453_v25  ;;  %v2580_v25 = vunpack.c.h.s8.bf16 %v2100_v23  ;;  %v2564_v32 = vunpack.c.l.s8.bf16 %v2100_v23 }
 0x497   : > { %3153 = vmatpush1.bf16.msra.mxu1 %v2196_v28  ;;  %v2565_v28 = vunpack.c.l.s8.bf16 %v2101_v17  ;;  %v2054_v17 = vld [vmem:[%s5018_s21 + $0x570] sm:$0xff] }
 0x498   : > { %3194 = vmatpush1.bf16.msra.mxu0 %v2452_v29  ;;  %3154 = vmatprep.subr.bf16.mxu1 %v2181_v30  ;;  %v1957_v29 = vld [vmem:[%s5018_s21 + $0x268] sm:$0xff] }
 0x499   : > { %3195 = vmatprep.subr.bf16.mxu0 %v2437_v31  ;;  %v2085_v30 = vld [vmem:[%s5018_s21 + $0x668] sm:$0xff]  ;;  %v2308_v31 = vunpack.c.l.s8.bf16 %v1972_v21  ;;  %v2293_v33 = vunpack.c.h.s8.bf16 %v1957_v29  ;;  %v2277_v3 = vunpack.c.l.s8.bf16 %v1957_v29  ;;  %v2471_v29 = vunpack.c.l.s8.bf16 %v2055_v63  ;;  %v2007_v63 = vld [vmem:[%s5018_s21 + $0x3f8] sm:$0xff] }
 0x49b   : > { %v4350_v0 = vpop.eup %4349  ;;  %3155 = vmatpush1.bf16.msra.mxu1 %v2180_v34  ;;  %v1956_v34 = vld [vmem:[%s5018_s21 + $0x260] sm:$0xff] }
 0x49c   : > { %3533 = vst [vmem:[%s5282_s17 + $0x20] sm:$0xff] %v4350_v0  ;;  %3196 = vmatpush1.bf16.msra.mxu0 %v2436_v35  ;;  %3156 = vmatprep.subr.bf16.mxu1 %v2165_v26  ;;  %v2549_v35 = vunpack.c.h.s8.bf16 %v2085_v30  ;;  %v2084_v26 = vld [vmem:[%s5018_s21 + $0x660] sm:$0xff]  ;;  %v2292_v37 = vunpack.c.h.s8.bf16 %v1956_v34  ;;  %v2533_v0 = vunpack.c.l.s8.bf16 %v2085_v30  ;;  %v1911_v30 = vld [vmem:[%s5018_s21 + $0xf8] sm:$0xff] }
 0x49d   : > { %v4352_v44 = vpop.eup %4351  ;;  %3197 = vmatprep.subr.bf16.mxu0 %v2421_v38  ;;  %v2548_v38 = vunpack.c.h.s8.bf16 %v2084_v26 }
 0x49e   : > { %3534 = vst [vmem:[%s5282_s17 + $0x28] sm:$0xff] %v4352_v44  ;;  %v2532_v44 = vunpack.c.l.s8.bf16 %v2084_v26  ;;  %v1910_v26 = vld [vmem:[%s5018_s21 + $0xf0] sm:$0xff] }
 0x49f   : > { %3157 = vmatpush1.bf16.msra.mxu1 %v2164_v41  ;;  %v1943_v41 = vld [vmem:[%s5018_s21 + $0x1f8] sm:$0xff] }
 0x4a0   : > { %3198 = vmatpush1.bf16.msra.mxu0 %v2420_v42  ;;  %3158 = vmatprep.subr.bf16.mxu1 %v2149_v43  ;;  %v2071_v42 = vld [vmem:[%s5018_s21 + $0x5f8] sm:$0xff]  ;;  %v2276_v43 = vunpack.c.l.s8.bf16 %v1956_v34  ;;  %v2247_v53 = vunpack.c.l.s8.bf16 %v1943_v41  ;;  %v2470_v34 = vunpack.c.l.s8.bf16 %v2054_v17 }
 0x4a1   : > { %3199 = vmatprep.subr.bf16.mxu0 %v2405_v45  ;;  %v2263_v45 = vunpack.c.h.s8.bf16 %v1943_v41  ;;  %v2519_v47 = vunpack.c.h.s8.bf16 %v2071_v42  ;;  %v2503_v60 = vunpack.c.l.s8.bf16 %v2071_v42  ;;  %v2183_v41 = vunpack.c.l.s8.bf16 %v1911_v30 }
 0x4a3   : > { %3159 = vmatpush1.bf16.msra.mxu1 %v2148_v48  ;;  %v2070_v48 = vld [vmem:[%s5018_s21 + $0x5f0] sm:$0xff] }
 0x4a4   : > { %3200 = vmatpush1.bf16.msra.mxu0 %v2404_v49  ;;  %3160 = vmatprep.subr.bf16.mxu1 %v2389_v50  ;;  %v5405_v49 = vsub.s32 6, %v5072_v2  ;;  %v2262_v50 = vunpack.c.h.s8.bf16 %v1942_v46  ;;  %v2518_v51 = vunpack.c.h.s8.bf16 %v2070_v48 }
 0x4a5   : > { %3201 = vmatprep.subr.bf16.mxu0 %v2645_v52  ;;  %v5408_v52 = vsub.s32 7, %v5072_v2  ;;  %v2246_v2 = vunpack.c.l.s8.bf16 %v1942_v46 }
 0x4a7   : > { %3161 = vmatpush2.bf16.msra.mxu1 %v2388_v54  ;;  %v1927_v54 = vld [vmem:[%s5018_s21 + $0x178] sm:$0xff] }
 0x4a8   : > { %3202 = vmatpush2.bf16.msra.mxu0 %v2644_v55  ;;  %3162 = vmatprep.subr.bf16.mxu1 %v2373_v56  ;;  %v4373_v56 = vld [vmem:[%s5247_s28] sm:$0xff] }
 0x4a9   : > { %3203 = vmatprep.subr.bf16.mxu0 %v2629_v59  ;;  %v3346_v59 = vrot.slane %v4373_v56, %v5405_v49  ;;  %v3350_v10 = vrot.slane %v4373_v56, %v5408_v52 }
 0x4ab   : > { %3163 = vmatpush2.bf16.msra.mxu1 %v2372_v5 }
 0x4ac   : > { %3204 = vmatpush2.bf16.msra.mxu0 %v2628_v6  ;;  %3164 = vmatprep.subr.bf16.mxu1 %v2357_v7  ;;  %v4374_v6 = vld [vmem:[%s5252_s11] sm:$0xff] }
 0x4ad   : > { %3205 = vmatprep.subr.bf16.mxu0 %v2613_v16  ;;  %v3444_v7 = vrot.slane %v4374_v6, %v5405_v49 }
 0x4af   : > { %3165 = vmatpush2.bf16.msra.mxu1 %v2356_v11  ;;  %v2502_v11 = vunpack.c.l.s8.bf16 %v2070_v48  ;;  %v1894_v48 = vld [vmem:[%s5018_s21 + $0x70] sm:$0xff] }
 0x4b0   : > { %3206 = vmatpush2.bf16.msra.mxu0 %v2612_v12  ;;  %3166 = vmatprep.subr.bf16.mxu1 %v2341_v13  ;;  %v2231_v12 = vunpack.c.h.s8.bf16 %v1927_v54  ;;  %v1926_v13 = vld [vmem:[%s5018_s21 + $0x170] sm:$0xff] }
 0x4b1   : > { %3207 = vmatprep.subr.bf16.mxu0 %v2597_v14 }
 0x4b3   : > { %3167 = vmatpush2.bf16.msra.mxu1 %v2340_v18 }
 0x4b4   : > { %3208 = vmatpush2.bf16.msra.mxu0 %v2596_v19  ;;  %3168 = vmatprep.subr.bf16.mxu1 %v2325_v20  ;;  %v3448_v20 = vrot.slane %v4374_v6, %v5408_v52  ;;  %v2150_v6 = vunpack.c.l.s8.bf16 %v1894_v48 }
 0x4b5   : > { %3209 = vmatprep.subr.bf16.mxu0 %v2581_v22  ;;  %v2230_v22 = vunpack.c.h.s8.bf16 %v1926_v13 }
 0x4b7   : > { %3169 = vmatpush2.bf16.msra.mxu1 %v2324_v24 }
 0x4b8   : > { %3210 = vmatpush2.bf16.msra.mxu0 %v2580_v25  ;;  %3170 = vmatprep.subr.bf16.mxu1 %v2309_v27  ;;  %v2215_v27 = vunpack.c.l.s8.bf16 %v1927_v54  ;;  %v2166_v54 = vunpack.c.h.s8.bf16 %v1894_v48 }
 0x4b9   : > { %3211 = vmatprep.subr.bf16.mxu0 %v2565_v28 }
 0x4bb   : > { %3171 = vmatpush2.bf16.msra.mxu1 %v2308_v31 }
 0x4bc   : > { %3212 = vmatpush2.bf16.msra.mxu0 %v2564_v32  ;;  %3172 = vmatprep.subr.bf16.mxu1 %v2293_v33  ;;  %v2039_v32 = vld [vmem:[%s5018_s21 + $0x4f8] sm:$0xff]  ;;  %v2214_v33 = vunpack.c.l.s8.bf16 %v1926_v13  ;;  %v2375_v13 = vunpack.c.l.s8.bf16 %v2007_v63 }
 0x4bd   : > { %3213 = vmatprep.subr.bf16.mxu0 %v2549_v35  ;;  %v2199_v35 = vunpack.c.h.s8.bf16 %v1911_v30  ;;  %v2439_v42 = vunpack.c.l.s8.bf16 %v2039_v32 }
 0x4bf   : > { %3173 = vmatpush2.bf16.msra.mxu1 %v2292_v37  ;;  %v2455_v37 = vunpack.c.h.s8.bf16 %v2039_v32  ;;  %v1974_v32 = vld [vmem:[%s5018_s21 + $0x2f0] sm:$0xff] }
 0x4c0   : > { %3214 = vmatpush2.bf16.msra.mxu0 %v2548_v38  ;;  %3174 = vmatprep.subr.bf16.mxu1 %v2277_v3  ;;  %v2038_v38 = vld [vmem:[%s5018_s21 + $0x4f0] sm:$0xff]  ;;  %v2198_v3 = vunpack.c.h.s8.bf16 %v1910_v26 }
 0x4c1   : > { %3215 = vmatprep.subr.bf16.mxu0 %v2533_v0  ;;  %v2454_v0 = vunpack.c.h.s8.bf16 %v2038_v38  ;;  %v2438_v46 = vunpack.c.l.s8.bf16 %v2038_v38 }
 0x4c3   : > { %3175 = vmatpush2.bf16.msra.mxu1 %v2276_v43  ;;  %v1895_v43 = vld [vmem:[%s5018_s21 + $0x78] sm:$0xff] }
 0x4c4   : > { %3216 = vmatpush2.bf16.msra.mxu0 %v2532_v44  ;;  %3226 = vmatprep.subr.bf16.mxu1 %v2263_v45  ;;  %v2023_v44 = vld [vmem:[%s5018_s21 + $0x478] sm:$0xff]  ;;  %v2182_v45 = vunpack.c.l.s8.bf16 %v1910_v26  ;;  %v2151_v56 = vunpack.c.l.s8.bf16 %v1895_v43 }
 0x4c5   : > { %3267 = vmatprep.subr.bf16.mxu0 %v2519_v47  ;;  %v2167_v47 = vunpack.c.h.s8.bf16 %v1895_v43 }
 0x4c6   : > { %v2932_v55 = vpop.f32.mrf.mxu1  ;;  %3177 = vmatmul.mubr.bf16.vlgmr.msra.gmra.mxu1 %v5130_v61 }
 0x4c7   : > { %v2973_v5 = vpop.f32.mrf.mxu0  ;;  %3218 = vmatmul.mubr.bf16.vlgmr.msra.gmra.mxu0 %v5132_v62  ;;  %3227 = vmatpush1.bf16.msra.mxu1 %v2262_v50  ;;  %v2423_v50 = vunpack.c.h.s8.bf16 %v2023_v44 }
 0x4c8   : > { %v2974_v9 = vadd.f32 %v2973_v5, %v2932_v55  ;;  %3258 = vmatprep.mubr.bf16.mxu1 %v5126_v57  ;;  %3268 = vmatpush1.bf16.msra.mxu0 %v2518_v51  ;;  %v2934_v16 = vpop.f32.mrf.mxu1  ;;  %v2022_v51 = vld [vmem:[%s5018_s21 + $0x470] sm:$0xff]  ;;  %v2135_v5 = vld [vmem:[%s5018_s21 + $0x7f8] sm:$0xff] }
 0x4c9   : > { %3299 = vmatprep.mubr.bf16.mxu0 %v5128_v58  ;;  %v2975_v14 = vpop.f32.mrf.mxu0  ;;  %3228 = vmatprep.subr.bf16.mxu1 %v2247_v53  ;;  %v2486_v58 = vunpack.c.h.s8.bf16 %v2054_v17  ;;  %v2422_v55 = vunpack.c.h.s8.bf16 %v2022_v51  ;;  %v2119_v17 = vld [vmem:[%s5018_s21 + $0x778] sm:$0xff] }
 0x4ca   : > { %v3405_v18 = vmul.f32 %v3346_v59, %v2974_v9  ;;  %v2976_v19 = vadd.f32 %v2975_v14, %v2934_v16  ;;  %v2936_v21 = vpop.f32.mrf.mxu1  ;;  %3269 = vmatprep.subr.bf16.mxu0 %v2503_v60  ;;  %v2407_v60 = vunpack.c.l.s8.bf16 %v2023_v44  ;;  %v2006_v9 = vld [vmem:[%s5018_s21 + $0x3f0] sm:$0xff]  ;;  %v2647_v16 = vunpack.c.h.s8.bf16 %v2135_v5 }
 0x4cb   : > { %v2977_v57 = vpop.f32.mrf.mxu0  ;;  %3229 = vmatpush1.bf16.msra.mxu1 %v2246_v2  ;;  %v2391_v2 = vunpack.c.h.s8.bf16 %v2007_v63  ;;  %v2631_v14 = vunpack.c.l.s8.bf16 %v2135_v5  ;;  %v1990_v21 = vld [vmem:[%s5018_s21 + $0x370] sm:$0xff] }
 0x4cc   : > { %v3503_v23 = vadd.f32 %v3444_v7, %v3405_v18  ;;  %v3406_v24 = vmul.f32 %v3350_v10, %v2976_v19  ;;  %3270 = vmatpush1.bf16.msra.mxu0 %v2502_v11  ;;  %v2937_v25 = vpop.f32.mrf.mxu1  ;;  %3230 = vmatprep.subr.bf16.mxu1 %v2231_v12  ;;  %v2406_v7 = vunpack.c.l.s8.bf16 %v2022_v51  ;;  %v2134_v10 = vld [vmem:[%s5018_s21 + $0x7f0] sm:$0xff]  ;;  %v2390_v11 = vunpack.c.h.s8.bf16 %v2006_v9 }
 0x4cd   : > { %v2978_v28 = vpop.f32.mrf.mxu0  ;;  %3271 = vmatprep.subr.bf16.mxu0 %v2487_v15  ;;  %v2646_v12 = vunpack.c.h.s8.bf16 %v2134_v10  ;;  %v1991_v15 = vld [vmem:[%s5018_s21 + $0x378] sm:$0xff]  ;;  %v2374_v18 = vunpack.c.l.s8.bf16 %v2006_v9  ;;  %v2630_v19 = vunpack.c.l.s8.bf16 %v2134_v10  ;;  %v2615_v57 = vunpack.c.h.s8.bf16 %v2119_v17  ;;  %v1958_v44 = vld [vmem:[%s5018_s21 + $0x270] sm:$0xff] }
 0x4ce   : > { %4353 = vtanh.f32 %v3503_v23  ;;  %v3504_v31 = vadd.f32 %v3448_v20, %v3406_v24  ;;  %v2359_v20 = vunpack.c.h.s8.bf16 %v1991_v15  ;;  %v2358_v23 = vunpack.c.h.s8.bf16 %v1990_v21  ;;  %v2103_v28 = vld [vmem:[%s5018_s21 + $0x6f8] sm:$0xff] }
 0x4cf   : > { %3231 = vmatpush1.bf16.msra.mxu1 %v2230_v22  ;;  %v2118_v22 = vld [vmem:[%s5018_s21 + $0x770] sm:$0xff]  ;;  %v2343_v25 = vunpack.c.l.s8.bf16 %v1991_v15  ;;  %v2567_v38 = vunpack.c.l.s8.bf16 %v2103_v28 }
 0x4d0   : > { %4355 = vtanh.f32 %v3504_v31  ;;  %3272 = vmatpush1.bf16.msra.mxu0 %v2486_v58  ;;  %3232 = vmatprep.subr.bf16.mxu1 %v2215_v27  ;;  %v2614_v24 = vunpack.c.h.s8.bf16 %v2118_v22  ;;  %v2599_v58 = vunpack.c.l.s8.bf16 %v2119_v17  ;;  %v1975_v27 = vld [vmem:[%s5018_s21 + $0x2f8] sm:$0xff]  ;;  %v2598_v30 = vunpack.c.l.s8.bf16 %v2118_v22 }
 0x4d1   : > { %3273 = vmatprep.subr.bf16.mxu0 %v2471_v29  ;;  %v2342_v29 = vunpack.c.l.s8.bf16 %v1990_v21  ;;  %v2327_v31 = vunpack.c.h.s8.bf16 %v1975_v27 }
 0x4d3   : > { %3233 = vmatpush1.bf16.msra.mxu1 %v2214_v33  ;;  %v2583_v33 = vunpack.c.h.s8.bf16 %v2103_v28 }
 0x4d4   : > { %3274 = vmatpush1.bf16.msra.mxu0 %v2470_v34  ;;  %3234 = vmatprep.subr.bf16.mxu1 %v2199_v35  ;;  %v2102_v34 = vld [vmem:[%s5018_s21 + $0x6f0] sm:$0xff]  ;;  %v2326_v35 = vunpack.c.h.s8.bf16 %v1974_v32 }
 0x4d5   : > { %3275 = vmatprep.subr.bf16.mxu0 %v2455_v37  ;;  %v2582_v26 = vunpack.c.h.s8.bf16 %v2102_v34  ;;  %v2311_v37 = vunpack.c.l.s8.bf16 %v1975_v27 }
 0x4d7   : > { %3235 = vmatpush1.bf16.msra.mxu1 %v2198_v3  ;;  %v1959_v3 = vld [vmem:[%s5018_s21 + $0x278] sm:$0xff] }
 0x4d8   : > { %3276 = vmatpush1.bf16.msra.mxu0 %v2454_v0  ;;  %3236 = vmatprep.subr.bf16.mxu1 %v2183_v41  ;;  %v2087_v0 = vld [vmem:[%s5018_s21 + $0x678] sm:$0xff]  ;;  %v2310_v41 = vunpack.c.l.s8.bf16 %v1974_v32  ;;  %v2295_v43 = vunpack.c.h.s8.bf16 %v1959_v3 }
 0x4d9   : > { %3277 = vmatprep.subr.bf16.mxu0 %v2439_v42  ;;  %v2566_v42 = vunpack.c.l.s8.bf16 %v2102_v34  ;;  %v2535_v51 = vunpack.c.l.s8.bf16 %v2087_v0 }
 0x4db   : > { %v4354_v53 = vpop.eup %4353  ;;  %3237 = vmatpush1.bf16.msra.mxu1 %v2182_v45  ;;  %v2551_v45 = vunpack.c.h.s8.bf16 %v2087_v0 }
 0x4dc   : > { %3535 = vst [vmem:[%s5282_s17 + $0x30] sm:$0xff] %v4354_v53  ;;  %3278 = vmatpush1.bf16.msra.mxu0 %v2438_v46  ;;  %3238 = vmatprep.subr.bf16.mxu1 %v2167_v47  ;;  %v2086_v46 = vld [vmem:[%s5018_s21 + $0x670] sm:$0xff]  ;;  %v2294_v47 = vunpack.c.h.s8.bf16 %v1958_v44  ;;  %v2278_v53 = vunpack.c.l.s8.bf16 %v1958_v44  ;;  %s4643_s21 = scalar_lea.vmem %s4642_s20, 4096 }
 0x4dd   : > { %v4356_v59 = vpop.eup %4355  ;;  %3279 = vmatprep.subr.bf16.mxu0 %v2423_v50  ;;  %v2550_v48 = vunpack.c.h.s8.bf16 %v2086_v46  ;;  %v2279_v50 = vunpack.c.l.s8.bf16 %v1959_v3  ;;  %p4645_p0 = scmp.lt.s32.totalorder %s4643_s21, %s4637_s0 }
 0x4de   : > { %3536 = vst [vmem:[%s5282_s17 + $0x38] sm:$0xff] %v4356_v59 }
 0x4df   : > { %3239 = vmatpush1.bf16.msra.mxu1 %v2166_v54  ;;  %v2534_v54 = vunpack.c.l.s8.bf16 %v2086_v46  ;;  %p4646_p2 = por %p4645_p0, %p4644_p6 }
 0x4e0   : > { %3280 = vmatpush1.bf16.msra.mxu0 %v2422_v55  ;;  %3240 = vmatprep.subr.bf16.mxu1 %v2151_v56  ;;  %v5451_v55 = vld [vmem:[%s5247_s28 + $0x8] sm:$0xff] }
 0x4e1   : > { %3281 = vmatprep.subr.bf16.mxu0 %v2407_v60  ;;  %v5454_v56 = vld [vmem:[%s5252_s11 + $0x8] sm:$0xff]  ;;  %v3354_v60 = vrot.slane %v5451_v55, %v5075_v8  ;;  %p4647_p8 = pnand %p4646_p2, %p4640_p10 }
 0x4e2   : > { %v3464_v27 = vrot.slane %v5454_v56, %v5118_v36 }
 0x4e3   : > { %3241 = vmatpush1.bf16.msra.mxu1 %v2150_v6  ;;  %v3452_v6 = vrot.slane %v5454_v56, %v5075_v8 }
 0x4e4   : > { %3282 = vmatpush1.bf16.msra.mxu0 %v2406_v7  ;;  %3242 = vmatprep.subr.bf16.mxu1 %v2391_v2  ;;  %v3358_v2 = vrot.slane %v5451_v55, %v5078_v40 }
 0x4e5   : > { %3283 = vmatprep.subr.bf16.mxu0 %v2647_v16 }
 0x4e7   : > { %3243 = vmatpush2.bf16.msra.mxu1 %v2390_v11  ;;  %v3456_v11 = vrot.slane %v5454_v56, %v5078_v40  ;;  %v3460_v40 = vrot.slane %v5454_v56, %v5115_v4 }
 0x4e8   : > { %3284 = vmatpush2.bf16.msra.mxu0 %v2646_v12  ;;  %3244 = vmatprep.subr.bf16.mxu1 %v2375_v13 }
 0x4e9   : > { %3285 = vmatprep.subr.bf16.mxu0 %v2631_v14 }
 0x4eb   : > { %3245 = vmatpush2.bf16.msra.mxu1 %v2374_v18 }
 0x4ec   : > { %3286 = vmatpush2.bf16.msra.mxu0 %v2630_v19  ;;  %3246 = vmatprep.subr.bf16.mxu1 %v2359_v20  ;;  %v3362_v20 = vrot.slane %v5451_v55, %v5115_v4 }
 0x4ed   : > { %3287 = vmatprep.subr.bf16.mxu0 %v2615_v57 }
 0x4ef   : > { %3247 = vmatpush2.bf16.msra.mxu1 %v2358_v23  ;;  %v3366_v23 = vrot.slane %v5451_v55, %v5118_v36  ;;  %v3468_v36 = vrot.slane %v5454_v56, %v5353_v1 }
 0x4f0   : > { %3288 = vmatpush2.bf16.msra.mxu0 %v2614_v24  ;;  %3248 = vmatprep.subr.bf16.mxu1 %v2343_v25 }
 0x4f1   : > { %3289 = vmatprep.subr.bf16.mxu0 %v2599_v58 }
 0x4f3   : > { %3249 = vmatpush2.bf16.msra.mxu1 %v2342_v29 }
 0x4f4   : > { %3290 = vmatpush2.bf16.msra.mxu0 %v2598_v30  ;;  %3250 = vmatprep.subr.bf16.mxu1 %v2327_v31 }
 0x4f5   : > { %3291 = vmatprep.subr.bf16.mxu0 %v2583_v33 }
 0x4f7   : > { %3251 = vmatpush2.bf16.msra.mxu1 %v2326_v35 }
 0x4f8   : > { %3292 = vmatpush2.bf16.msra.mxu0 %v2582_v26  ;;  %3252 = vmatprep.subr.bf16.mxu1 %v2311_v37  ;;  %v3370_v37 = vrot.slane %v5451_v55, %v5353_v1 }
 0x4f9   : > { %3293 = vmatprep.subr.bf16.mxu0 %v2567_v38 }
 0x4fb   : > { %3253 = vmatpush2.bf16.msra.mxu1 %v2310_v41  ;;  %v3374_v41 = vrot.slane %v5451_v55, %v5356_v39 }
 0x4fc   : > { %3294 = vmatpush2.bf16.msra.mxu0 %v2566_v42  ;;  %3254 = vmatprep.subr.bf16.mxu1 %v2295_v43 }
 0x4fd   : > { %3295 = vmatprep.subr.bf16.mxu0 %v2551_v45  ;;  %v3472_v45 = vrot.slane %v5454_v56, %v5356_v39  ;;  %v3476_v39 = vrot.slane %v5454_v56, %v5405_v49 }
 0x4ff   : > { %3255 = vmatpush2.bf16.msra.mxu1 %v2294_v47 }
 0x500   : > { %3296 = vmatpush2.bf16.msra.mxu0 %v2550_v48  ;;  %3256 = vmatprep.subr.bf16.mxu1 %v2279_v50 }
 0x501   : > { %3297 = vmatprep.subr.bf16.mxu0 %v2535_v51 }
 0x503   : > { %3257 = vmatpush2.bf16.msra.mxu1 %v2278_v53 }
 0x504   : > { %3298 = vmatpush2.bf16.msra.mxu0 %v2534_v54 }
 0x506   : > { %v3014_v59 = vpop.f32.mrf.mxu1  ;;  %3259 = vmatmul.mubr.bf16.vlgmr.msra.gmra.mxu1 %v5130_v61 }
 0x507   : > { %v3055_v63 = vpop.f32.mrf.mxu0  ;;  %3300 = vmatmul.mubr.bf16.vlgmr.msra.gmra.mxu0 %v5132_v62 }
 0x508   : > { %v3056_v5 = vadd.f32 %v3055_v63, %v3014_v59  ;;  %v3016_v7 = vpop.f32.mrf.mxu1  ;;  %v3378_v63 = vrot.slane %v5451_v55, %v5405_v49 }
 0x509   : > { %v3057_v9 = vpop.f32.mrf.mxu0 }
 0x50a   : > { %v3407_v16 = vmul.f32 %v3354_v60, %v3056_v5  ;;  %v3058_v10 = vadd.f32 %v3057_v9, %v3016_v7  ;;  %v3018_v61 = vpop.f32.mrf.mxu1 }
 0x50b   : > { %v3059_v12 = vpop.f32.mrf.mxu0 }
 0x50c   : > { %v3505_v13 = vadd.f32 %v3452_v6, %v3407_v16  ;;  %v3408_v62 = vmul.f32 %v3358_v2, %v3058_v10  ;;  %v3019_v14 = vpop.f32.mrf.mxu1  ;;  %v3382_v2 = vrot.slane %v5451_v55, %v5408_v52 }
 0x50d   : > { %v3060_v15 = vpop.f32.mrf.mxu0 }
 0x50e   : > { %4357 = vtanh.f32 %v3505_v13  ;;  %v3506_v8 = vadd.f32 %v3456_v11, %v3408_v62  ;;  %v3480_v11 = vrot.slane %v5454_v56, %v5408_v52 }
 0x510   : > { %4359 = vtanh.f32 %v3506_v8 }
 0x51b   : > { %v4358_v17 = vpop.eup %4357 }
 0x51c   : > { %3537 = vst [vmem:[%s5282_s17 + $0x40] sm:$0xff] %v4358_v17 }
 0x51d   : > { %v4360_v18 = vpop.eup %4359 }
 0x51e   : > { %3538 = vst [vmem:[%s5282_s17 + $0x48] sm:$0xff] %v4360_v18 }
 0x546   : > { %v3096_v19 = vpop.f32.mrf.mxu1 }
 0x547   : > { %v3137_v21 = vpop.f32.mrf.mxu0 }
 0x548   : > { %v3138_v57 = vadd.f32 %v3137_v21, %v3096_v19  ;;  %v3098_v22 = vpop.f32.mrf.mxu1 }
 0x549   : > { %v3139_v24 = vpop.f32.mrf.mxu0 }
 0x54a   : > { %v3409_v25 = vmul.f32 %v3362_v20, %v3138_v57  ;;  %v3140_v58 = vadd.f32 %v3139_v24, %v3098_v22  ;;  %v3100_v28 = vpop.f32.mrf.mxu1 }
 0x54b   : > { %v3141_v29 = vpop.f32.mrf.mxu0 }
 0x54c   : > { %v3507_v30 = vadd.f32 %v3460_v40, %v3409_v25  ;;  %v3410_v31 = vmul.f32 %v3366_v23, %v3140_v58  ;;  %v3101_v32 = vpop.f32.mrf.mxu1 }
 0x54d   : > { %v3142_v33 = vpop.f32.mrf.mxu0 }
 0x54e   : > { %4361 = vtanh.f32 %v3507_v30  ;;  %v3508_v4 = vadd.f32 %v3464_v27, %v3410_v31 }
 0x550   : > { %4363 = vtanh.f32 %v3508_v4 }
 0x55b   : > { %v4362_v34 = vpop.eup %4361 }
 0x55c   : > { %3539 = vst [vmem:[%s5282_s17 + $0x50] sm:$0xff] %v4362_v34 }
 0x55d   : > { %v4364_v35 = vpop.eup %4363 }
 0x55e   : > { %3540 = vst [vmem:[%s5282_s17 + $0x58] sm:$0xff] %v4364_v35 }
 0x586   : > { %v3178_v26 = vpop.f32.mrf.mxu1 }
 0x587   : > { %v3219_v38 = vpop.f32.mrf.mxu0 }
 0x588   : > { %v3220_v3 = vadd.f32 %v3219_v38, %v3178_v26  ;;  %v3180_v0 = vpop.f32.mrf.mxu1 }
 0x589   : > { %v3221_v42 = vpop.f32.mrf.mxu0 }
 0x58a   : > { %v3411_v43 = vmul.f32 %v3370_v37, %v3220_v3  ;;  %v3222_v44 = vadd.f32 %v3221_v42, %v3180_v0  ;;  %v3182_v46 = vpop.f32.mrf.mxu1 }
 0x58b   : > { %v3223_v47 = vpop.f32.mrf.mxu0 }
 0x58c   : > { %v3509_v48 = vadd.f32 %v3468_v36, %v3411_v43  ;;  %v3412_v50 = vmul.f32 %v3374_v41, %v3222_v44  ;;  %v3183_v51 = vpop.f32.mrf.mxu1 }
 0x58d   : > { %v3224_v53 = vpop.f32.mrf.mxu0 }
 0x58e   : > { %4365 = vtanh.f32 %v3509_v48  ;;  %v3510_v1 = vadd.f32 %v3472_v45, %v3412_v50 }
 0x590   : > { %4367 = vtanh.f32 %v3510_v1 }
 0x59b   : > { %v4366_v54 = vpop.eup %4365 }
 0x59c   : > { %3541 = vst [vmem:[%s5282_s17 + $0x60] sm:$0xff] %v4366_v54 }
 0x59d   : > { %v4368_v59 = vpop.eup %4367 }
 0x59e   : > { %3542 = vst [vmem:[%s5282_s17 + $0x68] sm:$0xff] %v4368_v59 }
 0x5c6   : > { %v3260_v60 = vpop.f32.mrf.mxu1 }
 0x5c7   : > { %v3301_v5 = vpop.f32.mrf.mxu0 }
 0x5c8   : > { %v3302_v6 = vadd.f32 %v3301_v5, %v3260_v60  ;;  %v3262_v7 = vpop.f32.mrf.mxu1 }
 0x5c9   : > { %v3303_v9 = vpop.f32.mrf.mxu0 }
 0x5ca   : > { %v3413_v16 = vmul.f32 %v3378_v63, %v3302_v6  ;;  %v3304_v10 = vadd.f32 %v3303_v9, %v3262_v7  ;;  %v3264_v61 = vpop.f32.mrf.mxu1 }
 0x5cb   : > { %v3305_v12 = vpop.f32.mrf.mxu0 }
 0x5cc   : > { %v3511_v13 = vadd.f32 %v3476_v39, %v3413_v16  ;;  %v3414_v62 = vmul.f32 %v3382_v2, %v3304_v10  ;;  %v3265_v49 = vpop.f32.mrf.mxu1 }
 0x5cd   : > { %v3306_v14 = vpop.f32.mrf.mxu0 }
 0x5ce   : > { %4369 = vtanh.f32 %v3511_v13  ;;  %v3512_v15 = vadd.f32 %v3480_v11, %v3414_v62 }
 0x5d0   : > { %4371 = vtanh.f32 %v3512_v15 }
 0x5db   : > { %v4370_v55 = vpop.eup %4369 }
 0x5dc   : > { %3543 = vst [vmem:[%s5282_s17 + $0x70] sm:$0xff] %v4370_v55 }
 0x5dd   : > { %v4372_v52 = vpop.eup %4371 }
 0x5de   : > { %3544 = vst [vmem:[%s5282_s17 + $0x78] sm:$0xff] %v4372_v52 }
 0x5df   : > { %4650 = shalt.err (!%p4647_p8)
}
 0x5e0   : > { %s4651_s19 = scalar_lea.hbm %s5502_s3, 2048  ;;  %s4655_s27 = scalar_lea.hbm %s5551_s10, 4096 }
 0x5e1   : > { %p4652_p9 = scmp.ne.s32.totalorder %s5502_s3, %s4651_s19  ;;  %p4656_p13 = scmp.lt.s32.totalorder %s5502_s3, %s5551_s10 }
 0x5e2   : > { %p4657_p5 = scmp.lt.s32.totalorder %s4655_s27, %s4651_s19 }
 0x5e3   : > { %p4653_p11 = pnand %p4652_p9, %p5591_p3 }
 0x5e4   : > { %p4658_p1 = por %p4657_p5, %p4656_p13 }
 0x5e5   : > { %p4654_p12 = pneg %p4653_p11 }
 0x5e7   : > { %p4659_p7 = pnand %p4658_p1, %p4654_p12 }
 0x5e9   : > { %4662 = shalt.err (!%p4659_p7)
}
 0x5ea   : > { %3969 = dma.vmem_to_hbm [thread:$0]  (%p5591_p3), %s3561_s25, 2048, %s5502_s3, %s3546_s4  }
 0x5eb PF: > { %s3572_s24 = sand.u32 1, %s4713_s13   ;;  %p5592_p4 = scmp.ne.s32.totalorder %s5575_s18, 0 }
 0x5ec   : > { %p5593_p10 = scmp.ge.s32.totalorder %s4725_s16, 2  ;;  %s3573_s17 = scalar_lea.sflag [#allocation4], %s3572_s24 }
 0x5ee   : > { %p4004_p6 = pnand %p5593_p10, %p5592_p4 }
 0x5f0   : > { %p4005_p0 = pneg %p4004_p6 }
 0x5f2   : > { %4708 = dma.done.wait (%p4005_p0), %s3573_s17, 2048  }
 0x5f3   : > { %4710 = vsyncadd (%p4005_p0), %s3573_s17, 4294965248  ;;  %p28_p2 = scmp.ge.s32.totalorder %s4930_s23, 4   ;;  %s5594_s13 = smov %s4717_s14 }
 0x5f4   : > { %s5595_s14 = smov %s4721_s15  ;;  %s5596_s15 = smov %s4942_s12 }
 0x5f5   : > { %s5597_s16 = smov %s4930_s23  ;;  %30 = sbr.rel (!%p28_p2) target bundleno = 16 (0x10), region = 144 }
 0x5fa   :  { %3578 = vsyncpa [#allocation3], 1 }
 0x5fb   :  { %3580 = vsyncpa [#allocation3 + $0x1], 1 }
 0x5fc   :  { %3581 = vsyncpa [#allocation6], 1 }
 0x5fd   :  { %3582 = vsyncpa [#allocation9], 1 }
 0x5fe   :  { %3583 = vsyncpa [#allocation12], 1 }
 0x5ff   :  { %3584 = vsyncpa [#allocation15], 1 }
 0x600   :  { %3586 = vsyncpa [#allocation15 + $0x1], 1 }
 0x601   :  { %3587 = vsyncpa [#allocation18], 1 }
 0x602   :  { %3588 = vsyncpa [#allocation4], 1 }
 0x603   :  { %3590 = vsyncpa [#allocation4 + $0x1], 1 }

</bundles_post_ra>
